<compile_context>
chip_gen: v7x
topology: tpu7x:2x2x1
jax: 0.10.0
libtpu: 0.0.40
codegen_flags: <defaults>
</compile_context>

<pallas_src>
import functools

import jax
import jax.numpy as jnp
from jax.experimental import pallas as pl
from jax.experimental.pallas import tpu as pltpu

IDENTITY_WEIGHT = 0.5          # config_parser.getfloat('training.losses', 'identity_weight')
CROP = (30, 0, 10, 10)         # (top, bottom, left, right) used by calculate_embedding
EMBED_DIM = 256                # synthetic embedder output dim
EPS = 1e-8                     # torch.cosine_similarity default eps
K_ALIGN = 256                  # pad contraction dim to a multiple of this


def _identity_loss_kernel(x_ref, wq_ref, ws_ref, loss_ref, wloss_ref,
                          *, batch, identity_weight):
    # int8 -> bf16 dequant (VPU cast; exact for |q| <= 127). Materialised once,
    # reused by both matmuls below.
    w = wq_ref[...].astype(jnp.bfloat16)                        # (K, D)

    # Two skinny MXU matmuls against the shared weight tile; the source/output
    # split lives on the untiled leading axis of x_ref, so no mid-tile slicing.
    es = jnp.dot(x_ref[0], w, preferred_element_type=jnp.float32)   # (B, D) f32
    eo = jnp.dot(x_ref[1], w, preferred_element_type=jnp.float32)   # (B, D) f32

    # Per-column f32 dequant scale applied in the f32 epilogue.
    scale = ws_ref[...]                                         # (1, D)
    es = es * scale
    eo = eo * scale

    dot = jnp.sum(es * eo, axis=-1, keepdims=True)              # (B, 1)
    ns2 = jnp.sum(es * es, axis=-1, keepdims=True)              # (B, 1) ||es||^2
    no2 = jnp.sum(eo * eo, axis=-1, keepdims=True)              # (B, 1) ||eo||^2

    # max(sqrt(n2), eps) == sqrt(max(n2, eps^2)); rsqrt runs on the EUP slot.
    # (Per-norm clamp == current torch.cosine_similarity semantics.)
    inv_ns = jax.lax.rsqrt(jnp.maximum(ns2, EPS * EPS))
    inv_no = jax.lax.rsqrt(jnp.maximum(no2, EPS * EPS))
    cos = dot * inv_ns * inv_no                                 # (B, 1)

    loss = jnp.sum(1.0 - cos) * (1.0 / batch)                   # scalar mean
    loss_ref[0, 0] = loss
    wloss_ref[0, 0] = loss * identity_weight


def prepare_embedder_weight(w_embed):
    """One-time parameter setup (NOT per step).

    Per-column symmetric int8 quantisation + f32 scales, with the contraction
    dim zero-padded to a multiple of 256.  The int8 stream halves the HBM
    traffic of bf16 storage (which dominates this kernel); accumulation stays
    f32 on the MXU and the scales are re-applied in the f32 epilogue.
    """
    K, D = w_embed.shape
    k_pad = ((K + K_ALIGN - 1) // K_ALIGN) * K_ALIGN
    amax = jnp.max(jnp.abs(w_embed), axis=0, keepdims=True)     # (1, D)
    scale = jnp.maximum(amax, 1e-12) / 127.0                    # (1, D) f32
    w_q = jnp.clip(jnp.round(w_embed / scale), -127, 127).astype(jnp.int8)
    w_q = jnp.pad(w_q, ((0, k_pad - K), (0, 0)))                # zero rows: exact
    return w_q, scale.astype(jnp.float32)


@functools.partial(jax.jit, static_argnames=("identity_weight",))
def identity_loss(source_nchw, output_nchw, w_q, w_scale,
                  identity_weight=IDENTITY_WEIGHT):
    """Returns (identity_loss, weighted_identity_loss) as f32 scalars.

    Jitted so the crop / reshape / bf16 cast / stack prep fuses with the
    pallas_call (in a real trainer this sits inside the training-step jit).
    """
    top, bottom, left, right = CROP
    B, C, H, W = source_nchw.shape
    K_pad, D = w_q.shape

    def crop_flat(x):
        xc = x[:, :, top:H - bottom, left:W - right]            # crop, NCHW
        xf = xc.reshape(B, -1).astype(jnp.bfloat16)             # [B, K] bf16
        return jnp.pad(xf, ((0, 0), (0, K_pad - xf.shape[1])))  # zero cols: exact

    # Stack on an untiled leading axis: (2, B, K_pad) bf16 (~36 KB at B=2).
    x = jnp.stack([crop_flat(source_nchw), crop_flat(output_nchw)], axis=0)

    kernel = functools.partial(_identity_loss_kernel, batch=B,
                               identity_weight=float(identity_weight))

    bytes_accessed = (K_pad * D * 1            # W int8
                      + 2 * B * K_pad * 2      # stacked crops bf16
                      + D * 4                  # column scales f32
                      + 8)                     # two scalar outputs
    cost = pl.CostEstimate(flops=2 * (2 * B) * K_pad * D,
                           transcendentals=2 * B,
                           bytes_accessed=bytes_accessed)

    # Single invocation (no grid): whole arrays DMA'd to VMEM once.
    #   x      (2, B, K_pad) bf16  ~ 36 KB
    #   W_q    (K_pad, D)    int8  ~ 1.2 MB
    #   scale  (1, D)        f32   ~ 1 KB
    loss, wloss = pl.pallas_call(
        kernel,
        out_shape=(jax.ShapeDtypeStruct((1, 1), jnp.float32),
                   jax.ShapeDtypeStruct((1, 1), jnp.float32)),
        in_specs=[
            pl.BlockSpec(memory_space=pltpu.MemorySpace.VMEM),   # stacked crops
            pl.BlockSpec(memory_space=pltpu.MemorySpace.VMEM),   # W_q int8
            pl.BlockSpec(memory_space=pltpu.MemorySpace.VMEM),   # column scales
        ],
        out_specs=(
            pl.BlockSpec(memory_space=pltpu.MemorySpace.SMEM),   # loss (1,1)
            pl.BlockSpec(memory_space=pltpu.MemorySpace.SMEM),   # weighted loss (1,1)
        ),
        cost_estimate=cost,
    )(x, w_q, w_scale)

    return loss[0, 0], wloss[0, 0]


def _reference(source_nchw, output_nchw, w_embed_f32, identity_weight=IDENTITY_WEIGHT):
    top, bottom, left, right = CROP
    B, C, H, W = source_nchw.shape

    def emb(x):
        xc = x[:, :, top:H - bottom, left:W - right].reshape(B, -1).astype(jnp.float32)
        return xc @ w_embed_f32

    es, eo = emb(source_nchw), emb(output_nchw)
    dot = jnp.sum(es * eo, axis=-1)
    ns = jnp.maximum(jnp.linalg.norm(es, axis=-1), EPS)
    no = jnp.maximum(jnp.linalg.norm(eo, axis=-1), EPS)
    loss = jnp.mean(1.0 - dot / (ns * no))
    return loss, loss * identity_weight


if __name__ == "__main__":
    key = jax.random.PRNGKey(0)
    k1, k2, k3 = jax.random.split(key, 3)

    # Crop is (top=30, left/right=10), so spatial must exceed it: 64x64 images.
    B, C, H, W = 2, 3, 64, 64
    source = jax.random.normal(k1, (B, C, H, W), dtype=jnp.float32)
    output = jax.random.normal(k2, (B, C, H, W), dtype=jnp.float32)

    top, bottom, left, right = CROP
    K = C * (H - top - bottom) * (W - left - right)          # 3 * 34 * 44 = 4488
    w_embed = 0.02 * jax.random.normal(k3, (K, EMBED_DIM), dtype=jnp.float32)

    # One-time "parameter setup" (hoisted out of the per-call path):
    # int8 weights + f32 column scales, K padded 4488 -> 4608.
    w_q, w_scale = prepare_embedder_weight(w_embed)
    w_q, w_scale = jax.block_until_ready((w_q, w_scale))

    loss, wloss = identity_loss(source, output, w_q, w_scale)
    loss, wloss = jax.block_until_ready((loss, wloss))

    # Reference uses the same (dequantised) embedder the kernel sees, with f32
    # activations; remaining error is bf16 activations + bf16 MXU accumulate.
    w_deq = w_q[:K].astype(jnp.float32) * w_scale
    ref_loss, ref_wloss = _reference(source, output, w_deq)
    assert jnp.allclose(loss, ref_loss, rtol=1e-2, atol=1e-2), (loss, ref_loss)
    assert jnp.allclose(wloss, ref_wloss, rtol=1e-2, atol=1e-2), (wloss, ref_wloss)

    print("KERNEL_OK")
</pallas_src>

<mosaic_0001>
module attributes {stable_mosaic.version = 11 : i64} {
  func.func @_identity_loss_kernel(%arg0: memref<2x2x4608xbf16, #tpu.memory_space<vmem>>, %arg1: memref<4608x256xi8, #tpu.memory_space<vmem>>, %arg2: memref<1x256xf32, #tpu.memory_space<vmem>>, %arg3: memref<1x1xf32, #tpu.memory_space<smem>>, %arg4: memref<1x1xf32, #tpu.memory_space<smem>>) attributes {dimension_semantics = [], scalar_prefetch = 0 : i64, scratch_operands = 0 : i64, tpu.core_type = #tpu.core_type<tc>} {
    %c0 = arith.constant 0 : index
    %c0_0 = arith.constant 0 : index
    %0 = vector.load %arg1[%c0, %c0_0] : memref<4608x256xi8, #tpu.memory_space<vmem>>, vector<4608x256xi8>
    %1 = arith.sitofp %0 : vector<4608x256xi8> to vector<4608x256xbf16>
    %c0_1 = arith.constant 0 : index
    %c0_2 = arith.constant 0 : index
    %c0_3 = arith.constant 0 : index
    %2 = vector.load %arg0[%c0_1, %c0_2, %c0_3] : memref<2x2x4608xbf16, #tpu.memory_space<vmem>>, vector<1x2x4608xbf16>
    %3 = vector.shape_cast %2 : vector<1x2x4608xbf16> to vector<2x4608xbf16>
    %cst = arith.constant dense<0.000000e+00> : vector<2x256xf32>
    %4 = tpu.matmul %3, %1, %cst {dimension_numbers = #tpu.dot_dimension_numbers<[1], [0], [0], [1], [0, 0, 1, 1], [], []>} : vector<2x4608xbf16>, vector<4608x256xbf16>, vector<2x256xf32> -> vector<2x256xf32>
    %c1 = arith.constant 1 : index
    %c0_4 = arith.constant 0 : index
    %c0_5 = arith.constant 0 : index
    %5 = vector.load %arg0[%c1, %c0_4, %c0_5] : memref<2x2x4608xbf16, #tpu.memory_space<vmem>>, vector<1x2x4608xbf16>
    %6 = vector.shape_cast %5 : vector<1x2x4608xbf16> to vector<2x4608xbf16>
    %cst_6 = arith.constant dense<0.000000e+00> : vector<2x256xf32>
    %7 = tpu.matmul %6, %1, %cst_6 {dimension_numbers = #tpu.dot_dimension_numbers<[1], [0], [0], [1], [0, 0, 1, 1], [], []>} : vector<2x4608xbf16>, vector<4608x256xbf16>, vector<2x256xf32> -> vector<2x256xf32>
    %c0_7 = arith.constant 0 : index
    %c0_8 = arith.constant 0 : index
    %8 = vector.load %arg2[%c0_7, %c0_8] : memref<1x256xf32, #tpu.memory_space<vmem>>, vector<1x256xf32>
    %9 = vector.broadcast %8 : vector<1x256xf32> to vector<2x256xf32>
    %10 = arith.mulf %4, %9 : vector<2x256xf32>
    %11 = vector.broadcast %8 : vector<1x256xf32> to vector<2x256xf32>
    %12 = arith.mulf %7, %11 : vector<2x256xf32>
    %13 = arith.mulf %10, %12 : vector<2x256xf32>
    %cst_9 = arith.constant dense<0.000000e+00> : vector<2xf32>
    %14 = vector.multi_reduction <add>, %13, %cst_9 [1] : vector<2x256xf32> to vector<2xf32>
    %15 = vector.shape_cast %14 : vector<2xf32> to vector<2x1xf32>
    %16 = arith.mulf %10, %10 : vector<2x256xf32>
    %cst_10 = arith.constant dense<0.000000e+00> : vector<2xf32>
    %17 = vector.multi_reduction <add>, %16, %cst_10 [1] : vector<2x256xf32> to vector<2xf32>
    %18 = vector.shape_cast %17 : vector<2xf32> to vector<2x1xf32>
    %19 = arith.mulf %12, %12 : vector<2x256xf32>
    %cst_11 = arith.constant dense<0.000000e+00> : vector<2xf32>
    %20 = vector.multi_reduction <add>, %19, %cst_11 [1] : vector<2x256xf32> to vector<2xf32>
    %21 = vector.shape_cast %20 : vector<2xf32> to vector<2x1xf32>
    %cst_12 = arith.constant 1.000000e-16 : f32
    %22 = vector.broadcast %cst_12 : f32 to vector<2x1xf32>
    %23 = arith.maximumf %18, %22 : vector<2x1xf32>
    %24 = math.rsqrt %23 : vector<2x1xf32>
    %cst_13 = arith.constant 1.000000e-16 : f32
    %25 = vector.broadcast %cst_13 : f32 to vector<2x1xf32>
    %26 = arith.maximumf %21, %25 : vector<2x1xf32>
    %27 = math.rsqrt %26 : vector<2x1xf32>
    %28 = arith.mulf %15, %24 : vector<2x1xf32>
    %29 = arith.mulf %28, %27 : vector<2x1xf32>
    %cst_14 = arith.constant 1.000000e+00 : f32
    %30 = vector.broadcast %cst_14 : f32 to vector<2x1xf32>
    %31 = arith.subf %30, %29 : vector<2x1xf32>
    %32 = vector.shape_cast %31 : vector<2x1xf32> to vector<1x2x1xf32>
    %cst_15 = arith.constant dense<0.000000e+00> : vector<1xf32>
    %33 = vector.multi_reduction <add>, %32, %cst_15 [1, 2] : vector<1x2x1xf32> to vector<1xf32>
    %34 = vector.shape_cast %33 : vector<1xf32> to vector<1x1x1xf32>
    %35 = vector.extract %34[0, 0, 0] : f32 from vector<1x1x1xf32>
    %cst_16 = arith.constant 5.000000e-01 : f32
    %36 = arith.mulf %35, %cst_16 : f32
    %c0_17 = arith.constant 0 : index
    %c0_18 = arith.constant 0 : index
    %37 = memref.load %arg3[%c0_17, %c0_18] : memref<1x1xf32, #tpu.memory_space<smem>>
    memref.store %36, %arg3[%c0_17, %c0_18] : memref<1x1xf32, #tpu.memory_space<smem>>
    %cst_19 = arith.constant 5.000000e-01 : f32
    %38 = arith.mulf %36, %cst_19 : f32
    %c0_20 = arith.constant 0 : index
    %c0_21 = arith.constant 0 : index
    %39 = memref.load %arg4[%c0_20, %c0_21] : memref<1x1xf32, #tpu.memory_space<smem>>
    memref.store %38, %arg4[%c0_20, %c0_21] : memref<1x1xf32, #tpu.memory_space<smem>>
    return
  }
}

</mosaic_0001>

<bundles_post_ra>
// kernel: identity_loss.1
= control target key start
LH: loop header
LB: loop body
LE: loop exit
PB: predicated region body
PF: predicated region fallthrough
CT: control target
= control target key end

     0   :  { %10 = vsyncpa [#allocation3], 0  ;;  %s3721_s0 = inlined_call_operand.vmem [shape: bf16[2,2,4608], index: 0, kind: input, shape index: {}]   ;;  %s3722_s1 = inlined_call_operand.hbm [shape: s8[4608,256], index: 1, kind: input, shape index: {}]   ;;  %s3723_s2 = inlined_call_operand.hbm [shape: f32[1,256], index: 2, kind: input, shape index: {}]   ;;  %s3724_s3 = inlined_call_operand.hbm [shape: f32[1,1], index: 3, kind: output, shape index: {0}]   ;;  %s3725_s4 = inlined_call_operand.hbm [shape: f32[1,1], index: 4, kind: output, shape index: {1}]  }
   0x1   :  { %11 = vsyncpa [#allocation6], 0 }
   0x2   :  { %12 = vsyncpa [#allocation4], 0 }
   0x3   :  { %13 = vsyncpa [#allocation9], 0  ;;  %s3242_s15 = smov [#allocation2]   ;;  %s3170_s19 = scalar_lea.hbm %s3722_s1, 36864 }
   0x4   :  { %s21_s16 = sshll.u32 %s3242_s15, 4  ;;  %p3171_p0 = scmp.ne.s32.totalorder %s3722_s1, %s3170_s19  ;;  %s22_s16 = int_to_ptr.vmem [resolvable:$true] %s21_s16 }
   0x5   :  { %p3174_p1 = scmp.lt.u32.totalorder %s3170_s19, %s3722_s1 }
   0x7   :  { %p3176_p2 = pnand %p3174_p1, %p3171_p0 }
   0x9   :  { %3179 = shalt.err (!%p3176_p2)
}
   0xa   :  { %s3180_s24 = scalar_lea.vmem %s22_s16, 36864  ;;  %p3185_p4 = scmp.lt.s32.totalorder %s22_s16, %s22_s16 }
   0xb   :  { %p3181_p3 = scmp.ne.s32.totalorder %s22_s16, %s3180_s24  ;;  %p3186_p5 = scmp.lt.s32.totalorder %s3180_s24, %s3180_s24 }
   0xd   :  { %p3187_p6 = por %p3186_p5, %p3185_p4 }
   0xf   :  { %p3188_p7 = pnand %p3187_p6, %p3181_p3 }
  0x11   :  { %3191 = shalt.err (!%p3188_p7)
}
  0x12   :  { %s3243_s25 = smov 256   ;;  %s3244_s26 = smov 16  }
  0x13   :  { %27 = dma.hbm_to_vmem [thread:$0]  %s3722_s1, 36864, %s22_s16, [#allocation3], %s3243_s25, %s3243_s25, %s3244_s26  }
  0x14   :  { %s3245_s29 = smov [#allocation5]   ;;  %s3192_s7 = scalar_lea.hbm %s3723_s2, 32 }
  0x15   :  { %s34_s30 = sshll.u32 %s3245_s29, 4  ;;  %p3193_p8 = scmp.ne.s32.totalorder %s3723_s2, %s3192_s7  ;;  %s35_s30 = int_to_ptr.vmem [resolvable:$true] %s34_s30 }
  0x16   :  { %p3196_p9 = scmp.lt.u32.totalorder %s3192_s7, %s3723_s2 }
  0x18   :  { %p3198_p10 = pnand %p3196_p9, %p3193_p8 }
  0x1a   :  { %3201 = shalt.err (!%p3198_p10)
}
  0x1b   :  { %s3202_s12 = scalar_lea.vmem %s35_s30, 32  ;;  %p3207_p12 = scmp.lt.s32.totalorder %s35_s30, %s35_s30 }
  0x1c   :  { %p3203_p11 = scmp.ne.s32.totalorder %s35_s30, %s3202_s12  ;;  %p3208_p13 = scmp.lt.s32.totalorder %s3202_s12, %s3202_s12 }
  0x1e   :  { %p3209_p0 = por %p3208_p13, %p3207_p12 }
  0x20   :  { %p3210_p1 = pnand %p3209_p0, %p3203_p11 }
  0x22   :  { %3213 = shalt.err (!%p3210_p1)
}
  0x23   :  { %37 = dma.hbm_to_vmem [thread:$0]  %s3723_s2, 32, %s35_s30, [#allocation6]  }
  0x24   :  { %3234 = dma.done.wait [#allocation3], 36864  }
  0x25   :  { %3235 = vsyncadd [#allocation3], 4294930432 }
  0x26   :  { %3236 = dma.done.wait [#allocation6], 32  }
  0x27   :  { %3237 = vsyncadd [#allocation6], 4294967264  ;;  %v922_v0 = vlaneseq  ;;  %v3246_v1 = vmov 1966171168   ;;  %v45_v3 = vld [vmem:[#allocation2 + $0x8] sm:$0xff]  ;;  %v44_v4 = vld [vmem:[#allocation2] sm:$0xff] }
  0x28   :  { %v920_v2 = vunpack.c.l.s4 %v3246_v1  ;;  %v333_v6 = vunpack.c.l.s8.bf16 %v45_v3  ;;  %v335_v7 = vunpack.c.h.s8.bf16 %v45_v3  ;;  %v332_v8 = vunpack.c.l.s8.bf16 %v44_v4  ;;  %v47_v10 = vld [vmem:[#allocation2 + $0x18] sm:$0xff]  ;;  %v46_v13 = vld [vmem:[#allocation2 + $0x10] sm:$0xff]  ;;  %v3306_v15 = vld [vmem:[%s3721_s0] sm:$0xff]  ;;  %s3214_s11 = scalar_lea.hbm %s3724_s3, 16 }
  0x29   :  { %v3298_v5 = vshrl.u32 %v922_v0, 7  ;;  %v334_v11 = vunpack.c.h.s8.bf16 %v44_v4  ;;  %v337_v12 = vunpack.c.l.s8.bf16 %v47_v10  ;;  %v3311_v16 = vld [vmem:[%s3721_s0 + $0x24] sm:$0xff]  ;;  %v336_v17 = vunpack.c.l.s8.bf16 %v46_v13  ;;  %v51_v31 = vld [vmem:[#allocation2 + $0x38] sm:$0xff]  ;;  %v50_v34 = vld [vmem:[#allocation2 + $0x30] sm:$0xff]  ;;  %p3215_p2 = scmp.ne.s32.totalorder %s3724_s3, %s3214_s11  ;;  %p3218_p3 = scmp.lt.u32.totalorder %s3214_s11, %s3724_s3 }
  0x2a   :  { %v921_v9 = vunpack.c.0.s8 %v920_v2  ;;  %1174 = vmatprep.subr.bf16.mxu0 %v333_v6  ;;  %2179 = vmatprep.subr.bf16.mxu1 %v333_v6  ;;  %v339_v18 = vunpack.c.h.s8.bf16 %v47_v10  ;;  %v49_v20 = vld [vmem:[#allocation2 + $0x28] sm:$0xff]  ;;  %v338_v23 = vunpack.c.h.s8.bf16 %v46_v13  ;;  %v48_v26 = vld [vmem:[#allocation2 + $0x20] sm:$0xff]  ;;  %v345_v33 = vunpack.c.l.s8.bf16 %v51_v31  ;;  %v55_v43 = vld [vmem:[#allocation2 + $0x58] sm:$0xff] }
  0x2b   :  { %1175 = vmatpush1.bf16.msra.mxu0 %v332_v8  ;;  %2180 = vmatpush1.bf16.msra.mxu1 %v332_v8  ;;  %v341_v25 = vunpack.c.l.s8.bf16 %v49_v20  ;;  %v340_v29 = vunpack.c.l.s8.bf16 %v48_v26  ;;  %v343_v30 = vunpack.c.h.s8.bf16 %v49_v20  ;;  %v342_v32 = vunpack.c.h.s8.bf16 %v48_v26  ;;  %v53_v37 = vld [vmem:[#allocation2 + $0x48] sm:$0xff]  ;;  %v52_v40 = vld [vmem:[#allocation2 + $0x40] sm:$0xff]  ;;  %v54_v46 = vld [vmem:[#allocation2 + $0x50] sm:$0xff]  ;;  %p3220_p4 = pnand %p3218_p3, %p3215_p2 }
  0x2c   :  { %1176 = vmatprep.subr.bf16.mxu0 %v335_v7  ;;  %2181 = vmatprep.subr.bf16.mxu1 %v335_v7  ;;  %v3301_v14 = vsub.s32 %v921_v9, %v3298_v5  ;;  %v344_v35 = vunpack.c.l.s8.bf16 %v50_v34  ;;  %v347_v36 = vunpack.c.h.s8.bf16 %v51_v31  ;;  %v346_v38 = vunpack.c.h.s8.bf16 %v50_v34  ;;  %v57_v49 = vld [vmem:[#allocation2 + $0x68] sm:$0xff]  ;;  %v56_v52 = vld [vmem:[#allocation2 + $0x60] sm:$0xff]  ;;  %v59_v55 = vld [vmem:[#allocation2 + $0x78] sm:$0xff] }
  0x2d   :  { %v349_v39 = vunpack.c.l.s8.bf16 %v53_v37  ;;  %v348_v41 = vunpack.c.l.s8.bf16 %v52_v40  ;;  %v351_v42 = vunpack.c.h.s8.bf16 %v53_v37  ;;  %v350_v44 = vunpack.c.h.s8.bf16 %v52_v40  ;;  %v58_v58 = vld [vmem:[#allocation2 + $0x70] sm:$0xff]  ;;  %v61_v61 = vld [vmem:[#allocation2 + $0x88] sm:$0xff]  ;;  %v60_v0 = vld [vmem:[#allocation2 + $0x80] sm:$0xff] }
  0x2e   :  { %v3315_v19 = vrot.slane %v3306_v15, %v3301_v14  ;;  %v3319_v21 = vrot.slane %v3311_v16, %v3301_v14  ;;  %v353_v45 = vunpack.c.l.s8.bf16 %v55_v43  ;;  %v352_v47 = vunpack.c.l.s8.bf16 %v54_v46  ;;  %v63_v8 = vld [vmem:[#allocation2 + $0x98] sm:$0xff]  ;;  %v64_v20 = vld [vmem:[#allocation2 + $0xa0] sm:$0xff]  ;;  %v66_v26 = vld [vmem:[#allocation2 + $0xb0] sm:$0xff] }
  0x2f   :  { %1177 = vmatpush1.bf16.msra.mxu0 %v334_v11  ;;  %2182 = vmatpush1.bf16.msra.mxu1 %v334_v11  ;;  %v355_v48 = vunpack.c.h.s8.bf16 %v55_v43  ;;  %v354_v50 = vunpack.c.h.s8.bf16 %v54_v46  ;;  %v357_v51 = vunpack.c.l.s8.bf16 %v57_v49  ;;  %v356_v53 = vunpack.c.l.s8.bf16 %v56_v52  ;;  %v62_v11 = vld [vmem:[#allocation2 + $0x90] sm:$0xff] }
  0x30   :  { %1178 = vmatprep.subr.bf16.mxu0 %v337_v12  ;;  %2183 = vmatprep.subr.bf16.mxu1 %v337_v12  ;;  %v933_v22 = vcombine.high %v3315_v19, %v3315_v19  ;;  %v1938_v24 = vcombine.high %v3319_v21, %v3319_v21  ;;  %v359_v54 = vunpack.c.h.s8.bf16 %v57_v49  ;;  %v358_v56 = vunpack.c.h.s8.bf16 %v56_v52 }
  0x31   :  { %v361_v57 = vunpack.c.l.s8.bf16 %v59_v55  ;;  %v360_v59 = vunpack.c.l.s8.bf16 %v58_v58  ;;  %v363_v60 = vunpack.c.h.s8.bf16 %v59_v55  ;;  %v362_v62 = vunpack.c.h.s8.bf16 %v58_v58  ;;  %v77_v55 = vld [vmem:[#allocation2 + $0x108] sm:$0xff] }
  0x32   :  { %v3326_v27 = vrot.slane %v933_v22, %v3301_v14  ;;  %v3329_v28 = vrot.slane %v1938_v24, %v3301_v14  ;;  %v365_v63 = vunpack.c.l.s8.bf16 %v61_v61  ;;  %v3335_v1 = vrot.slane %v3315_v19, %v3301_v14 }
  0x33   :  { %1179 = vmatpush1.bf16.msra.mxu0 %v336_v17  ;;  %2184 = vmatpush1.bf16.msra.mxu1 %v336_v17  ;;  %v3339_v2 = vrot.slane %v3319_v21, %v3301_v14  ;;  %v364_v3 = vunpack.c.l.s8.bf16 %v60_v0  ;;  %v367_v4 = vunpack.c.h.s8.bf16 %v61_v61  ;;  %v366_v9 = vunpack.c.h.s8.bf16 %v60_v0  ;;  %v65_v17 = vld [vmem:[#allocation2 + $0xa8] sm:$0xff] }
  0x34   :  { %1180 = vmatprep.subr.bf16.mxu0 %v339_v18  ;;  %2185 = vmatprep.subr.bf16.mxu1 %v339_v18  ;;  %v965_v6 = vcombine.high %v3326_v27, %v3326_v27  ;;  %v1970_v7 = vcombine.high %v3329_v28, %v3329_v28  ;;  %v369_v10 = vunpack.c.l.s8.bf16 %v63_v8  ;;  %v368_v12 = vunpack.c.l.s8.bf16 %v62_v11 }
  0x35   :  { %1206 = vmatprep.mubr.bf16.mxu0 %v3326_v27  ;;  %2211 = vmatprep.mubr.bf16.mxu1 %v3329_v28  ;;  %v371_v13 = vunpack.c.h.s8.bf16 %v63_v8  ;;  %v370_v18 = vunpack.c.h.s8.bf16 %v62_v11  ;;  %v373_v19 = vunpack.c.l.s8.bf16 %v65_v17  ;;  %v372_v21 = vunpack.c.l.s8.bf16 %v64_v20 }
  0x36   :  { %v375_v22 = vunpack.c.h.s8.bf16 %v65_v17  ;;  %v374_v24 = vunpack.c.h.s8.bf16 %v64_v20  ;;  %v376_v27 = vunpack.c.l.s8.bf16 %v66_v26  ;;  %v1923_v52 = vcombine.high %v3311_v16, %v3311_v16  ;;  %v76_v16 = vld [vmem:[#allocation2 + $0x100] sm:$0xff] }
  0x37   :  { %1181 = vmatpush1.bf16.msra.mxu0 %v338_v23  ;;  %2186 = vmatpush1.bf16.msra.mxu1 %v338_v23  ;;  %v67_v23 = vld [vmem:[#allocation2 + $0xb8] sm:$0xff]  ;;  %v963_v61 = vcombine.high %v3335_v1, %v3335_v1  ;;  %v399_v0 = vunpack.c.h.s8.bf16 %v77_v55  ;;  %vm2935_vm0 = vcmask 1041408   ;;  %vm2962_vm1 = vcmask 1024  }
  0x38   :  { %1182 = vmatprep.subr.bf16.mxu0 %v341_v25  ;;  %2187 = vmatprep.subr.bf16.mxu1 %v341_v25  ;;  %v377_v25 = vunpack.c.l.s8.bf16 %v67_v23  ;;  %v379_v28 = vunpack.c.h.s8.bf16 %v67_v23 }
  0x3b   :  { %1183 = vmatpush1.bf16.msra.mxu0 %v340_v29  ;;  %2188 = vmatpush1.bf16.msra.mxu1 %v340_v29  ;;  %v69_v29 = vld [vmem:[#allocation2 + $0xc8] sm:$0xff] }
  0x3c   :  { %1184 = vmatprep.subr.bf16.mxu0 %v343_v30  ;;  %2189 = vmatprep.subr.bf16.mxu1 %v343_v30  ;;  %v378_v30 = vunpack.c.h.s8.bf16 %v66_v26  ;;  %v381_v31 = vunpack.c.l.s8.bf16 %v69_v29  ;;  %v383_v34 = vunpack.c.h.s8.bf16 %v69_v29 }
  0x3f   :  { %1185 = vmatpush1.bf16.msra.mxu0 %v342_v32  ;;  %2190 = vmatpush1.bf16.msra.mxu1 %v342_v32  ;;  %v68_v32 = vld [vmem:[#allocation2 + $0xc0] sm:$0xff] }
  0x40   :  { %1186 = vmatprep.subr.bf16.mxu0 %v345_v33  ;;  %2191 = vmatprep.subr.bf16.mxu1 %v345_v33  ;;  %v380_v33 = vunpack.c.l.s8.bf16 %v68_v32 }
  0x43   :  { %1187 = vmatpush1.bf16.msra.mxu0 %v344_v35  ;;  %2192 = vmatpush1.bf16.msra.mxu1 %v344_v35  ;;  %v71_v35 = vld [vmem:[#allocation2 + $0xd8] sm:$0xff] }
  0x44   :  { %1188 = vmatprep.subr.bf16.mxu0 %v347_v36  ;;  %2193 = vmatprep.subr.bf16.mxu1 %v347_v36  ;;  %v382_v36 = vunpack.c.h.s8.bf16 %v68_v32  ;;  %v385_v37 = vunpack.c.l.s8.bf16 %v71_v35  ;;  %v387_v40 = vunpack.c.h.s8.bf16 %v71_v35 }
  0x47   :  { %1189 = vmatpush1.bf16.msra.mxu0 %v346_v38  ;;  %2194 = vmatpush1.bf16.msra.mxu1 %v346_v38  ;;  %v70_v38 = vld [vmem:[#allocation2 + $0xd0] sm:$0xff] }
  0x48   :  { %1190 = vmatprep.subr.bf16.mxu0 %v349_v39  ;;  %2195 = vmatprep.subr.bf16.mxu1 %v349_v39  ;;  %v384_v39 = vunpack.c.l.s8.bf16 %v70_v38 }
  0x4b   :  { %1191 = vmatpush1.bf16.msra.mxu0 %v348_v41  ;;  %2196 = vmatpush1.bf16.msra.mxu1 %v348_v41  ;;  %v73_v41 = vld [vmem:[#allocation2 + $0xe8] sm:$0xff] }
  0x4c   :  { %1192 = vmatprep.subr.bf16.mxu0 %v351_v42  ;;  %2197 = vmatprep.subr.bf16.mxu1 %v351_v42  ;;  %v386_v42 = vunpack.c.h.s8.bf16 %v70_v38  ;;  %v389_v43 = vunpack.c.l.s8.bf16 %v73_v41  ;;  %v391_v46 = vunpack.c.h.s8.bf16 %v73_v41 }
  0x4f   :  { %1193 = vmatpush1.bf16.msra.mxu0 %v350_v44  ;;  %2198 = vmatpush1.bf16.msra.mxu1 %v350_v44  ;;  %v72_v44 = vld [vmem:[#allocation2 + $0xe0] sm:$0xff] }
  0x50   :  { %1194 = vmatprep.subr.bf16.mxu0 %v353_v45  ;;  %2199 = vmatprep.subr.bf16.mxu1 %v353_v45  ;;  %v388_v45 = vunpack.c.l.s8.bf16 %v72_v44 }
  0x53   :  { %1195 = vmatpush1.bf16.msra.mxu0 %v352_v47  ;;  %2200 = vmatpush1.bf16.msra.mxu1 %v352_v47  ;;  %v75_v47 = vld [vmem:[#allocation2 + $0xf8] sm:$0xff] }
  0x54   :  { %1196 = vmatprep.subr.bf16.mxu0 %v355_v48  ;;  %2201 = vmatprep.subr.bf16.mxu1 %v355_v48  ;;  %v390_v48 = vunpack.c.h.s8.bf16 %v72_v44  ;;  %v393_v49 = vunpack.c.l.s8.bf16 %v75_v47 }
  0x57   :  { %1197 = vmatpush1.bf16.msra.mxu0 %v354_v50  ;;  %2202 = vmatpush1.bf16.msra.mxu1 %v354_v50  ;;  %v74_v50 = vld [vmem:[#allocation2 + $0xf0] sm:$0xff] }
  0x58   :  { %1198 = vmatprep.subr.bf16.mxu0 %v357_v51  ;;  %2203 = vmatprep.subr.bf16.mxu1 %v357_v51  ;;  %v918_v51 = vcombine.high %v3306_v15, %v3306_v15  ;;  %v394_v58 = vunpack.c.h.s8.bf16 %v74_v50  ;;  %v397_v15 = vunpack.c.l.s8.bf16 %v77_v55 }
  0x5b   :  { %1199 = vmatpush1.bf16.msra.mxu0 %v356_v53  ;;  %2204 = vmatpush1.bf16.msra.mxu1 %v356_v53  ;;  %v392_v53 = vunpack.c.l.s8.bf16 %v74_v50 }
  0x5c   :  { %1200 = vmatprep.subr.bf16.mxu0 %v359_v54  ;;  %2205 = vmatprep.subr.bf16.mxu1 %v359_v54  ;;  %v395_v54 = vunpack.c.h.s8.bf16 %v75_v47 }
  0x5f   :  { %1201 = vmatpush1.bf16.msra.mxu0 %v358_v56  ;;  %2206 = vmatpush1.bf16.msra.mxu1 %v358_v56  ;;  %v3352_v56 = vrot.slane %v918_v51, %v3301_v14 }
  0x60   :  { %1202 = vmatprep.subr.bf16.mxu0 %v361_v57  ;;  %2207 = vmatprep.subr.bf16.mxu1 %v361_v57  ;;  %v3355_v57 = vrot.slane %v1923_v52, %v3301_v14  ;;  %v92_v52 = vld [vmem:[#allocation2 + $0x180] sm:$0xff] }
  0x61   :  { %v428_v55 = vunpack.c.l.s8.bf16 %v92_v52 }
  0x63   :  { %1203 = vmatpush1.bf16.msra.mxu0 %v360_v59  ;;  %2208 = vmatpush1.bf16.msra.mxu1 %v360_v59  ;;  %v934_v59 = vcombine.high %v3352_v56, %v3352_v56 }
  0x64   :  { %1204 = vmatprep.subr.bf16.mxu0 %v363_v60  ;;  %2209 = vmatprep.subr.bf16.mxu1 %v363_v60  ;;  %v1939_v60 = vcombine.high %v3355_v57, %v3355_v57 }
  0x67   :  { %1205 = vmatpush1.bf16.msra.mxu0 %v362_v62  ;;  %2210 = vmatpush1.bf16.msra.mxu1 %v362_v62  ;;  %v1968_v62 = vcombine.high %v3339_v2, %v3339_v2 }
  0x68   :  { %1215 = vmatprep.subr.bf16.mxu0 %v365_v63  ;;  %2220 = vmatprep.subr.bf16.mxu1 %v365_v63  ;;  %v396_v63 = vunpack.c.l.s8.bf16 %v76_v16 }
  0x6a   :  { %1207 = vmatmul.mubr.bf16.vlgmr.msra.gmra.mrb[0].mxu0 %v3335_v1  ;;  %2212 = vmatmul.mubr.bf16.vlgmr.msra.gmra.mrb[0].mxu1 %v3339_v2  ;;  %v398_v1 = vunpack.c.h.s8.bf16 %v76_v16 }
  0x6b   :  { %1216 = vmatpush1.bf16.msra.mxu0 %v364_v3  ;;  %2221 = vmatpush1.bf16.msra.mxu1 %v364_v3  ;;  %v79_v3 = vld [vmem:[#allocation2 + $0x118] sm:$0xff] }
  0x6c   :  { %1217 = vmatprep.subr.bf16.mxu0 %v367_v4  ;;  %2222 = vmatprep.subr.bf16.mxu1 %v367_v4  ;;  %v3366_v4 = vrot.slane %v934_v59, %v3301_v14  ;;  %v401_v2 = vunpack.c.l.s8.bf16 %v79_v3 }
  0x6d   :  { %1247 = vmatprep.mubr.bf16.mxu0 %v965_v6  ;;  %2252 = vmatprep.mubr.bf16.mxu1 %v1970_v7  ;;  %v3369_v6 = vrot.slane %v1939_v60, %v3301_v14  ;;  %v78_v7 = vld [vmem:[#allocation2 + $0x110] sm:$0xff] }
  0x6e   :  { %v400_v8 = vunpack.c.l.s8.bf16 %v78_v7  ;;  %v402_v11 = vunpack.c.h.s8.bf16 %v78_v7  ;;  %v966_v16 = vcombine.high %v3366_v4, %v3366_v4  ;;  %v94_v60 = vld [vmem:[#allocation2 + $0x190] sm:$0xff] }
  0x6f   :  { %1218 = vmatpush1.bf16.msra.mxu0 %v366_v9  ;;  %2223 = vmatpush1.bf16.msra.mxu1 %v366_v9  ;;  %v403_v9 = vunpack.c.h.s8.bf16 %v79_v3  ;;  %v1971_v59 = vcombine.high %v3369_v6, %v3369_v6 }
  0x70   :  { %1219 = vmatprep.subr.bf16.mxu0 %v369_v10  ;;  %2224 = vmatprep.subr.bf16.mxu1 %v369_v10  ;;  %v81_v10 = vld [vmem:[#allocation2 + $0x128] sm:$0xff] }
  0x73   :  { %1220 = vmatpush1.bf16.msra.mxu0 %v368_v12  ;;  %2225 = vmatpush1.bf16.msra.mxu1 %v368_v12  ;;  %v405_v12 = vunpack.c.l.s8.bf16 %v81_v10 }
  0x74   :  { %1221 = vmatprep.subr.bf16.mxu0 %v371_v13  ;;  %2226 = vmatprep.subr.bf16.mxu1 %v371_v13  ;;  %v80_v13 = vld [vmem:[#allocation2 + $0x120] sm:$0xff] }
  0x75   :  { %v404_v17 = vunpack.c.l.s8.bf16 %v80_v13  ;;  %v406_v20 = vunpack.c.h.s8.bf16 %v80_v13 }
  0x77   :  { %1222 = vmatpush1.bf16.msra.mxu0 %v370_v18  ;;  %2227 = vmatpush1.bf16.msra.mxu1 %v370_v18  ;;  %v407_v18 = vunpack.c.h.s8.bf16 %v81_v10 }
  0x78   :  { %1223 = vmatprep.subr.bf16.mxu0 %v373_v19  ;;  %2228 = vmatprep.subr.bf16.mxu1 %v373_v19  ;;  %v83_v19 = vld [vmem:[#allocation2 + $0x138] sm:$0xff] }
  0x7b   :  { %1224 = vmatpush1.bf16.msra.mxu0 %v372_v21  ;;  %2229 = vmatpush1.bf16.msra.mxu1 %v372_v21  ;;  %v409_v21 = vunpack.c.l.s8.bf16 %v83_v19 }
  0x7c   :  { %1225 = vmatprep.subr.bf16.mxu0 %v375_v22  ;;  %2230 = vmatprep.subr.bf16.mxu1 %v375_v22  ;;  %v82_v22 = vld [vmem:[#allocation2 + $0x130] sm:$0xff] }
  0x7d   :  { %v408_v23 = vunpack.c.l.s8.bf16 %v82_v22  ;;  %v410_v26 = vunpack.c.h.s8.bf16 %v82_v22 }
  0x7f   :  { %1226 = vmatpush1.bf16.msra.mxu0 %v374_v24  ;;  %2231 = vmatpush1.bf16.msra.mxu1 %v374_v24  ;;  %v411_v24 = vunpack.c.h.s8.bf16 %v83_v19 }
  0x80   :  { %1227 = vmatprep.subr.bf16.mxu0 %v377_v25  ;;  %2232 = vmatprep.subr.bf16.mxu1 %v377_v25  ;;  %v85_v25 = vld [vmem:[#allocation2 + $0x148] sm:$0xff] }
  0x83   :  { %1228 = vmatpush1.bf16.msra.mxu0 %v376_v27  ;;  %2233 = vmatpush1.bf16.msra.mxu1 %v376_v27  ;;  %v413_v27 = vunpack.c.l.s8.bf16 %v85_v25 }
  0x84   :  { %1229 = vmatprep.subr.bf16.mxu0 %v379_v28  ;;  %2234 = vmatprep.subr.bf16.mxu1 %v379_v28  ;;  %v84_v28 = vld [vmem:[#allocation2 + $0x140] sm:$0xff] }
  0x85   :  { %v412_v29 = vunpack.c.l.s8.bf16 %v84_v28  ;;  %v414_v32 = vunpack.c.h.s8.bf16 %v84_v28 }
  0x87   :  { %1230 = vmatpush1.bf16.msra.mxu0 %v378_v30  ;;  %2235 = vmatpush1.bf16.msra.mxu1 %v378_v30  ;;  %v415_v30 = vunpack.c.h.s8.bf16 %v85_v25 }
  0x88   :  { %1231 = vmatprep.subr.bf16.mxu0 %v381_v31  ;;  %2236 = vmatprep.subr.bf16.mxu1 %v381_v31  ;;  %v87_v31 = vld [vmem:[#allocation2 + $0x158] sm:$0xff] }
  0x8b   :  { %1232 = vmatpush1.bf16.msra.mxu0 %v380_v33  ;;  %2237 = vmatpush1.bf16.msra.mxu1 %v380_v33  ;;  %v417_v33 = vunpack.c.l.s8.bf16 %v87_v31 }
  0x8c   :  { %1233 = vmatprep.subr.bf16.mxu0 %v383_v34  ;;  %2238 = vmatprep.subr.bf16.mxu1 %v383_v34  ;;  %v86_v34 = vld [vmem:[#allocation2 + $0x150] sm:$0xff] }
  0x8d   :  { %v416_v35 = vunpack.c.l.s8.bf16 %v86_v34  ;;  %v418_v38 = vunpack.c.h.s8.bf16 %v86_v34 }
  0x8f   :  { %1234 = vmatpush1.bf16.msra.mxu0 %v382_v36  ;;  %2239 = vmatpush1.bf16.msra.mxu1 %v382_v36  ;;  %v419_v36 = vunpack.c.h.s8.bf16 %v87_v31 }
  0x90   :  { %1235 = vmatprep.subr.bf16.mxu0 %v385_v37  ;;  %2240 = vmatprep.subr.bf16.mxu1 %v385_v37  ;;  %v89_v37 = vld [vmem:[#allocation2 + $0x168] sm:$0xff] }
  0x93   :  { %1236 = vmatpush1.bf16.msra.mxu0 %v384_v39  ;;  %2241 = vmatpush1.bf16.msra.mxu1 %v384_v39  ;;  %v421_v39 = vunpack.c.l.s8.bf16 %v89_v37 }
  0x94   :  { %1237 = vmatprep.subr.bf16.mxu0 %v387_v40  ;;  %2242 = vmatprep.subr.bf16.mxu1 %v387_v40  ;;  %v88_v40 = vld [vmem:[#allocation2 + $0x160] sm:$0xff] }
  0x95   :  { %v420_v41 = vunpack.c.l.s8.bf16 %v88_v40  ;;  %v422_v44 = vunpack.c.h.s8.bf16 %v88_v40 }
  0x97   :  { %1238 = vmatpush1.bf16.msra.mxu0 %v386_v42  ;;  %2243 = vmatpush1.bf16.msra.mxu1 %v386_v42  ;;  %v423_v42 = vunpack.c.h.s8.bf16 %v89_v37  ;;  %v3390_v37 = vld [vmem:[%s3721_s0 + $0x8] sm:$0xff] }
  0x98   :  { %1239 = vmatprep.subr.bf16.mxu0 %v389_v43  ;;  %2244 = vmatprep.subr.bf16.mxu1 %v389_v43  ;;  %v91_v43 = vld [vmem:[#allocation2 + $0x178] sm:$0xff] }
  0x9b   :  { %1240 = vmatpush1.bf16.msra.mxu0 %v388_v45  ;;  %2245 = vmatpush1.bf16.msra.mxu1 %v388_v45  ;;  %v425_v45 = vunpack.c.l.s8.bf16 %v91_v43 }
  0x9c   :  { %1241 = vmatprep.subr.bf16.mxu0 %v391_v46  ;;  %2246 = vmatprep.subr.bf16.mxu1 %v391_v46  ;;  %v90_v46 = vld [vmem:[#allocation2 + $0x170] sm:$0xff] }
  0x9d   :  { %v424_v47 = vunpack.c.l.s8.bf16 %v90_v46  ;;  %v426_v50 = vunpack.c.h.s8.bf16 %v90_v46  ;;  %v108_v46 = vld [vmem:[#allocation2 + $0x200] sm:$0xff] }
  0x9f   :  { %1242 = vmatpush1.bf16.msra.mxu0 %v390_v48  ;;  %2247 = vmatpush1.bf16.msra.mxu1 %v390_v48  ;;  %v427_v48 = vunpack.c.h.s8.bf16 %v91_v43 }
  0xa0   :  { %1243 = vmatprep.subr.bf16.mxu0 %v393_v49  ;;  %2248 = vmatprep.subr.bf16.mxu1 %v393_v49  ;;  %v93_v49 = vld [vmem:[#allocation2 + $0x188] sm:$0xff] }
  0xa1   :  { %v429_v51 = vunpack.c.l.s8.bf16 %v93_v49 }
  0xa3   :  { %1244 = vmatpush1.bf16.msra.mxu0 %v392_v53  ;;  %2249 = vmatpush1.bf16.msra.mxu1 %v392_v53  ;;  %v3375_v53 = vrot.slane %v3352_v56, %v3301_v14  ;;  %v430_v56 = vunpack.c.h.s8.bf16 %v92_v52 }
  0xa4   :  { %1245 = vmatprep.subr.bf16.mxu0 %v395_v54  ;;  %2250 = vmatprep.subr.bf16.mxu1 %v395_v54  ;;  %v3379_v54 = vrot.slane %v3355_v57, %v3301_v14 }
  0xa7   :  { %1246 = vmatpush1.bf16.msra.mxu0 %v394_v58  ;;  %2251 = vmatpush1.bf16.msra.mxu1 %v394_v58  ;;  %v431_v58 = vunpack.c.h.s8.bf16 %v93_v49  ;;  %v964_v49 = vcombine.high %v3375_v53, %v3375_v53 }
  0xa8   :  { %1256 = vmatprep.subr.bf16.mxu0 %v397_v15  ;;  %2261 = vmatprep.subr.bf16.mxu1 %v397_v15  ;;  %v95_v15 = vld [vmem:[#allocation2 + $0x198] sm:$0xff] }
  0xa9   :  { %v433_v57 = vunpack.c.l.s8.bf16 %v95_v15 }
  0xaa   :  { %1248 = vmatmul.mubr.bf16.vlgmr.msra.gmra.mrb[0].mxu0 %v963_v61  ;;  %2253 = vmatmul.mubr.bf16.vlgmr.msra.gmra.mrb[0].mxu1 %v1968_v62  ;;  %v432_v61 = vunpack.c.l.s8.bf16 %v94_v60  ;;  %v435_v62 = vunpack.c.h.s8.bf16 %v95_v15 }
  0xab   :  { %1257 = vmatpush1.bf16.msra.mxu0 %v396_v63  ;;  %2262 = vmatpush1.bf16.msra.mxu1 %v396_v63  ;;  %v97_v63 = vld [vmem:[#allocation2 + $0x1a8] sm:$0xff] }
  0xac   :  { %1258 = vmatprep.subr.bf16.mxu0 %v399_v0  ;;  %2263 = vmatprep.subr.bf16.mxu1 %v399_v0  ;;  %v434_v0 = vunpack.c.h.s8.bf16 %v94_v60  ;;  %v437_v3 = vunpack.c.l.s8.bf16 %v97_v63 }
  0xad   :  { %1288 = vmatprep.mubr.bf16.mxu0 %v3366_v4  ;;  %2293 = vmatprep.mubr.bf16.mxu1 %v3369_v6  ;;  %v96_v4 = vld [vmem:[#allocation2 + $0x1a0] sm:$0xff] }
  0xae   :  { %v436_v6 = vunpack.c.l.s8.bf16 %v96_v4  ;;  %v438_v7 = vunpack.c.h.s8.bf16 %v96_v4 }
  0xaf   :  { %1259 = vmatpush1.bf16.msra.mxu0 %v398_v1  ;;  %2264 = vmatpush1.bf16.msra.mxu1 %v398_v1  ;;  %v439_v1 = vunpack.c.h.s8.bf16 %v97_v63 }
  0xb0   :  { %1260 = vmatprep.subr.bf16.mxu0 %v401_v2  ;;  %2265 = vmatprep.subr.bf16.mxu1 %v401_v2  ;;  %v99_v2 = vld [vmem:[#allocation2 + $0x1b8] sm:$0xff] }
  0xb3   :  { %1261 = vmatpush1.bf16.msra.mxu0 %v400_v8  ;;  %2266 = vmatpush1.bf16.msra.mxu1 %v400_v8  ;;  %v441_v8 = vunpack.c.l.s8.bf16 %v99_v2 }
  0xb4   :  { %1262 = vmatprep.subr.bf16.mxu0 %v403_v9  ;;  %2267 = vmatprep.subr.bf16.mxu1 %v403_v9  ;;  %v98_v9 = vld [vmem:[#allocation2 + $0x1b0] sm:$0xff] }
  0xb5   :  { %v440_v10 = vunpack.c.l.s8.bf16 %v98_v9  ;;  %v442_v13 = vunpack.c.h.s8.bf16 %v98_v9 }
  0xb7   :  { %1263 = vmatpush1.bf16.msra.mxu0 %v402_v11  ;;  %2268 = vmatpush1.bf16.msra.mxu1 %v402_v11  ;;  %v443_v11 = vunpack.c.h.s8.bf16 %v99_v2 }
  0xb8   :  { %1264 = vmatprep.subr.bf16.mxu0 %v405_v12  ;;  %2269 = vmatprep.subr.bf16.mxu1 %v405_v12  ;;  %v101_v12 = vld [vmem:[#allocation2 + $0x1c8] sm:$0xff] }
  0xbb   :  { %1265 = vmatpush1.bf16.msra.mxu0 %v404_v17  ;;  %2270 = vmatpush1.bf16.msra.mxu1 %v404_v17  ;;  %v445_v17 = vunpack.c.l.s8.bf16 %v101_v12 }
  0xbc   :  { %1266 = vmatprep.subr.bf16.mxu0 %v407_v18  ;;  %2271 = vmatprep.subr.bf16.mxu1 %v407_v18  ;;  %v100_v18 = vld [vmem:[#allocation2 + $0x1c0] sm:$0xff] }
  0xbd   :  { %v444_v19 = vunpack.c.l.s8.bf16 %v100_v18  ;;  %v446_v22 = vunpack.c.h.s8.bf16 %v100_v18 }
  0xbf   :  { %1267 = vmatpush1.bf16.msra.mxu0 %v406_v20  ;;  %2272 = vmatpush1.bf16.msra.mxu1 %v406_v20  ;;  %v447_v20 = vunpack.c.h.s8.bf16 %v101_v12 }
  0xc0   :  { %1268 = vmatprep.subr.bf16.mxu0 %v409_v21  ;;  %2273 = vmatprep.subr.bf16.mxu1 %v409_v21  ;;  %v103_v21 = vld [vmem:[#allocation2 + $0x1d8] sm:$0xff] }
  0xc3   :  { %1269 = vmatpush1.bf16.msra.mxu0 %v408_v23  ;;  %2274 = vmatpush1.bf16.msra.mxu1 %v408_v23  ;;  %v449_v23 = vunpack.c.l.s8.bf16 %v103_v21 }
  0xc4   :  { %1270 = vmatprep.subr.bf16.mxu0 %v411_v24  ;;  %2275 = vmatprep.subr.bf16.mxu1 %v411_v24  ;;  %v102_v24 = vld [vmem:[#allocation2 + $0x1d0] sm:$0xff] }
  0xc5   :  { %v448_v25 = vunpack.c.l.s8.bf16 %v102_v24  ;;  %v450_v28 = vunpack.c.h.s8.bf16 %v102_v24 }
  0xc7   :  { %1271 = vmatpush1.bf16.msra.mxu0 %v410_v26  ;;  %2276 = vmatpush1.bf16.msra.mxu1 %v410_v26  ;;  %v451_v26 = vunpack.c.h.s8.bf16 %v103_v21 }
  0xc8   :  { %1272 = vmatprep.subr.bf16.mxu0 %v413_v27  ;;  %2277 = vmatprep.subr.bf16.mxu1 %v413_v27  ;;  %v105_v27 = vld [vmem:[#allocation2 + $0x1e8] sm:$0xff] }
  0xcb   :  { %1273 = vmatpush1.bf16.msra.mxu0 %v412_v29  ;;  %2278 = vmatpush1.bf16.msra.mxu1 %v412_v29  ;;  %v453_v29 = vunpack.c.l.s8.bf16 %v105_v27 }
  0xcc   :  { %1274 = vmatprep.subr.bf16.mxu0 %v415_v30  ;;  %2279 = vmatprep.subr.bf16.mxu1 %v415_v30  ;;  %v104_v30 = vld [vmem:[#allocation2 + $0x1e0] sm:$0xff] }
  0xcd   :  { %v452_v31 = vunpack.c.l.s8.bf16 %v104_v30  ;;  %v454_v34 = vunpack.c.h.s8.bf16 %v104_v30 }
  0xcf   :  { %1275 = vmatpush1.bf16.msra.mxu0 %v414_v32  ;;  %2280 = vmatpush1.bf16.msra.mxu1 %v414_v32  ;;  %v455_v32 = vunpack.c.h.s8.bf16 %v105_v27 }
  0xd0   :  { %1276 = vmatprep.subr.bf16.mxu0 %v417_v33  ;;  %2281 = vmatprep.subr.bf16.mxu1 %v417_v33  ;;  %v107_v33 = vld [vmem:[#allocation2 + $0x1f8] sm:$0xff] }
  0xd1   :  { %v459_v40 = vunpack.c.h.s8.bf16 %v107_v33 }
  0xd3   :  { %1277 = vmatpush1.bf16.msra.mxu0 %v416_v35  ;;  %2282 = vmatpush1.bf16.msra.mxu1 %v416_v35  ;;  %v457_v35 = vunpack.c.l.s8.bf16 %v107_v33 }
  0xd4   :  { %1278 = vmatprep.subr.bf16.mxu0 %v419_v36  ;;  %2283 = vmatprep.subr.bf16.mxu1 %v419_v36  ;;  %v106_v36 = vld [vmem:[#allocation2 + $0x1f0] sm:$0xff] }
  0xd7   :  { %1279 = vmatpush1.bf16.msra.mxu0 %v418_v38  ;;  %2284 = vmatpush1.bf16.msra.mxu1 %v418_v38  ;;  %v3395_v38 = vld [vmem:[%s3721_s0 + $0x2c] sm:$0xff] }
  0xd8   :  { %1280 = vmatprep.subr.bf16.mxu0 %v421_v39  ;;  %2285 = vmatprep.subr.bf16.mxu1 %v421_v39  ;;  %v456_v39 = vunpack.c.l.s8.bf16 %v106_v36  ;;  %v3403_v43 = vrot.slane %v3395_v38, %v3301_v14 }
  0xdb   :  { %1281 = vmatpush1.bf16.msra.mxu0 %v420_v41  ;;  %2286 = vmatpush1.bf16.msra.mxu1 %v420_v41  ;;  %v109_v41 = vld [vmem:[#allocation2 + $0x208] sm:$0xff] }
  0xdc   :  { %1282 = vmatprep.subr.bf16.mxu0 %v423_v42  ;;  %2287 = vmatprep.subr.bf16.mxu1 %v423_v42  ;;  %v3399_v42 = vrot.slane %v3390_v37, %v3301_v14  ;;  %v463_v52 = vunpack.c.h.s8.bf16 %v109_v41 }
  0xdf   :  { %1283 = vmatpush1.bf16.msra.mxu0 %v422_v44  ;;  %2288 = vmatpush1.bf16.msra.mxu1 %v422_v44  ;;  %v458_v44 = vunpack.c.h.s8.bf16 %v106_v36 }
  0xe0   :  { %1284 = vmatprep.subr.bf16.mxu0 %v425_v45  ;;  %2289 = vmatprep.subr.bf16.mxu1 %v425_v45  ;;  %v461_v45 = vunpack.c.l.s8.bf16 %v109_v41  ;;  %v3423_v41 = vrot.slane %v3399_v42, %v3301_v14 }
  0xe3   :  { %1285 = vmatpush1.bf16.msra.mxu0 %v424_v47  ;;  %2290 = vmatpush1.bf16.msra.mxu1 %v424_v47  ;;  %v982_v47 = vcombine.high %v3399_v42, %v3399_v42 }
  0xe4   :  { %1286 = vmatprep.subr.bf16.mxu0 %v427_v48  ;;  %2291 = vmatprep.subr.bf16.mxu1 %v427_v48  ;;  %v1987_v48 = vcombine.high %v3403_v43, %v3403_v43 }
  0xe6   :  { %v3417_v15 = vrot.slane %v1987_v48, %v3301_v14 }
  0xe7   :  { %1287 = vmatpush1.bf16.msra.mxu0 %v426_v50  ;;  %2292 = vmatpush1.bf16.msra.mxu1 %v426_v50  ;;  %v1969_v50 = vcombine.high %v3379_v54, %v3379_v54 }
  0xe8   :  { %1297 = vmatprep.subr.bf16.mxu0 %v429_v51  ;;  %2302 = vmatprep.subr.bf16.mxu1 %v429_v51  ;;  %v460_v51 = vunpack.c.l.s8.bf16 %v108_v46 }
  0xea   :  { %1289 = vmatmul.mubr.bf16.vlgmr.msra.gmra.mrb[0].mxu0 %v3375_v53  ;;  %2294 = vmatmul.mubr.bf16.vlgmr.msra.gmra.mrb[0].mxu1 %v3379_v54  ;;  %v462_v53 = vunpack.c.h.s8.bf16 %v108_v46 }
  0xeb   :  { %1298 = vmatpush1.bf16.msra.mxu0 %v428_v55  ;;  %2303 = vmatpush1.bf16.msra.mxu1 %v428_v55  ;;  %v111_v55 = vld [vmem:[#allocation2 + $0x218] sm:$0xff] }
  0xec   :  { %1299 = vmatprep.subr.bf16.mxu0 %v431_v58  ;;  %2304 = vmatprep.subr.bf16.mxu1 %v431_v58  ;;  %v3414_v58 = vrot.slane %v982_v47, %v3301_v14  ;;  %v465_v54 = vunpack.c.l.s8.bf16 %v111_v55  ;;  %v127_v47 = vld [vmem:[#allocation2 + $0x298] sm:$0xff] }
  0xed   :  { %1329 = vmatprep.mubr.bf16.mxu0 %v966_v16  ;;  %2334 = vmatprep.mubr.bf16.mxu1 %v1971_v59  ;;  %v110_v16 = vld [vmem:[#allocation2 + $0x210] sm:$0xff] }
  0xee   :  { %v464_v59 = vunpack.c.l.s8.bf16 %v110_v16  ;;  %v466_v60 = vunpack.c.h.s8.bf16 %v110_v16  ;;  %v1014_v48 = vcombine.high %v3414_v58, %v3414_v58 }
  0xef   :  { %1300 = vmatpush1.bf16.msra.mxu0 %v430_v56  ;;  %2305 = vmatpush1.bf16.msra.mxu1 %v430_v56  ;;  %v467_v56 = vunpack.c.h.s8.bf16 %v111_v55  ;;  %v129_v55 = vld [vmem:[#allocation2 + $0x2a8] sm:$0xff] }
  0xf0   :  { %1301 = vmatprep.subr.bf16.mxu0 %v433_v57  ;;  %2306 = vmatprep.subr.bf16.mxu1 %v433_v57  ;;  %v113_v57 = vld [vmem:[#allocation2 + $0x228] sm:$0xff]  ;;  %v503_v16 = vunpack.c.h.s8.bf16 %v129_v55 }
  0xf3   :  { %1302 = vmatpush1.bf16.msra.mxu0 %v432_v61  ;;  %2307 = vmatpush1.bf16.msra.mxu1 %v432_v61  ;;  %v469_v61 = vunpack.c.l.s8.bf16 %v113_v57 }
  0xf4   :  { %1303 = vmatprep.subr.bf16.mxu0 %v435_v62  ;;  %2308 = vmatprep.subr.bf16.mxu1 %v435_v62  ;;  %v112_v62 = vld [vmem:[#allocation2 + $0x220] sm:$0xff] }
  0xf5   :  { %v468_v63 = vunpack.c.l.s8.bf16 %v112_v62  ;;  %v470_v4 = vunpack.c.h.s8.bf16 %v112_v62 }
  0xf7   :  { %1304 = vmatpush1.bf16.msra.mxu0 %v434_v0  ;;  %2309 = vmatpush1.bf16.msra.mxu1 %v434_v0  ;;  %v471_v0 = vunpack.c.h.s8.bf16 %v113_v57 }
  0xf8   :  { %1305 = vmatprep.subr.bf16.mxu0 %v437_v3  ;;  %2310 = vmatprep.subr.bf16.mxu1 %v437_v3  ;;  %v115_v3 = vld [vmem:[#allocation2 + $0x238] sm:$0xff] }
  0xfb   :  { %1306 = vmatpush1.bf16.msra.mxu0 %v436_v6  ;;  %2311 = vmatpush1.bf16.msra.mxu1 %v436_v6  ;;  %v473_v6 = vunpack.c.l.s8.bf16 %v115_v3 }
  0xfc   :  { %1307 = vmatprep.subr.bf16.mxu0 %v439_v1  ;;  %2312 = vmatprep.subr.bf16.mxu1 %v439_v1  ;;  %v114_v1 = vld [vmem:[#allocation2 + $0x230] sm:$0xff] }
  0xfd   :  { %v472_v2 = vunpack.c.l.s8.bf16 %v114_v1  ;;  %v474_v9 = vunpack.c.h.s8.bf16 %v114_v1 }
  0xff   :  { %1308 = vmatpush1.bf16.msra.mxu0 %v438_v7  ;;  %2313 = vmatpush1.bf16.msra.mxu1 %v438_v7  ;;  %v475_v7 = vunpack.c.h.s8.bf16 %v115_v3 }
 0x100   :  { %1309 = vmatprep.subr.bf16.mxu0 %v441_v8  ;;  %2314 = vmatprep.subr.bf16.mxu1 %v441_v8  ;;  %v117_v8 = vld [vmem:[#allocation2 + $0x248] sm:$0xff] }
 0x103   :  { %1310 = vmatpush1.bf16.msra.mxu0 %v440_v10  ;;  %2315 = vmatpush1.bf16.msra.mxu1 %v440_v10  ;;  %v477_v10 = vunpack.c.l.s8.bf16 %v117_v8 }
 0x104   :  { %1311 = vmatprep.subr.bf16.mxu0 %v443_v11  ;;  %2316 = vmatprep.subr.bf16.mxu1 %v443_v11  ;;  %v116_v11 = vld [vmem:[#allocation2 + $0x240] sm:$0xff] }
 0x105   :  { %v476_v12 = vunpack.c.l.s8.bf16 %v116_v11  ;;  %v478_v18 = vunpack.c.h.s8.bf16 %v116_v11 }
 0x107   :  { %1312 = vmatpush1.bf16.msra.mxu0 %v442_v13  ;;  %2317 = vmatpush1.bf16.msra.mxu1 %v442_v13  ;;  %v479_v13 = vunpack.c.h.s8.bf16 %v117_v8 }
 0x108   :  { %1313 = vmatprep.subr.bf16.mxu0 %v445_v17  ;;  %2318 = vmatprep.subr.bf16.mxu1 %v445_v17  ;;  %v119_v17 = vld [vmem:[#allocation2 + $0x258] sm:$0xff] }
 0x10b   :  { %1314 = vmatpush1.bf16.msra.mxu0 %v444_v19  ;;  %2319 = vmatpush1.bf16.msra.mxu1 %v444_v19  ;;  %v481_v19 = vunpack.c.l.s8.bf16 %v119_v17 }
 0x10c   :  { %1315 = vmatprep.subr.bf16.mxu0 %v447_v20  ;;  %2320 = vmatprep.subr.bf16.mxu1 %v447_v20  ;;  %v118_v20 = vld [vmem:[#allocation2 + $0x250] sm:$0xff] }
 0x10d   :  { %v480_v21 = vunpack.c.l.s8.bf16 %v118_v20  ;;  %v482_v24 = vunpack.c.h.s8.bf16 %v118_v20 }
 0x10f   :  { %1316 = vmatpush1.bf16.msra.mxu0 %v446_v22  ;;  %2321 = vmatpush1.bf16.msra.mxu1 %v446_v22  ;;  %v483_v22 = vunpack.c.h.s8.bf16 %v119_v17 }
 0x110   :  { %1317 = vmatprep.subr.bf16.mxu0 %v449_v23  ;;  %2322 = vmatprep.subr.bf16.mxu1 %v449_v23  ;;  %v121_v23 = vld [vmem:[#allocation2 + $0x268] sm:$0xff] }
 0x113   :  { %1318 = vmatpush1.bf16.msra.mxu0 %v448_v25  ;;  %2323 = vmatpush1.bf16.msra.mxu1 %v448_v25  ;;  %v485_v25 = vunpack.c.l.s8.bf16 %v121_v23 }
 0x114   :  { %1319 = vmatprep.subr.bf16.mxu0 %v451_v26  ;;  %2324 = vmatprep.subr.bf16.mxu1 %v451_v26  ;;  %v120_v26 = vld [vmem:[#allocation2 + $0x260] sm:$0xff] }
 0x115   :  { %v484_v27 = vunpack.c.l.s8.bf16 %v120_v26  ;;  %v486_v30 = vunpack.c.h.s8.bf16 %v120_v26  ;;  %v1972_v26 = vcombine.high %v3395_v38, %v3395_v38  ;;  %v140_v38 = vld [vmem:[#allocation2 + $0x300] sm:$0xff] }
 0x117   :  { %1320 = vmatpush1.bf16.msra.mxu0 %v450_v28  ;;  %2325 = vmatpush1.bf16.msra.mxu1 %v450_v28  ;;  %v487_v28 = vunpack.c.h.s8.bf16 %v121_v23 }
 0x118   :  { %1321 = vmatprep.subr.bf16.mxu0 %v453_v29  ;;  %2326 = vmatprep.subr.bf16.mxu1 %v453_v29  ;;  %v123_v29 = vld [vmem:[#allocation2 + $0x278] sm:$0xff] }
 0x11b   :  { %1322 = vmatpush1.bf16.msra.mxu0 %v452_v31  ;;  %2327 = vmatpush1.bf16.msra.mxu1 %v452_v31  ;;  %v489_v31 = vunpack.c.l.s8.bf16 %v123_v29 }
 0x11c   :  { %1323 = vmatprep.subr.bf16.mxu0 %v455_v32  ;;  %2328 = vmatprep.subr.bf16.mxu1 %v455_v32  ;;  %v122_v32 = vld [vmem:[#allocation2 + $0x270] sm:$0xff] }
 0x11d   :  { %v488_v33 = vunpack.c.l.s8.bf16 %v122_v32  ;;  %v490_v36 = vunpack.c.h.s8.bf16 %v122_v32 }
 0x11f   :  { %1324 = vmatpush1.bf16.msra.mxu0 %v454_v34  ;;  %2329 = vmatpush1.bf16.msra.mxu1 %v454_v34  ;;  %v491_v34 = vunpack.c.h.s8.bf16 %v123_v29  ;;  %v141_v29 = vld [vmem:[#allocation2 + $0x308] sm:$0xff] }
 0x120   :  { %1325 = vmatprep.subr.bf16.mxu0 %v457_v35  ;;  %2330 = vmatprep.subr.bf16.mxu1 %v457_v35  ;;  %v125_v35 = vld [vmem:[#allocation2 + $0x288] sm:$0xff] }
 0x121   :  { %v495_v46 = vunpack.c.h.s8.bf16 %v125_v35 }
 0x123   :  { %1326 = vmatpush1.bf16.msra.mxu0 %v456_v39  ;;  %2331 = vmatpush1.bf16.msra.mxu1 %v456_v39  ;;  %v493_v39 = vunpack.c.l.s8.bf16 %v125_v35  ;;  %v1012_v35 = vcombine.high %v3423_v41, %v3423_v41 }
 0x124   :  { %1327 = vmatprep.subr.bf16.mxu0 %v459_v40  ;;  %2332 = vmatprep.subr.bf16.mxu1 %v459_v40  ;;  %v124_v40 = vld [vmem:[#allocation2 + $0x280] sm:$0xff] }
 0x125   :  { %v494_v42 = vunpack.c.h.s8.bf16 %v124_v40 }
 0x127   :  { %1328 = vmatpush1.bf16.msra.mxu0 %v458_v44  ;;  %2333 = vmatpush1.bf16.msra.mxu1 %v458_v44  ;;  %v3427_v44 = vrot.slane %v3403_v43, %v3301_v14  ;;  %v497_v43 = vunpack.c.l.s8.bf16 %v127_v47 }
 0x128   :  { %1338 = vmatprep.subr.bf16.mxu0 %v461_v45  ;;  %2343 = vmatprep.subr.bf16.mxu1 %v461_v45  ;;  %v492_v45 = vunpack.c.l.s8.bf16 %v124_v40  ;;  %v527_v40 = vunpack.c.h.s8.bf16 %v141_v29 }
 0x12a   :  { %1330 = vmatmul.mubr.bf16.vlgmr.msra.gmra.mrb[0].mxu0 %v964_v49  ;;  %2335 = vmatmul.mubr.bf16.vlgmr.msra.gmra.mrb[0].mxu1 %v1969_v50  ;;  %v2019_v49 = vcombine.high %v3417_v15, %v3417_v15  ;;  %v126_v50 = vld [vmem:[#allocation2 + $0x290] sm:$0xff] }
 0x12b   :  { %1339 = vmatpush1.bf16.msra.mxu0 %v460_v51  ;;  %2344 = vmatpush1.bf16.msra.mxu1 %v460_v51  ;;  %v496_v51 = vunpack.c.l.s8.bf16 %v126_v50 }
 0x12c   :  { %1340 = vmatprep.subr.bf16.mxu0 %v463_v52  ;;  %2345 = vmatprep.subr.bf16.mxu1 %v463_v52  ;;  %v499_v52 = vunpack.c.h.s8.bf16 %v127_v47 }
 0x12d   :  { %1370 = vmatprep.mubr.bf16.mxu0 %v3414_v58  ;;  %2375 = vmatprep.mubr.bf16.mxu1 %v3417_v15  ;;  %v498_v58 = vunpack.c.h.s8.bf16 %v126_v50  ;;  %v501_v15 = vunpack.c.l.s8.bf16 %v129_v55 }
 0x12f   :  { %1341 = vmatpush1.bf16.msra.mxu0 %v462_v53  ;;  %2346 = vmatpush1.bf16.msra.mxu1 %v462_v53  ;;  %v128_v53 = vld [vmem:[#allocation2 + $0x2a0] sm:$0xff] }
 0x130   :  { %1342 = vmatprep.subr.bf16.mxu0 %v465_v54  ;;  %2347 = vmatprep.subr.bf16.mxu1 %v465_v54  ;;  %v500_v54 = vunpack.c.l.s8.bf16 %v128_v53 }
 0x133   :  { %1343 = vmatpush1.bf16.msra.mxu0 %v464_v59  ;;  %2348 = vmatpush1.bf16.msra.mxu1 %v464_v59  ;;  %v131_v59 = vld [vmem:[#allocation2 + $0x2b8] sm:$0xff] }
 0x134   :  { %1344 = vmatprep.subr.bf16.mxu0 %v467_v56  ;;  %2349 = vmatprep.subr.bf16.mxu1 %v467_v56  ;;  %v502_v56 = vunpack.c.h.s8.bf16 %v128_v53  ;;  %v505_v57 = vunpack.c.l.s8.bf16 %v131_v59  ;;  %v507_v62 = vunpack.c.h.s8.bf16 %v131_v59 }
 0x137   :  { %1345 = vmatpush1.bf16.msra.mxu0 %v466_v60  ;;  %2350 = vmatpush1.bf16.msra.mxu1 %v466_v60  ;;  %v130_v60 = vld [vmem:[#allocation2 + $0x2b0] sm:$0xff] }
 0x138   :  { %1346 = vmatprep.subr.bf16.mxu0 %v469_v61  ;;  %2351 = vmatprep.subr.bf16.mxu1 %v469_v61  ;;  %v504_v61 = vunpack.c.l.s8.bf16 %v130_v60 }
 0x13b   :  { %1347 = vmatpush1.bf16.msra.mxu0 %v468_v63  ;;  %2352 = vmatpush1.bf16.msra.mxu1 %v468_v63  ;;  %v133_v63 = vld [vmem:[#allocation2 + $0x2c8] sm:$0xff] }
 0x13c   :  { %1348 = vmatprep.subr.bf16.mxu0 %v471_v0  ;;  %2353 = vmatprep.subr.bf16.mxu1 %v471_v0  ;;  %v506_v0 = vunpack.c.h.s8.bf16 %v130_v60  ;;  %v509_v3 = vunpack.c.l.s8.bf16 %v133_v63  ;;  %v511_v1 = vunpack.c.h.s8.bf16 %v133_v63 }
 0x13f   :  { %1349 = vmatpush1.bf16.msra.mxu0 %v470_v4  ;;  %2354 = vmatpush1.bf16.msra.mxu1 %v470_v4  ;;  %v132_v4 = vld [vmem:[#allocation2 + $0x2c0] sm:$0xff] }
 0x140   :  { %1350 = vmatprep.subr.bf16.mxu0 %v473_v6  ;;  %2355 = vmatprep.subr.bf16.mxu1 %v473_v6  ;;  %v508_v6 = vunpack.c.l.s8.bf16 %v132_v4 }
 0x143   :  { %1351 = vmatpush1.bf16.msra.mxu0 %v472_v2  ;;  %2356 = vmatpush1.bf16.msra.mxu1 %v472_v2  ;;  %v135_v2 = vld [vmem:[#allocation2 + $0x2d8] sm:$0xff] }
 0x144   :  { %1352 = vmatprep.subr.bf16.mxu0 %v475_v7  ;;  %2357 = vmatprep.subr.bf16.mxu1 %v475_v7  ;;  %v510_v7 = vunpack.c.h.s8.bf16 %v132_v4  ;;  %v513_v8 = vunpack.c.l.s8.bf16 %v135_v2  ;;  %v515_v11 = vunpack.c.h.s8.bf16 %v135_v2 }
 0x147   :  { %1353 = vmatpush1.bf16.msra.mxu0 %v474_v9  ;;  %2358 = vmatpush1.bf16.msra.mxu1 %v474_v9  ;;  %v134_v9 = vld [vmem:[#allocation2 + $0x2d0] sm:$0xff] }
 0x148   :  { %1354 = vmatprep.subr.bf16.mxu0 %v477_v10  ;;  %2359 = vmatprep.subr.bf16.mxu1 %v477_v10  ;;  %v512_v10 = vunpack.c.l.s8.bf16 %v134_v9 }
 0x14b   :  { %1355 = vmatpush1.bf16.msra.mxu0 %v476_v12  ;;  %2360 = vmatpush1.bf16.msra.mxu1 %v476_v12  ;;  %v137_v12 = vld [vmem:[#allocation2 + $0x2e8] sm:$0xff] }
 0x14c   :  { %1356 = vmatprep.subr.bf16.mxu0 %v479_v13  ;;  %2361 = vmatprep.subr.bf16.mxu1 %v479_v13  ;;  %v514_v13 = vunpack.c.h.s8.bf16 %v134_v9  ;;  %v517_v17 = vunpack.c.l.s8.bf16 %v137_v12  ;;  %v519_v20 = vunpack.c.h.s8.bf16 %v137_v12 }
 0x14f   :  { %1357 = vmatpush1.bf16.msra.mxu0 %v478_v18  ;;  %2362 = vmatpush1.bf16.msra.mxu1 %v478_v18  ;;  %v136_v18 = vld [vmem:[#allocation2 + $0x2e0] sm:$0xff] }
 0x150   :  { %1358 = vmatprep.subr.bf16.mxu0 %v481_v19  ;;  %2363 = vmatprep.subr.bf16.mxu1 %v481_v19  ;;  %v516_v19 = vunpack.c.l.s8.bf16 %v136_v18 }
 0x153   :  { %1359 = vmatpush1.bf16.msra.mxu0 %v480_v21  ;;  %2364 = vmatpush1.bf16.msra.mxu1 %v480_v21  ;;  %v139_v21 = vld [vmem:[#allocation2 + $0x2f8] sm:$0xff] }
 0x154   :  { %1360 = vmatprep.subr.bf16.mxu0 %v483_v22  ;;  %2365 = vmatprep.subr.bf16.mxu1 %v483_v22  ;;  %v518_v22 = vunpack.c.h.s8.bf16 %v136_v18  ;;  %v521_v23 = vunpack.c.l.s8.bf16 %v139_v21 }
 0x157   :  { %1361 = vmatpush1.bf16.msra.mxu0 %v482_v24  ;;  %2366 = vmatpush1.bf16.msra.mxu1 %v482_v24  ;;  %v138_v24 = vld [vmem:[#allocation2 + $0x2f0] sm:$0xff] }
 0x158   :  { %1362 = vmatprep.subr.bf16.mxu0 %v485_v25  ;;  %2367 = vmatprep.subr.bf16.mxu1 %v485_v25  ;;  %v967_v25 = vcombine.high %v3390_v37, %v3390_v37  ;;  %v522_v32 = vunpack.c.h.s8.bf16 %v138_v24  ;;  %v525_v37 = vunpack.c.l.s8.bf16 %v141_v29 }
 0x15b   :  { %1363 = vmatpush1.bf16.msra.mxu0 %v484_v27  ;;  %2368 = vmatpush1.bf16.msra.mxu1 %v484_v27  ;;  %v520_v27 = vunpack.c.l.s8.bf16 %v138_v24 }
 0x15c   :  { %1364 = vmatprep.subr.bf16.mxu0 %v487_v28  ;;  %2369 = vmatprep.subr.bf16.mxu1 %v487_v28  ;;  %v523_v28 = vunpack.c.h.s8.bf16 %v139_v21 }
 0x15f   :  { %1365 = vmatpush1.bf16.msra.mxu0 %v486_v30  ;;  %2370 = vmatpush1.bf16.msra.mxu1 %v486_v30  ;;  %v3440_v30 = vrot.slane %v967_v25, %v3301_v14 }
 0x160   :  { %1366 = vmatprep.subr.bf16.mxu0 %v489_v31  ;;  %2371 = vmatprep.subr.bf16.mxu1 %v489_v31  ;;  %v3443_v31 = vrot.slane %v1972_v26, %v3301_v14  ;;  %v156_v26 = vld [vmem:[#allocation2 + $0x380] sm:$0xff] }
 0x161   :  { %v556_v29 = vunpack.c.l.s8.bf16 %v156_v26 }
 0x163   :  { %1367 = vmatpush1.bf16.msra.mxu0 %v488_v33  ;;  %2372 = vmatpush1.bf16.msra.mxu1 %v488_v33  ;;  %v983_v33 = vcombine.high %v3440_v30, %v3440_v30 }
 0x164   :  { %1368 = vmatprep.subr.bf16.mxu0 %v491_v34  ;;  %2373 = vmatprep.subr.bf16.mxu1 %v491_v34  ;;  %v1988_v34 = vcombine.high %v3443_v31, %v3443_v31 }
 0x166   :  { %v3457_v47 = vrot.slane %v1988_v34, %v3301_v14  ;;  %v158_v34 = vld [vmem:[#allocation2 + $0x390] sm:$0xff] }
 0x167   :  { %1369 = vmatpush1.bf16.msra.mxu0 %v490_v36  ;;  %2374 = vmatpush1.bf16.msra.mxu1 %v490_v36  ;;  %v2017_v36 = vcombine.high %v3427_v44, %v3427_v44 }
 0x168   :  { %1379 = vmatprep.subr.bf16.mxu0 %v493_v39  ;;  %2384 = vmatprep.subr.bf16.mxu1 %v493_v39  ;;  %v524_v39 = vunpack.c.l.s8.bf16 %v140_v38 }
 0x16a   :  { %1371 = vmatmul.mubr.bf16.vlgmr.msra.gmra.mrb[0].mxu0 %v3423_v41  ;;  %2376 = vmatmul.mubr.bf16.vlgmr.msra.gmra.mrb[0].mxu1 %v3427_v44  ;;  %v526_v41 = vunpack.c.h.s8.bf16 %v140_v38 }
 0x16b   :  { %1380 = vmatpush1.bf16.msra.mxu0 %v492_v45  ;;  %2385 = vmatpush1.bf16.msra.mxu1 %v492_v45  ;;  %v143_v45 = vld [vmem:[#allocation2 + $0x318] sm:$0xff] }
 0x16c   :  { %1381 = vmatprep.subr.bf16.mxu0 %v495_v46  ;;  %2386 = vmatprep.subr.bf16.mxu1 %v495_v46  ;;  %v3454_v46 = vrot.slane %v983_v33, %v3301_v14  ;;  %v529_v44 = vunpack.c.l.s8.bf16 %v143_v45  ;;  %v2020_v33 = vcombine.high %v3457_v47, %v3457_v47 }
 0x16d   :  { %1411 = vmatprep.mubr.bf16.mxu0 %v1014_v48  ;;  %2416 = vmatprep.mubr.bf16.mxu1 %v2019_v49  ;;  %v142_v48 = vld [vmem:[#allocation2 + $0x310] sm:$0xff] }
 0x16e   :  { %v528_v49 = vunpack.c.l.s8.bf16 %v142_v48  ;;  %v530_v50 = vunpack.c.h.s8.bf16 %v142_v48  ;;  %v1015_v38 = vcombine.high %v3454_v46, %v3454_v46 }
 0x16f   :  { %1382 = vmatpush1.bf16.msra.mxu0 %v494_v42  ;;  %2387 = vmatpush1.bf16.msra.mxu1 %v494_v42  ;;  %v531_v42 = vunpack.c.h.s8.bf16 %v143_v45 }
 0x170   :  { %1383 = vmatprep.subr.bf16.mxu0 %v497_v43  ;;  %2388 = vmatprep.subr.bf16.mxu1 %v497_v43  ;;  %v145_v43 = vld [vmem:[#allocation2 + $0x328] sm:$0xff] }
 0x173   :  { %1384 = vmatpush1.bf16.msra.mxu0 %v496_v51  ;;  %2389 = vmatpush1.bf16.msra.mxu1 %v496_v51  ;;  %v533_v51 = vunpack.c.l.s8.bf16 %v145_v43 }
 0x174   :  { %1385 = vmatprep.subr.bf16.mxu0 %v499_v52  ;;  %2390 = vmatprep.subr.bf16.mxu1 %v499_v52  ;;  %v144_v52 = vld [vmem:[#allocation2 + $0x320] sm:$0xff] }
 0x175   :  { %v532_v55 = vunpack.c.l.s8.bf16 %v144_v52  ;;  %v534_v53 = vunpack.c.h.s8.bf16 %v144_v52 }
 0x177   :  { %1386 = vmatpush1.bf16.msra.mxu0 %v498_v58  ;;  %2391 = vmatpush1.bf16.msra.mxu1 %v498_v58  ;;  %v535_v58 = vunpack.c.h.s8.bf16 %v145_v43 }
 0x178   :  { %1387 = vmatprep.subr.bf16.mxu0 %v501_v15  ;;  %2392 = vmatprep.subr.bf16.mxu1 %v501_v15  ;;  %v147_v15 = vld [vmem:[#allocation2 + $0x338] sm:$0xff] }
 0x17b   :  { %1388 = vmatpush1.bf16.msra.mxu0 %v500_v54  ;;  %2393 = vmatpush1.bf16.msra.mxu1 %v500_v54  ;;  %v537_v54 = vunpack.c.l.s8.bf16 %v147_v15 }
 0x17c   :  { %1389 = vmatprep.subr.bf16.mxu0 %v503_v16  ;;  %2394 = vmatprep.subr.bf16.mxu1 %v503_v16  ;;  %v146_v16 = vld [vmem:[#allocation2 + $0x330] sm:$0xff] }
 0x17d   :  { %v536_v59 = vunpack.c.l.s8.bf16 %v146_v16  ;;  %v538_v60 = vunpack.c.h.s8.bf16 %v146_v16 }
 0x17f   :  { %1390 = vmatpush1.bf16.msra.mxu0 %v502_v56  ;;  %2395 = vmatpush1.bf16.msra.mxu1 %v502_v56  ;;  %v539_v56 = vunpack.c.h.s8.bf16 %v147_v15 }
 0x180   :  { %1391 = vmatprep.subr.bf16.mxu0 %v505_v57  ;;  %2396 = vmatprep.subr.bf16.mxu1 %v505_v57  ;;  %v149_v57 = vld [vmem:[#allocation2 + $0x348] sm:$0xff] }
 0x183   :  { %1392 = vmatpush1.bf16.msra.mxu0 %v504_v61  ;;  %2397 = vmatpush1.bf16.msra.mxu1 %v504_v61  ;;  %v541_v61 = vunpack.c.l.s8.bf16 %v149_v57 }
 0x184   :  { %1393 = vmatprep.subr.bf16.mxu0 %v507_v62  ;;  %2398 = vmatprep.subr.bf16.mxu1 %v507_v62  ;;  %v148_v62 = vld [vmem:[#allocation2 + $0x340] sm:$0xff] }
 0x185   :  { %v540_v63 = vunpack.c.l.s8.bf16 %v148_v62  ;;  %v542_v4 = vunpack.c.h.s8.bf16 %v148_v62 }
 0x187   :  { %1394 = vmatpush1.bf16.msra.mxu0 %v506_v0  ;;  %2399 = vmatpush1.bf16.msra.mxu1 %v506_v0  ;;  %v543_v0 = vunpack.c.h.s8.bf16 %v149_v57 }
 0x188   :  { %1395 = vmatprep.subr.bf16.mxu0 %v509_v3  ;;  %2400 = vmatprep.subr.bf16.mxu1 %v509_v3  ;;  %v151_v3 = vld [vmem:[#allocation2 + $0x358] sm:$0xff] }
 0x18b   :  { %1396 = vmatpush1.bf16.msra.mxu0 %v508_v6  ;;  %2401 = vmatpush1.bf16.msra.mxu1 %v508_v6  ;;  %v545_v6 = vunpack.c.l.s8.bf16 %v151_v3 }
 0x18c   :  { %1397 = vmatprep.subr.bf16.mxu0 %v511_v1  ;;  %2402 = vmatprep.subr.bf16.mxu1 %v511_v1  ;;  %v150_v1 = vld [vmem:[#allocation2 + $0x350] sm:$0xff] }
 0x18d   :  { %v544_v2 = vunpack.c.l.s8.bf16 %v150_v1  ;;  %v546_v9 = vunpack.c.h.s8.bf16 %v150_v1 }
 0x18f   :  { %1398 = vmatpush1.bf16.msra.mxu0 %v510_v7  ;;  %2403 = vmatpush1.bf16.msra.mxu1 %v510_v7  ;;  %v547_v7 = vunpack.c.h.s8.bf16 %v151_v3 }
 0x190   :  { %1399 = vmatprep.subr.bf16.mxu0 %v513_v8  ;;  %2404 = vmatprep.subr.bf16.mxu1 %v513_v8  ;;  %v153_v8 = vld [vmem:[#allocation2 + $0x368] sm:$0xff] }
 0x193   :  { %1400 = vmatpush1.bf16.msra.mxu0 %v512_v10  ;;  %2405 = vmatpush1.bf16.msra.mxu1 %v512_v10  ;;  %v549_v10 = vunpack.c.l.s8.bf16 %v153_v8 }
 0x194   :  { %1401 = vmatprep.subr.bf16.mxu0 %v515_v11  ;;  %2406 = vmatprep.subr.bf16.mxu1 %v515_v11  ;;  %v152_v11 = vld [vmem:[#allocation2 + $0x360] sm:$0xff] }
 0x195   :  { %v548_v12 = vunpack.c.l.s8.bf16 %v152_v11  ;;  %v550_v18 = vunpack.c.h.s8.bf16 %v152_v11 }
 0x197   :  { %1402 = vmatpush1.bf16.msra.mxu0 %v514_v13  ;;  %2407 = vmatpush1.bf16.msra.mxu1 %v514_v13  ;;  %v551_v13 = vunpack.c.h.s8.bf16 %v153_v8  ;;  %v3478_v8 = vld [vmem:[%s3721_s0 + $0x10] sm:$0xff] }
 0x198   :  { %1403 = vmatprep.subr.bf16.mxu0 %v517_v17  ;;  %2408 = vmatprep.subr.bf16.mxu1 %v517_v17  ;;  %v155_v17 = vld [vmem:[#allocation2 + $0x378] sm:$0xff] }
 0x19b   :  { %1404 = vmatpush1.bf16.msra.mxu0 %v516_v19  ;;  %2409 = vmatpush1.bf16.msra.mxu1 %v516_v19  ;;  %v553_v19 = vunpack.c.l.s8.bf16 %v155_v17 }
 0x19c   :  { %1405 = vmatprep.subr.bf16.mxu0 %v519_v20  ;;  %2410 = vmatprep.subr.bf16.mxu1 %v519_v20  ;;  %v154_v20 = vld [vmem:[#allocation2 + $0x370] sm:$0xff] }
 0x19d   :  { %v552_v21 = vunpack.c.l.s8.bf16 %v154_v20  ;;  %v554_v24 = vunpack.c.h.s8.bf16 %v154_v20  ;;  %v172_v20 = vld [vmem:[#allocation2 + $0x400] sm:$0xff] }
 0x19f   :  { %1406 = vmatpush1.bf16.msra.mxu0 %v518_v22  ;;  %2411 = vmatpush1.bf16.msra.mxu1 %v518_v22  ;;  %v555_v22 = vunpack.c.h.s8.bf16 %v155_v17 }
 0x1a0   :  { %1407 = vmatprep.subr.bf16.mxu0 %v521_v23  ;;  %2412 = vmatprep.subr.bf16.mxu1 %v521_v23  ;;  %v157_v23 = vld [vmem:[#allocation2 + $0x388] sm:$0xff] }
 0x1a1   :  { %v557_v25 = vunpack.c.l.s8.bf16 %v157_v23 }
 0x1a3   :  { %1408 = vmatpush1.bf16.msra.mxu0 %v520_v27  ;;  %2413 = vmatpush1.bf16.msra.mxu1 %v520_v27  ;;  %v3463_v27 = vrot.slane %v3440_v30, %v3301_v14  ;;  %v558_v30 = vunpack.c.h.s8.bf16 %v156_v26 }
 0x1a4   :  { %1409 = vmatprep.subr.bf16.mxu0 %v523_v28  ;;  %2414 = vmatprep.subr.bf16.mxu1 %v523_v28  ;;  %v3467_v28 = vrot.slane %v3443_v31, %v3301_v14 }
 0x1a7   :  { %1410 = vmatpush1.bf16.msra.mxu0 %v522_v32  ;;  %2415 = vmatpush1.bf16.msra.mxu1 %v522_v32  ;;  %v559_v32 = vunpack.c.h.s8.bf16 %v157_v23  ;;  %v1013_v23 = vcombine.high %v3463_v27, %v3463_v27 }
 0x1a8   :  { %1420 = vmatprep.subr.bf16.mxu0 %v525_v37  ;;  %2425 = vmatprep.subr.bf16.mxu1 %v525_v37  ;;  %v159_v37 = vld [vmem:[#allocation2 + $0x398] sm:$0xff] }
 0x1a9   :  { %v561_v31 = vunpack.c.l.s8.bf16 %v159_v37 }
 0x1aa   :  { %1412 = vmatmul.mubr.bf16.vlgmr.msra.gmra.mrb[0].mxu0 %v1012_v35  ;;  %2417 = vmatmul.mubr.bf16.vlgmr.msra.gmra.mrb[0].mxu1 %v2017_v36  ;;  %v560_v35 = vunpack.c.l.s8.bf16 %v158_v34  ;;  %v563_v36 = vunpack.c.h.s8.bf16 %v159_v37 }
 0x1ab   :  { %1421 = vmatpush1.bf16.msra.mxu0 %v524_v39  ;;  %2426 = vmatpush1.bf16.msra.mxu1 %v524_v39  ;;  %v161_v39 = vld [vmem:[#allocation2 + $0x3a8] sm:$0xff] }
 0x1ac   :  { %1422 = vmatprep.subr.bf16.mxu0 %v527_v40  ;;  %2427 = vmatprep.subr.bf16.mxu1 %v527_v40  ;;  %v562_v40 = vunpack.c.h.s8.bf16 %v158_v34  ;;  %v565_v45 = vunpack.c.l.s8.bf16 %v161_v39 }
 0x1ad   :  { %1452 = vmatprep.mubr.bf16.mxu0 %v3454_v46  ;;  %2457 = vmatprep.mubr.bf16.mxu1 %v3457_v47  ;;  %v160_v46 = vld [vmem:[#allocation2 + $0x3a0] sm:$0xff] }
 0x1ae   :  { %v564_v47 = vunpack.c.l.s8.bf16 %v160_v46  ;;  %v566_v48 = vunpack.c.h.s8.bf16 %v160_v46 }
 0x1af   :  { %1423 = vmatpush1.bf16.msra.mxu0 %v526_v41  ;;  %2428 = vmatpush1.bf16.msra.mxu1 %v526_v41  ;;  %v567_v41 = vunpack.c.h.s8.bf16 %v161_v39 }
 0x1b0   :  { %1424 = vmatprep.subr.bf16.mxu0 %v529_v44  ;;  %2429 = vmatprep.subr.bf16.mxu1 %v529_v44  ;;  %v163_v44 = vld [vmem:[#allocation2 + $0x3b8] sm:$0xff] }
 0x1b3   :  { %1425 = vmatpush1.bf16.msra.mxu0 %v528_v49  ;;  %2430 = vmatpush1.bf16.msra.mxu1 %v528_v49  ;;  %v569_v49 = vunpack.c.l.s8.bf16 %v163_v44 }
 0x1b4   :  { %1426 = vmatprep.subr.bf16.mxu0 %v531_v42  ;;  %2431 = vmatprep.subr.bf16.mxu1 %v531_v42  ;;  %v162_v42 = vld [vmem:[#allocation2 + $0x3b0] sm:$0xff] }
 0x1b5   :  { %v568_v43 = vunpack.c.l.s8.bf16 %v162_v42  ;;  %v570_v52 = vunpack.c.h.s8.bf16 %v162_v42 }
 0x1b7   :  { %1427 = vmatpush1.bf16.msra.mxu0 %v530_v50  ;;  %2432 = vmatpush1.bf16.msra.mxu1 %v530_v50  ;;  %v571_v50 = vunpack.c.h.s8.bf16 %v163_v44 }
 0x1b8   :  { %1428 = vmatprep.subr.bf16.mxu0 %v533_v51  ;;  %2433 = vmatprep.subr.bf16.mxu1 %v533_v51  ;;  %v165_v51 = vld [vmem:[#allocation2 + $0x3c8] sm:$0xff] }
 0x1bb   :  { %1429 = vmatpush1.bf16.msra.mxu0 %v532_v55  ;;  %2434 = vmatpush1.bf16.msra.mxu1 %v532_v55  ;;  %v573_v55 = vunpack.c.l.s8.bf16 %v165_v51 }
 0x1bc   :  { %1430 = vmatprep.subr.bf16.mxu0 %v535_v58  ;;  %2435 = vmatprep.subr.bf16.mxu1 %v535_v58  ;;  %v164_v58 = vld [vmem:[#allocation2 + $0x3c0] sm:$0xff] }
 0x1bd   :  { %v572_v15 = vunpack.c.l.s8.bf16 %v164_v58  ;;  %v574_v16 = vunpack.c.h.s8.bf16 %v164_v58 }
 0x1bf   :  { %1431 = vmatpush1.bf16.msra.mxu0 %v534_v53  ;;  %2436 = vmatpush1.bf16.msra.mxu1 %v534_v53  ;;  %v575_v53 = vunpack.c.h.s8.bf16 %v165_v51 }
 0x1c0   :  { %1432 = vmatprep.subr.bf16.mxu0 %v537_v54  ;;  %2437 = vmatprep.subr.bf16.mxu1 %v537_v54  ;;  %v167_v54 = vld [vmem:[#allocation2 + $0x3d8] sm:$0xff] }
 0x1c3   :  { %1433 = vmatpush1.bf16.msra.mxu0 %v536_v59  ;;  %2438 = vmatpush1.bf16.msra.mxu1 %v536_v59  ;;  %v577_v59 = vunpack.c.l.s8.bf16 %v167_v54 }
 0x1c4   :  { %1434 = vmatprep.subr.bf16.mxu0 %v539_v56  ;;  %2439 = vmatprep.subr.bf16.mxu1 %v539_v56  ;;  %v166_v56 = vld [vmem:[#allocation2 + $0x3d0] sm:$0xff] }
 0x1c5   :  { %v576_v57 = vunpack.c.l.s8.bf16 %v166_v56  ;;  %v578_v62 = vunpack.c.h.s8.bf16 %v166_v56 }
 0x1c7   :  { %1435 = vmatpush1.bf16.msra.mxu0 %v538_v60  ;;  %2440 = vmatpush1.bf16.msra.mxu1 %v538_v60  ;;  %v579_v60 = vunpack.c.h.s8.bf16 %v167_v54 }
 0x1c8   :  { %1436 = vmatprep.subr.bf16.mxu0 %v541_v61  ;;  %2441 = vmatprep.subr.bf16.mxu1 %v541_v61  ;;  %v169_v61 = vld [vmem:[#allocation2 + $0x3e8] sm:$0xff] }
 0x1cb   :  { %1437 = vmatpush1.bf16.msra.mxu0 %v540_v63  ;;  %2442 = vmatpush1.bf16.msra.mxu1 %v540_v63  ;;  %v581_v63 = vunpack.c.l.s8.bf16 %v169_v61 }
 0x1cc   :  { %1438 = vmatprep.subr.bf16.mxu0 %v543_v0  ;;  %2443 = vmatprep.subr.bf16.mxu1 %v543_v0  ;;  %v168_v0 = vld [vmem:[#allocation2 + $0x3e0] sm:$0xff] }
 0x1cd   :  { %v580_v3 = vunpack.c.l.s8.bf16 %v168_v0  ;;  %v582_v1 = vunpack.c.h.s8.bf16 %v168_v0 }
 0x1cf   :  { %1439 = vmatpush1.bf16.msra.mxu0 %v542_v4  ;;  %2444 = vmatpush1.bf16.msra.mxu1 %v542_v4  ;;  %v583_v4 = vunpack.c.h.s8.bf16 %v169_v61 }
 0x1d0   :  { %1440 = vmatprep.subr.bf16.mxu0 %v545_v6  ;;  %2445 = vmatprep.subr.bf16.mxu1 %v545_v6  ;;  %v171_v6 = vld [vmem:[#allocation2 + $0x3f8] sm:$0xff] }
 0x1d1   :  { %v587_v11 = vunpack.c.h.s8.bf16 %v171_v6 }
 0x1d3   :  { %1441 = vmatpush1.bf16.msra.mxu0 %v544_v2  ;;  %2446 = vmatpush1.bf16.msra.mxu1 %v544_v2  ;;  %v585_v2 = vunpack.c.l.s8.bf16 %v171_v6 }
 0x1d4   :  { %1442 = vmatprep.subr.bf16.mxu0 %v547_v7  ;;  %2447 = vmatprep.subr.bf16.mxu1 %v547_v7  ;;  %v170_v7 = vld [vmem:[#allocation2 + $0x3f0] sm:$0xff] }
 0x1d7   :  { %1443 = vmatpush1.bf16.msra.mxu0 %v546_v9  ;;  %2448 = vmatpush1.bf16.msra.mxu1 %v546_v9  ;;  %v3483_v9 = vld [vmem:[%s3721_s0 + $0x34] sm:$0xff] }
 0x1d8   :  { %1444 = vmatprep.subr.bf16.mxu0 %v549_v10  ;;  %2449 = vmatprep.subr.bf16.mxu1 %v549_v10  ;;  %v584_v10 = vunpack.c.l.s8.bf16 %v170_v7  ;;  %v3491_v17 = vrot.slane %v3483_v9, %v3301_v14 }
 0x1db   :  { %1445 = vmatpush1.bf16.msra.mxu0 %v548_v12  ;;  %2450 = vmatpush1.bf16.msra.mxu1 %v548_v12  ;;  %v173_v12 = vld [vmem:[#allocation2 + $0x408] sm:$0xff] }
 0x1dc   :  { %1446 = vmatprep.subr.bf16.mxu0 %v551_v13  ;;  %2451 = vmatprep.subr.bf16.mxu1 %v551_v13  ;;  %v3487_v13 = vrot.slane %v3478_v8, %v3301_v14  ;;  %v591_v26 = vunpack.c.h.s8.bf16 %v173_v12 }
 0x1df   :  { %1447 = vmatpush1.bf16.msra.mxu0 %v550_v18  ;;  %2452 = vmatpush1.bf16.msra.mxu1 %v550_v18  ;;  %v586_v18 = vunpack.c.h.s8.bf16 %v170_v7 }
 0x1e0   :  { %1448 = vmatprep.subr.bf16.mxu0 %v553_v19  ;;  %2453 = vmatprep.subr.bf16.mxu1 %v553_v19  ;;  %v589_v19 = vunpack.c.l.s8.bf16 %v173_v12  ;;  %v3511_v12 = vrot.slane %v3487_v13, %v3301_v14 }
 0x1e3   :  { %1449 = vmatpush1.bf16.msra.mxu0 %v552_v21  ;;  %2454 = vmatpush1.bf16.msra.mxu1 %v552_v21  ;;  %v1031_v21 = vcombine.high %v3487_v13, %v3487_v13 }
 0x1e4   :  { %1450 = vmatprep.subr.bf16.mxu0 %v555_v22  ;;  %2455 = vmatprep.subr.bf16.mxu1 %v555_v22  ;;  %v2036_v22 = vcombine.high %v3491_v17, %v3491_v17 }
 0x1e6   :  { %v3505_v37 = vrot.slane %v2036_v22, %v3301_v14 }
 0x1e7   :  { %1451 = vmatpush1.bf16.msra.mxu0 %v554_v24  ;;  %2456 = vmatpush1.bf16.msra.mxu1 %v554_v24  ;;  %v2018_v24 = vcombine.high %v3467_v28, %v3467_v28 }
 0x1e8   :  { %1461 = vmatprep.subr.bf16.mxu0 %v557_v25  ;;  %2466 = vmatprep.subr.bf16.mxu1 %v557_v25  ;;  %v588_v25 = vunpack.c.l.s8.bf16 %v172_v20 }
 0x1ea   :  { %1453 = vmatmul.mubr.bf16.vlgmr.msra.gmra.mrb[0].mxu0 %v3463_v27  ;;  %2458 = vmatmul.mubr.bf16.vlgmr.msra.gmra.mrb[0].mxu1 %v3467_v28  ;;  %v590_v27 = vunpack.c.h.s8.bf16 %v172_v20 }
 0x1eb   :  { %1462 = vmatpush1.bf16.msra.mxu0 %v556_v29  ;;  %2467 = vmatpush1.bf16.msra.mxu1 %v556_v29  ;;  %v175_v29 = vld [vmem:[#allocation2 + $0x418] sm:$0xff] }
 0x1ec   :  { %1463 = vmatprep.subr.bf16.mxu0 %v559_v32  ;;  %2468 = vmatprep.subr.bf16.mxu1 %v559_v32  ;;  %v3502_v32 = vrot.slane %v1031_v21, %v3301_v14  ;;  %v593_v28 = vunpack.c.l.s8.bf16 %v175_v29  ;;  %v191_v21 = vld [vmem:[#allocation2 + $0x498] sm:$0xff] }
 0x1ed   :  { %1493 = vmatprep.mubr.bf16.mxu0 %v1015_v38  ;;  %2498 = vmatprep.mubr.bf16.mxu1 %v2020_v33  ;;  %v174_v38 = vld [vmem:[#allocation2 + $0x410] sm:$0xff] }
 0x1ee   :  { %v592_v33 = vunpack.c.l.s8.bf16 %v174_v38  ;;  %v594_v34 = vunpack.c.h.s8.bf16 %v174_v38  ;;  %v1063_v22 = vcombine.high %v3502_v32, %v3502_v32 }
 0x1ef   :  { %1464 = vmatpush1.bf16.msra.mxu0 %v558_v30  ;;  %2469 = vmatpush1.bf16.msra.mxu1 %v558_v30  ;;  %v595_v30 = vunpack.c.h.s8.bf16 %v175_v29  ;;  %v193_v29 = vld [vmem:[#allocation2 + $0x4a8] sm:$0xff] }
 0x1f0   :  { %1465 = vmatprep.subr.bf16.mxu0 %v561_v31  ;;  %2470 = vmatprep.subr.bf16.mxu1 %v561_v31  ;;  %v177_v31 = vld [vmem:[#allocation2 + $0x428] sm:$0xff]  ;;  %v631_v38 = vunpack.c.h.s8.bf16 %v193_v29 }
 0x1f3   :  { %1466 = vmatpush1.bf16.msra.mxu0 %v560_v35  ;;  %2471 = vmatpush1.bf16.msra.mxu1 %v560_v35  ;;  %v597_v35 = vunpack.c.l.s8.bf16 %v177_v31 }
 0x1f4   :  { %1467 = vmatprep.subr.bf16.mxu0 %v563_v36  ;;  %2472 = vmatprep.subr.bf16.mxu1 %v563_v36  ;;  %v176_v36 = vld [vmem:[#allocation2 + $0x420] sm:$0xff] }
 0x1f5   :  { %v596_v39 = vunpack.c.l.s8.bf16 %v176_v36  ;;  %v598_v46 = vunpack.c.h.s8.bf16 %v176_v36 }
 0x1f7   :  { %1468 = vmatpush1.bf16.msra.mxu0 %v562_v40  ;;  %2473 = vmatpush1.bf16.msra.mxu1 %v562_v40  ;;  %v599_v40 = vunpack.c.h.s8.bf16 %v177_v31 }
 0x1f8   :  { %1469 = vmatprep.subr.bf16.mxu0 %v565_v45  ;;  %2474 = vmatprep.subr.bf16.mxu1 %v565_v45  ;;  %v179_v45 = vld [vmem:[#allocation2 + $0x438] sm:$0xff] }
 0x1fb   :  { %1470 = vmatpush1.bf16.msra.mxu0 %v564_v47  ;;  %2475 = vmatpush1.bf16.msra.mxu1 %v564_v47  ;;  %v601_v47 = vunpack.c.l.s8.bf16 %v179_v45 }
 0x1fc   :  { %1471 = vmatprep.subr.bf16.mxu0 %v567_v41  ;;  %2476 = vmatprep.subr.bf16.mxu1 %v567_v41  ;;  %v178_v41 = vld [vmem:[#allocation2 + $0x430] sm:$0xff] }
 0x1fd   :  { %v600_v44 = vunpack.c.l.s8.bf16 %v178_v41  ;;  %v602_v42 = vunpack.c.h.s8.bf16 %v178_v41 }
 0x1ff   :  { %1472 = vmatpush1.bf16.msra.mxu0 %v566_v48  ;;  %2477 = vmatpush1.bf16.msra.mxu1 %v566_v48  ;;  %v603_v48 = vunpack.c.h.s8.bf16 %v179_v45 }
 0x200   :  { %1473 = vmatprep.subr.bf16.mxu0 %v569_v49  ;;  %2478 = vmatprep.subr.bf16.mxu1 %v569_v49  ;;  %v181_v49 = vld [vmem:[#allocation2 + $0x448] sm:$0xff] }
 0x203   :  { %1474 = vmatpush1.bf16.msra.mxu0 %v568_v43  ;;  %2479 = vmatpush1.bf16.msra.mxu1 %v568_v43  ;;  %v605_v43 = vunpack.c.l.s8.bf16 %v181_v49 }
 0x204   :  { %1475 = vmatprep.subr.bf16.mxu0 %v571_v50  ;;  %2480 = vmatprep.subr.bf16.mxu1 %v571_v50  ;;  %v180_v50 = vld [vmem:[#allocation2 + $0x440] sm:$0xff] }
 0x205   :  { %v604_v51 = vunpack.c.l.s8.bf16 %v180_v50  ;;  %v606_v58 = vunpack.c.h.s8.bf16 %v180_v50 }
 0x207   :  { %1476 = vmatpush1.bf16.msra.mxu0 %v570_v52  ;;  %2481 = vmatpush1.bf16.msra.mxu1 %v570_v52  ;;  %v607_v52 = vunpack.c.h.s8.bf16 %v181_v49 }
 0x208   :  { %1477 = vmatprep.subr.bf16.mxu0 %v573_v55  ;;  %2482 = vmatprep.subr.bf16.mxu1 %v573_v55  ;;  %v183_v55 = vld [vmem:[#allocation2 + $0x458] sm:$0xff] }
 0x20b   :  { %1478 = vmatpush1.bf16.msra.mxu0 %v572_v15  ;;  %2483 = vmatpush1.bf16.msra.mxu1 %v572_v15  ;;  %v609_v15 = vunpack.c.l.s8.bf16 %v183_v55 }
 0x20c   :  { %1479 = vmatprep.subr.bf16.mxu0 %v575_v53  ;;  %2484 = vmatprep.subr.bf16.mxu1 %v575_v53  ;;  %v182_v53 = vld [vmem:[#allocation2 + $0x450] sm:$0xff] }
 0x20d   :  { %v608_v54 = vunpack.c.l.s8.bf16 %v182_v53  ;;  %v610_v56 = vunpack.c.h.s8.bf16 %v182_v53 }
 0x20f   :  { %1480 = vmatpush1.bf16.msra.mxu0 %v574_v16  ;;  %2485 = vmatpush1.bf16.msra.mxu1 %v574_v16  ;;  %v611_v16 = vunpack.c.h.s8.bf16 %v183_v55 }
 0x210   :  { %1481 = vmatprep.subr.bf16.mxu0 %v577_v59  ;;  %2486 = vmatprep.subr.bf16.mxu1 %v577_v59  ;;  %v185_v59 = vld [vmem:[#allocation2 + $0x468] sm:$0xff] }
 0x213   :  { %1482 = vmatpush1.bf16.msra.mxu0 %v576_v57  ;;  %2487 = vmatpush1.bf16.msra.mxu1 %v576_v57  ;;  %v613_v57 = vunpack.c.l.s8.bf16 %v185_v59 }
 0x214   :  { %1483 = vmatprep.subr.bf16.mxu0 %v579_v60  ;;  %2488 = vmatprep.subr.bf16.mxu1 %v579_v60  ;;  %v184_v60 = vld [vmem:[#allocation2 + $0x460] sm:$0xff] }
 0x215   :  { %v612_v61 = vunpack.c.l.s8.bf16 %v184_v60  ;;  %v614_v0 = vunpack.c.h.s8.bf16 %v184_v60  ;;  %v2021_v60 = vcombine.high %v3483_v9, %v3483_v9  ;;  %v204_v9 = vld [vmem:[#allocation2 + $0x500] sm:$0xff] }
 0x217   :  { %1484 = vmatpush1.bf16.msra.mxu0 %v578_v62  ;;  %2489 = vmatpush1.bf16.msra.mxu1 %v578_v62  ;;  %v615_v62 = vunpack.c.h.s8.bf16 %v185_v59 }
 0x218   :  { %1485 = vmatprep.subr.bf16.mxu0 %v581_v63  ;;  %2490 = vmatprep.subr.bf16.mxu1 %v581_v63  ;;  %v187_v63 = vld [vmem:[#allocation2 + $0x478] sm:$0xff] }
 0x21b   :  { %1486 = vmatpush1.bf16.msra.mxu0 %v580_v3  ;;  %2491 = vmatpush1.bf16.msra.mxu1 %v580_v3  ;;  %v617_v3 = vunpack.c.l.s8.bf16 %v187_v63 }
 0x21c   :  { %1487 = vmatprep.subr.bf16.mxu0 %v583_v4  ;;  %2492 = vmatprep.subr.bf16.mxu1 %v583_v4  ;;  %v186_v4 = vld [vmem:[#allocation2 + $0x470] sm:$0xff] }
 0x21d   :  { %v616_v6 = vunpack.c.l.s8.bf16 %v186_v4  ;;  %v618_v7 = vunpack.c.h.s8.bf16 %v186_v4 }
 0x21f   :  { %1488 = vmatpush1.bf16.msra.mxu0 %v582_v1  ;;  %2493 = vmatpush1.bf16.msra.mxu1 %v582_v1  ;;  %v619_v1 = vunpack.c.h.s8.bf16 %v187_v63  ;;  %v205_v63 = vld [vmem:[#allocation2 + $0x508] sm:$0xff] }
 0x220   :  { %1489 = vmatprep.subr.bf16.mxu0 %v585_v2  ;;  %2494 = vmatprep.subr.bf16.mxu1 %v585_v2  ;;  %v189_v2 = vld [vmem:[#allocation2 + $0x488] sm:$0xff] }
 0x221   :  { %v623_v20 = vunpack.c.h.s8.bf16 %v189_v2 }
 0x223   :  { %1490 = vmatpush1.bf16.msra.mxu0 %v584_v10  ;;  %2495 = vmatpush1.bf16.msra.mxu1 %v584_v10  ;;  %v621_v10 = vunpack.c.l.s8.bf16 %v189_v2  ;;  %v1061_v2 = vcombine.high %v3511_v12, %v3511_v12 }
 0x224   :  { %1491 = vmatprep.subr.bf16.mxu0 %v587_v11  ;;  %2496 = vmatprep.subr.bf16.mxu1 %v587_v11  ;;  %v188_v11 = vld [vmem:[#allocation2 + $0x480] sm:$0xff] }
 0x225   :  { %v622_v13 = vunpack.c.h.s8.bf16 %v188_v11 }
 0x227   :  { %1492 = vmatpush1.bf16.msra.mxu0 %v586_v18  ;;  %2497 = vmatpush1.bf16.msra.mxu1 %v586_v18  ;;  %v3515_v18 = vrot.slane %v3491_v17, %v3301_v14  ;;  %v625_v17 = vunpack.c.l.s8.bf16 %v191_v21 }
 0x228   :  { %1502 = vmatprep.subr.bf16.mxu0 %v589_v19  ;;  %2507 = vmatprep.subr.bf16.mxu1 %v589_v19  ;;  %v620_v19 = vunpack.c.l.s8.bf16 %v188_v11  ;;  %v655_v11 = vunpack.c.h.s8.bf16 %v205_v63 }
 0x22a   :  { %1494 = vmatmul.mubr.bf16.vlgmr.msra.gmra.mrb[0].mxu0 %v1013_v23  ;;  %2499 = vmatmul.mubr.bf16.vlgmr.msra.gmra.mrb[0].mxu1 %v2018_v24  ;;  %v2068_v23 = vcombine.high %v3505_v37, %v3505_v37  ;;  %v190_v24 = vld [vmem:[#allocation2 + $0x490] sm:$0xff] }
 0x22b   :  { %1503 = vmatpush1.bf16.msra.mxu0 %v588_v25  ;;  %2508 = vmatpush1.bf16.msra.mxu1 %v588_v25  ;;  %v624_v25 = vunpack.c.l.s8.bf16 %v190_v24 }
 0x22c   :  { %1504 = vmatprep.subr.bf16.mxu0 %v591_v26  ;;  %2509 = vmatprep.subr.bf16.mxu1 %v591_v26  ;;  %v627_v26 = vunpack.c.h.s8.bf16 %v191_v21 }
 0x22d   :  { %1534 = vmatprep.mubr.bf16.mxu0 %v3502_v32  ;;  %2539 = vmatprep.mubr.bf16.mxu1 %v3505_v37  ;;  %v626_v32 = vunpack.c.h.s8.bf16 %v190_v24  ;;  %v629_v37 = vunpack.c.l.s8.bf16 %v193_v29 }
 0x22f   :  { %1505 = vmatpush1.bf16.msra.mxu0 %v590_v27  ;;  %2510 = vmatpush1.bf16.msra.mxu1 %v590_v27  ;;  %v192_v27 = vld [vmem:[#allocation2 + $0x4a0] sm:$0xff] }
 0x230   :  { %1506 = vmatprep.subr.bf16.mxu0 %v593_v28  ;;  %2511 = vmatprep.subr.bf16.mxu1 %v593_v28  ;;  %v628_v28 = vunpack.c.l.s8.bf16 %v192_v27 }
 0x233   :  { %1507 = vmatpush1.bf16.msra.mxu0 %v592_v33  ;;  %2512 = vmatpush1.bf16.msra.mxu1 %v592_v33  ;;  %v195_v33 = vld [vmem:[#allocation2 + $0x4b8] sm:$0xff] }
 0x234   :  { %1508 = vmatprep.subr.bf16.mxu0 %v595_v30  ;;  %2513 = vmatprep.subr.bf16.mxu1 %v595_v30  ;;  %v630_v30 = vunpack.c.h.s8.bf16 %v192_v27  ;;  %v633_v31 = vunpack.c.l.s8.bf16 %v195_v33  ;;  %v635_v36 = vunpack.c.h.s8.bf16 %v195_v33 }
 0x237   :  { %1509 = vmatpush1.bf16.msra.mxu0 %v594_v34  ;;  %2514 = vmatpush1.bf16.msra.mxu1 %v594_v34  ;;  %v194_v34 = vld [vmem:[#allocation2 + $0x4b0] sm:$0xff] }
 0x238   :  { %1510 = vmatprep.subr.bf16.mxu0 %v597_v35  ;;  %2515 = vmatprep.subr.bf16.mxu1 %v597_v35  ;;  %v632_v35 = vunpack.c.l.s8.bf16 %v194_v34 }
 0x23b   :  { %1511 = vmatpush1.bf16.msra.mxu0 %v596_v39  ;;  %2516 = vmatpush1.bf16.msra.mxu1 %v596_v39  ;;  %v197_v39 = vld [vmem:[#allocation2 + $0x4c8] sm:$0xff] }
 0x23c   :  { %1512 = vmatprep.subr.bf16.mxu0 %v599_v40  ;;  %2517 = vmatprep.subr.bf16.mxu1 %v599_v40  ;;  %v634_v40 = vunpack.c.h.s8.bf16 %v194_v34  ;;  %v637_v45 = vunpack.c.l.s8.bf16 %v197_v39  ;;  %v639_v41 = vunpack.c.h.s8.bf16 %v197_v39 }
 0x23f   :  { %1513 = vmatpush1.bf16.msra.mxu0 %v598_v46  ;;  %2518 = vmatpush1.bf16.msra.mxu1 %v598_v46  ;;  %v196_v46 = vld [vmem:[#allocation2 + $0x4c0] sm:$0xff] }
 0x240   :  { %1514 = vmatprep.subr.bf16.mxu0 %v601_v47  ;;  %2519 = vmatprep.subr.bf16.mxu1 %v601_v47  ;;  %v636_v47 = vunpack.c.l.s8.bf16 %v196_v46 }
 0x243   :  { %1515 = vmatpush1.bf16.msra.mxu0 %v600_v44  ;;  %2520 = vmatpush1.bf16.msra.mxu1 %v600_v44  ;;  %v199_v44 = vld [vmem:[#allocation2 + $0x4d8] sm:$0xff] }
 0x244   :  { %1516 = vmatprep.subr.bf16.mxu0 %v603_v48  ;;  %2521 = vmatprep.subr.bf16.mxu1 %v603_v48  ;;  %v638_v48 = vunpack.c.h.s8.bf16 %v196_v46  ;;  %v641_v49 = vunpack.c.l.s8.bf16 %v199_v44  ;;  %v643_v50 = vunpack.c.h.s8.bf16 %v199_v44 }
 0x247   :  { %1517 = vmatpush1.bf16.msra.mxu0 %v602_v42  ;;  %2522 = vmatpush1.bf16.msra.mxu1 %v602_v42  ;;  %v198_v42 = vld [vmem:[#allocation2 + $0x4d0] sm:$0xff] }
 0x248   :  { %1518 = vmatprep.subr.bf16.mxu0 %v605_v43  ;;  %2523 = vmatprep.subr.bf16.mxu1 %v605_v43  ;;  %v640_v43 = vunpack.c.l.s8.bf16 %v198_v42 }
 0x24b   :  { %1519 = vmatpush1.bf16.msra.mxu0 %v604_v51  ;;  %2524 = vmatpush1.bf16.msra.mxu1 %v604_v51  ;;  %v201_v51 = vld [vmem:[#allocation2 + $0x4e8] sm:$0xff] }
 0x24c   :  { %1520 = vmatprep.subr.bf16.mxu0 %v607_v52  ;;  %2525 = vmatprep.subr.bf16.mxu1 %v607_v52  ;;  %v642_v52 = vunpack.c.h.s8.bf16 %v198_v42  ;;  %v645_v55 = vunpack.c.l.s8.bf16 %v201_v51  ;;  %v647_v53 = vunpack.c.h.s8.bf16 %v201_v51 }
 0x24f   :  { %1521 = vmatpush1.bf16.msra.mxu0 %v606_v58  ;;  %2526 = vmatpush1.bf16.msra.mxu1 %v606_v58  ;;  %v200_v58 = vld [vmem:[#allocation2 + $0x4e0] sm:$0xff] }
 0x250   :  { %1522 = vmatprep.subr.bf16.mxu0 %v609_v15  ;;  %2527 = vmatprep.subr.bf16.mxu1 %v609_v15  ;;  %v644_v15 = vunpack.c.l.s8.bf16 %v200_v58 }
 0x253   :  { %1523 = vmatpush1.bf16.msra.mxu0 %v608_v54  ;;  %2528 = vmatpush1.bf16.msra.mxu1 %v608_v54  ;;  %v203_v54 = vld [vmem:[#allocation2 + $0x4f8] sm:$0xff] }
 0x254   :  { %1524 = vmatprep.subr.bf16.mxu0 %v611_v16  ;;  %2529 = vmatprep.subr.bf16.mxu1 %v611_v16  ;;  %v646_v16 = vunpack.c.h.s8.bf16 %v200_v58  ;;  %v649_v59 = vunpack.c.l.s8.bf16 %v203_v54 }
 0x257   :  { %1525 = vmatpush1.bf16.msra.mxu0 %v610_v56  ;;  %2530 = vmatpush1.bf16.msra.mxu1 %v610_v56  ;;  %v202_v56 = vld [vmem:[#allocation2 + $0x4f0] sm:$0xff] }
 0x258   :  { %1526 = vmatprep.subr.bf16.mxu0 %v613_v57  ;;  %2531 = vmatprep.subr.bf16.mxu1 %v613_v57  ;;  %v1016_v57 = vcombine.high %v3478_v8, %v3478_v8  ;;  %v650_v4 = vunpack.c.h.s8.bf16 %v202_v56  ;;  %v653_v8 = vunpack.c.l.s8.bf16 %v205_v63 }
 0x25b   :  { %1527 = vmatpush1.bf16.msra.mxu0 %v612_v61  ;;  %2532 = vmatpush1.bf16.msra.mxu1 %v612_v61  ;;  %v648_v61 = vunpack.c.l.s8.bf16 %v202_v56 }
 0x25c   :  { %1528 = vmatprep.subr.bf16.mxu0 %v615_v62  ;;  %2533 = vmatprep.subr.bf16.mxu1 %v615_v62  ;;  %v651_v62 = vunpack.c.h.s8.bf16 %v203_v54 }
 0x25f   :  { %1529 = vmatpush1.bf16.msra.mxu0 %v614_v0  ;;  %2534 = vmatpush1.bf16.msra.mxu1 %v614_v0  ;;  %v3528_v0 = vrot.slane %v1016_v57, %v3301_v14 }
 0x260   :  { %1530 = vmatprep.subr.bf16.mxu0 %v617_v3  ;;  %2535 = vmatprep.subr.bf16.mxu1 %v617_v3  ;;  %v3531_v3 = vrot.slane %v2021_v60, %v3301_v14  ;;  %v220_v60 = vld [vmem:[#allocation2 + $0x580] sm:$0xff] }
 0x261   :  { %v684_v63 = vunpack.c.l.s8.bf16 %v220_v60 }
 0x263   :  { %1531 = vmatpush1.bf16.msra.mxu0 %v616_v6  ;;  %2536 = vmatpush1.bf16.msra.mxu1 %v616_v6  ;;  %v1032_v6 = vcombine.high %v3528_v0, %v3528_v0 }
 0x264   :  { %1532 = vmatprep.subr.bf16.mxu0 %v619_v1  ;;  %2537 = vmatprep.subr.bf16.mxu1 %v619_v1  ;;  %v2037_v1 = vcombine.high %v3531_v3, %v3531_v3 }
 0x266   :  { %v3545_v21 = vrot.slane %v2037_v1, %v3301_v14  ;;  %v222_v1 = vld [vmem:[#allocation2 + $0x590] sm:$0xff] }
 0x267   :  { %1533 = vmatpush1.bf16.msra.mxu0 %v618_v7  ;;  %2538 = vmatpush1.bf16.msra.mxu1 %v618_v7  ;;  %v2066_v7 = vcombine.high %v3515_v18, %v3515_v18 }
 0x268   :  { %1543 = vmatprep.subr.bf16.mxu0 %v621_v10  ;;  %2548 = vmatprep.subr.bf16.mxu1 %v621_v10  ;;  %v652_v10 = vunpack.c.l.s8.bf16 %v204_v9 }
 0x26a   :  { %1535 = vmatmul.mubr.bf16.vlgmr.msra.gmra.mrb[0].mxu0 %v3511_v12  ;;  %2540 = vmatmul.mubr.bf16.vlgmr.msra.gmra.mrb[0].mxu1 %v3515_v18  ;;  %v654_v12 = vunpack.c.h.s8.bf16 %v204_v9 }
 0x26b   :  { %1544 = vmatpush1.bf16.msra.mxu0 %v620_v19  ;;  %2549 = vmatpush1.bf16.msra.mxu1 %v620_v19  ;;  %v207_v19 = vld [vmem:[#allocation2 + $0x518] sm:$0xff] }
 0x26c   :  { %1545 = vmatprep.subr.bf16.mxu0 %v623_v20  ;;  %2550 = vmatprep.subr.bf16.mxu1 %v623_v20  ;;  %v3542_v20 = vrot.slane %v1032_v6, %v3301_v14  ;;  %v657_v18 = vunpack.c.l.s8.bf16 %v207_v19  ;;  %v2069_v6 = vcombine.high %v3545_v21, %v3545_v21 }
 0x26d   :  { %1575 = vmatprep.mubr.bf16.mxu0 %v1063_v22  ;;  %2580 = vmatprep.mubr.bf16.mxu1 %v2068_v23  ;;  %v206_v22 = vld [vmem:[#allocation2 + $0x510] sm:$0xff] }
 0x26e   :  { %v656_v23 = vunpack.c.l.s8.bf16 %v206_v22  ;;  %v658_v24 = vunpack.c.h.s8.bf16 %v206_v22  ;;  %v1064_v9 = vcombine.high %v3542_v20, %v3542_v20 }
 0x26f   :  { %1546 = vmatpush1.bf16.msra.mxu0 %v622_v13  ;;  %2551 = vmatpush1.bf16.msra.mxu1 %v622_v13  ;;  %v659_v13 = vunpack.c.h.s8.bf16 %v207_v19 }
 0x270   :  { %1547 = vmatprep.subr.bf16.mxu0 %v625_v17  ;;  %2552 = vmatprep.subr.bf16.mxu1 %v625_v17  ;;  %v209_v17 = vld [vmem:[#allocation2 + $0x528] sm:$0xff] }
 0x273   :  { %1548 = vmatpush1.bf16.msra.mxu0 %v624_v25  ;;  %2553 = vmatpush1.bf16.msra.mxu1 %v624_v25  ;;  %v661_v25 = vunpack.c.l.s8.bf16 %v209_v17 }
 0x274   :  { %1549 = vmatprep.subr.bf16.mxu0 %v627_v26  ;;  %2554 = vmatprep.subr.bf16.mxu1 %v627_v26  ;;  %v208_v26 = vld [vmem:[#allocation2 + $0x520] sm:$0xff] }
 0x275   :  { %v660_v29 = vunpack.c.l.s8.bf16 %v208_v26  ;;  %v662_v27 = vunpack.c.h.s8.bf16 %v208_v26 }
 0x277   :  { %1550 = vmatpush1.bf16.msra.mxu0 %v626_v32  ;;  %2555 = vmatpush1.bf16.msra.mxu1 %v626_v32  ;;  %v663_v32 = vunpack.c.h.s8.bf16 %v209_v17 }
 0x278   :  { %1551 = vmatprep.subr.bf16.mxu0 %v629_v37  ;;  %2556 = vmatprep.subr.bf16.mxu1 %v629_v37  ;;  %v211_v37 = vld [vmem:[#allocation2 + $0x538] sm:$0xff] }
 0x27b   :  { %1552 = vmatpush1.bf16.msra.mxu0 %v628_v28  ;;  %2557 = vmatpush1.bf16.msra.mxu1 %v628_v28  ;;  %v665_v28 = vunpack.c.l.s8.bf16 %v211_v37 }
 0x27c   :  { %1553 = vmatprep.subr.bf16.mxu0 %v631_v38  ;;  %2558 = vmatprep.subr.bf16.mxu1 %v631_v38  ;;  %v210_v38 = vld [vmem:[#allocation2 + $0x530] sm:$0xff] }
 0x27d   :  { %v664_v33 = vunpack.c.l.s8.bf16 %v210_v38  ;;  %v666_v34 = vunpack.c.h.s8.bf16 %v210_v38 }
 0x27f   :  { %1554 = vmatpush1.bf16.msra.mxu0 %v630_v30  ;;  %2559 = vmatpush1.bf16.msra.mxu1 %v630_v30  ;;  %v667_v30 = vunpack.c.h.s8.bf16 %v211_v37 }
 0x280   :  { %1555 = vmatprep.subr.bf16.mxu0 %v633_v31  ;;  %2560 = vmatprep.subr.bf16.mxu1 %v633_v31  ;;  %v213_v31 = vld [vmem:[#allocation2 + $0x548] sm:$0xff] }
 0x283   :  { %1556 = vmatpush1.bf16.msra.mxu0 %v632_v35  ;;  %2561 = vmatpush1.bf16.msra.mxu1 %v632_v35  ;;  %v669_v35 = vunpack.c.l.s8.bf16 %v213_v31 }
 0x284   :  { %1557 = vmatprep.subr.bf16.mxu0 %v635_v36  ;;  %2562 = vmatprep.subr.bf16.mxu1 %v635_v36  ;;  %v212_v36 = vld [vmem:[#allocation2 + $0x540] sm:$0xff] }
 0x285   :  { %v668_v39 = vunpack.c.l.s8.bf16 %v212_v36  ;;  %v670_v46 = vunpack.c.h.s8.bf16 %v212_v36 }
 0x287   :  { %1558 = vmatpush1.bf16.msra.mxu0 %v634_v40  ;;  %2563 = vmatpush1.bf16.msra.mxu1 %v634_v40  ;;  %v671_v40 = vunpack.c.h.s8.bf16 %v213_v31 }
 0x288   :  { %1559 = vmatprep.subr.bf16.mxu0 %v637_v45  ;;  %2564 = vmatprep.subr.bf16.mxu1 %v637_v45  ;;  %v215_v45 = vld [vmem:[#allocation2 + $0x558] sm:$0xff] }
 0x28b   :  { %1560 = vmatpush1.bf16.msra.mxu0 %v636_v47  ;;  %2565 = vmatpush1.bf16.msra.mxu1 %v636_v47  ;;  %v673_v47 = vunpack.c.l.s8.bf16 %v215_v45 }
 0x28c   :  { %1561 = vmatprep.subr.bf16.mxu0 %v639_v41  ;;  %2566 = vmatprep.subr.bf16.mxu1 %v639_v41  ;;  %v214_v41 = vld [vmem:[#allocation2 + $0x550] sm:$0xff] }
 0x28d   :  { %v672_v44 = vunpack.c.l.s8.bf16 %v214_v41  ;;  %v674_v42 = vunpack.c.h.s8.bf16 %v214_v41 }
 0x28f   :  { %1562 = vmatpush1.bf16.msra.mxu0 %v638_v48  ;;  %2567 = vmatpush1.bf16.msra.mxu1 %v638_v48  ;;  %v675_v48 = vunpack.c.h.s8.bf16 %v215_v45 }
 0x290   :  { %1563 = vmatprep.subr.bf16.mxu0 %v641_v49  ;;  %2568 = vmatprep.subr.bf16.mxu1 %v641_v49  ;;  %v217_v49 = vld [vmem:[#allocation2 + $0x568] sm:$0xff] }
 0x293   :  { %1564 = vmatpush1.bf16.msra.mxu0 %v640_v43  ;;  %2569 = vmatpush1.bf16.msra.mxu1 %v640_v43  ;;  %v677_v43 = vunpack.c.l.s8.bf16 %v217_v49 }
 0x294   :  { %1565 = vmatprep.subr.bf16.mxu0 %v643_v50  ;;  %2570 = vmatprep.subr.bf16.mxu1 %v643_v50  ;;  %v216_v50 = vld [vmem:[#allocation2 + $0x560] sm:$0xff] }
 0x295   :  { %v676_v51 = vunpack.c.l.s8.bf16 %v216_v50  ;;  %v678_v58 = vunpack.c.h.s8.bf16 %v216_v50 }
 0x297   :  { %1566 = vmatpush1.bf16.msra.mxu0 %v642_v52  ;;  %2571 = vmatpush1.bf16.msra.mxu1 %v642_v52  ;;  %v679_v52 = vunpack.c.h.s8.bf16 %v217_v49  ;;  %v3566_v49 = vld [vmem:[%s3721_s0 + $0x18] sm:$0xff] }
 0x298   :  { %1567 = vmatprep.subr.bf16.mxu0 %v645_v55  ;;  %2572 = vmatprep.subr.bf16.mxu1 %v645_v55  ;;  %v219_v55 = vld [vmem:[#allocation2 + $0x578] sm:$0xff] }
 0x29b   :  { %1568 = vmatpush1.bf16.msra.mxu0 %v644_v15  ;;  %2573 = vmatpush1.bf16.msra.mxu1 %v644_v15  ;;  %v681_v15 = vunpack.c.l.s8.bf16 %v219_v55 }
 0x29c   :  { %1569 = vmatprep.subr.bf16.mxu0 %v647_v53  ;;  %2574 = vmatprep.subr.bf16.mxu1 %v647_v53  ;;  %v218_v53 = vld [vmem:[#allocation2 + $0x570] sm:$0xff] }
 0x29d   :  { %v680_v54 = vunpack.c.l.s8.bf16 %v218_v53  ;;  %v682_v56 = vunpack.c.h.s8.bf16 %v218_v53  ;;  %v236_v53 = vld [vmem:[#allocation2 + $0x600] sm:$0xff] }
 0x29f   :  { %1570 = vmatpush1.bf16.msra.mxu0 %v646_v16  ;;  %2575 = vmatpush1.bf16.msra.mxu1 %v646_v16  ;;  %v683_v16 = vunpack.c.h.s8.bf16 %v219_v55 }
 0x2a0   :  { %1571 = vmatprep.subr.bf16.mxu0 %v649_v59  ;;  %2576 = vmatprep.subr.bf16.mxu1 %v649_v59  ;;  %v221_v59 = vld [vmem:[#allocation2 + $0x588] sm:$0xff] }
 0x2a1   :  { %v685_v57 = vunpack.c.l.s8.bf16 %v221_v59 }
 0x2a3   :  { %1572 = vmatpush1.bf16.msra.mxu0 %v648_v61  ;;  %2577 = vmatpush1.bf16.msra.mxu1 %v648_v61  ;;  %v3551_v61 = vrot.slane %v3528_v0, %v3301_v14  ;;  %v686_v0 = vunpack.c.h.s8.bf16 %v220_v60 }
 0x2a4   :  { %1573 = vmatprep.subr.bf16.mxu0 %v651_v62  ;;  %2578 = vmatprep.subr.bf16.mxu1 %v651_v62  ;;  %v3555_v62 = vrot.slane %v3531_v3, %v3301_v14 }
 0x2a7   :  { %1574 = vmatpush1.bf16.msra.mxu0 %v650_v4  ;;  %2579 = vmatpush1.bf16.msra.mxu1 %v650_v4  ;;  %v687_v4 = vunpack.c.h.s8.bf16 %v221_v59  ;;  %v1062_v59 = vcombine.high %v3551_v61, %v3551_v61 }
 0x2a8   :  { %1584 = vmatprep.subr.bf16.mxu0 %v653_v8  ;;  %2589 = vmatprep.subr.bf16.mxu1 %v653_v8  ;;  %v223_v8 = vld [vmem:[#allocation2 + $0x598] sm:$0xff] }
 0x2a9   :  { %v689_v3 = vunpack.c.l.s8.bf16 %v223_v8 }
 0x2aa   :  { %1576 = vmatmul.mubr.bf16.vlgmr.msra.gmra.mrb[0].mxu0 %v1061_v2  ;;  %2581 = vmatmul.mubr.bf16.vlgmr.msra.gmra.mrb[0].mxu1 %v2066_v7  ;;  %v688_v2 = vunpack.c.l.s8.bf16 %v222_v1  ;;  %v691_v7 = vunpack.c.h.s8.bf16 %v223_v8 }
 0x2ab   :  { %1585 = vmatpush1.bf16.msra.mxu0 %v652_v10  ;;  %2590 = vmatpush1.bf16.msra.mxu1 %v652_v10  ;;  %v225_v10 = vld [vmem:[#allocation2 + $0x5a8] sm:$0xff] }
 0x2ac   :  { %1586 = vmatprep.subr.bf16.mxu0 %v655_v11  ;;  %2591 = vmatprep.subr.bf16.mxu1 %v655_v11  ;;  %v690_v11 = vunpack.c.h.s8.bf16 %v222_v1  ;;  %v693_v19 = vunpack.c.l.s8.bf16 %v225_v10 }
 0x2ad   :  { %1616 = vmatprep.mubr.bf16.mxu0 %v3542_v20  ;;  %2621 = vmatprep.mubr.bf16.mxu1 %v3545_v21  ;;  %v224_v20 = vld [vmem:[#allocation2 + $0x5a0] sm:$0xff] }
 0x2ae   :  { %v692_v21 = vunpack.c.l.s8.bf16 %v224_v20  ;;  %v694_v22 = vunpack.c.h.s8.bf16 %v224_v20 }
 0x2af   :  { %1587 = vmatpush1.bf16.msra.mxu0 %v654_v12  ;;  %2592 = vmatpush1.bf16.msra.mxu1 %v654_v12  ;;  %v695_v12 = vunpack.c.h.s8.bf16 %v225_v10 }
 0x2b0   :  { %1588 = vmatprep.subr.bf16.mxu0 %v657_v18  ;;  %2593 = vmatprep.subr.bf16.mxu1 %v657_v18  ;;  %v227_v18 = vld [vmem:[#allocation2 + $0x5b8] sm:$0xff] }
 0x2b3   :  { %1589 = vmatpush1.bf16.msra.mxu0 %v656_v23  ;;  %2594 = vmatpush1.bf16.msra.mxu1 %v656_v23  ;;  %v697_v23 = vunpack.c.l.s8.bf16 %v227_v18 }
 0x2b4   :  { %1590 = vmatprep.subr.bf16.mxu0 %v659_v13  ;;  %2595 = vmatprep.subr.bf16.mxu1 %v659_v13  ;;  %v226_v13 = vld [vmem:[#allocation2 + $0x5b0] sm:$0xff] }
 0x2b5   :  { %v696_v17 = vunpack.c.l.s8.bf16 %v226_v13  ;;  %v698_v26 = vunpack.c.h.s8.bf16 %v226_v13 }
 0x2b7   :  { %1591 = vmatpush1.bf16.msra.mxu0 %v658_v24  ;;  %2596 = vmatpush1.bf16.msra.mxu1 %v658_v24  ;;  %v699_v24 = vunpack.c.h.s8.bf16 %v227_v18 }
 0x2b8   :  { %1592 = vmatprep.subr.bf16.mxu0 %v661_v25  ;;  %2597 = vmatprep.subr.bf16.mxu1 %v661_v25  ;;  %v229_v25 = vld [vmem:[#allocation2 + $0x5c8] sm:$0xff] }
 0x2bb   :  { %1593 = vmatpush1.bf16.msra.mxu0 %v660_v29  ;;  %2598 = vmatpush1.bf16.msra.mxu1 %v660_v29  ;;  %v701_v29 = vunpack.c.l.s8.bf16 %v229_v25 }
 0x2bc   :  { %1594 = vmatprep.subr.bf16.mxu0 %v663_v32  ;;  %2599 = vmatprep.subr.bf16.mxu1 %v663_v32  ;;  %v228_v32 = vld [vmem:[#allocation2 + $0x5c0] sm:$0xff] }
 0x2bd   :  { %v700_v37 = vunpack.c.l.s8.bf16 %v228_v32  ;;  %v702_v38 = vunpack.c.h.s8.bf16 %v228_v32 }
 0x2bf   :  { %1595 = vmatpush1.bf16.msra.mxu0 %v662_v27  ;;  %2600 = vmatpush1.bf16.msra.mxu1 %v662_v27  ;;  %v703_v27 = vunpack.c.h.s8.bf16 %v229_v25 }
 0x2c0   :  { %1596 = vmatprep.subr.bf16.mxu0 %v665_v28  ;;  %2601 = vmatprep.subr.bf16.mxu1 %v665_v28  ;;  %v231_v28 = vld [vmem:[#allocation2 + $0x5d8] sm:$0xff] }
 0x2c3   :  { %1597 = vmatpush1.bf16.msra.mxu0 %v664_v33  ;;  %2602 = vmatpush1.bf16.msra.mxu1 %v664_v33  ;;  %v705_v33 = vunpack.c.l.s8.bf16 %v231_v28 }
 0x2c4   :  { %1598 = vmatprep.subr.bf16.mxu0 %v667_v30  ;;  %2603 = vmatprep.subr.bf16.mxu1 %v667_v30  ;;  %v230_v30 = vld [vmem:[#allocation2 + $0x5d0] sm:$0xff] }
 0x2c5   :  { %v704_v31 = vunpack.c.l.s8.bf16 %v230_v30  ;;  %v706_v36 = vunpack.c.h.s8.bf16 %v230_v30 }
 0x2c7   :  { %1599 = vmatpush1.bf16.msra.mxu0 %v666_v34  ;;  %2604 = vmatpush1.bf16.msra.mxu1 %v666_v34  ;;  %v707_v34 = vunpack.c.h.s8.bf16 %v231_v28 }
 0x2c8   :  { %1600 = vmatprep.subr.bf16.mxu0 %v669_v35  ;;  %2605 = vmatprep.subr.bf16.mxu1 %v669_v35  ;;  %v233_v35 = vld [vmem:[#allocation2 + $0x5e8] sm:$0xff] }
 0x2cb   :  { %1601 = vmatpush1.bf16.msra.mxu0 %v668_v39  ;;  %2606 = vmatpush1.bf16.msra.mxu1 %v668_v39  ;;  %v709_v39 = vunpack.c.l.s8.bf16 %v233_v35 }
 0x2cc   :  { %1602 = vmatprep.subr.bf16.mxu0 %v671_v40  ;;  %2607 = vmatprep.subr.bf16.mxu1 %v671_v40  ;;  %v232_v40 = vld [vmem:[#allocation2 + $0x5e0] sm:$0xff] }
 0x2cd   :  { %v708_v45 = vunpack.c.l.s8.bf16 %v232_v40  ;;  %v710_v41 = vunpack.c.h.s8.bf16 %v232_v40 }
 0x2cf   :  { %1603 = vmatpush1.bf16.msra.mxu0 %v670_v46  ;;  %2608 = vmatpush1.bf16.msra.mxu1 %v670_v46  ;;  %v711_v46 = vunpack.c.h.s8.bf16 %v233_v35 }
 0x2d0   :  { %1604 = vmatprep.subr.bf16.mxu0 %v673_v47  ;;  %2609 = vmatprep.subr.bf16.mxu1 %v673_v47  ;;  %v235_v47 = vld [vmem:[#allocation2 + $0x5f8] sm:$0xff] }
 0x2d1   :  { %v715_v50 = vunpack.c.h.s8.bf16 %v235_v47 }
 0x2d3   :  { %1605 = vmatpush1.bf16.msra.mxu0 %v672_v44  ;;  %2610 = vmatpush1.bf16.msra.mxu1 %v672_v44  ;;  %v713_v44 = vunpack.c.l.s8.bf16 %v235_v47 }
 0x2d4   :  { %1606 = vmatprep.subr.bf16.mxu0 %v675_v48  ;;  %2611 = vmatprep.subr.bf16.mxu1 %v675_v48  ;;  %v234_v48 = vld [vmem:[#allocation2 + $0x5f0] sm:$0xff] }
 0x2d7   :  { %1607 = vmatpush1.bf16.msra.mxu0 %v674_v42  ;;  %2612 = vmatpush1.bf16.msra.mxu1 %v674_v42  ;;  %v3571_v42 = vld [vmem:[%s3721_s0 + $0x3c] sm:$0xff] }
 0x2d8   :  { %1608 = vmatprep.subr.bf16.mxu0 %v677_v43  ;;  %2613 = vmatprep.subr.bf16.mxu1 %v677_v43  ;;  %v712_v43 = vunpack.c.l.s8.bf16 %v234_v48  ;;  %v3579_v55 = vrot.slane %v3571_v42, %v3301_v14 }
 0x2db   :  { %1609 = vmatpush1.bf16.msra.mxu0 %v676_v51  ;;  %2614 = vmatpush1.bf16.msra.mxu1 %v676_v51  ;;  %v237_v51 = vld [vmem:[#allocation2 + $0x608] sm:$0xff] }
 0x2dc   :  { %1610 = vmatprep.subr.bf16.mxu0 %v679_v52  ;;  %2615 = vmatprep.subr.bf16.mxu1 %v679_v52  ;;  %v3575_v52 = vrot.slane %v3566_v49, %v3301_v14  ;;  %v719_v60 = vunpack.c.h.s8.bf16 %v237_v51 }
 0x2df   :  { %1611 = vmatpush1.bf16.msra.mxu0 %v678_v58  ;;  %2616 = vmatpush1.bf16.msra.mxu1 %v678_v58  ;;  %v714_v58 = vunpack.c.h.s8.bf16 %v234_v48 }
 0x2e0   :  { %1612 = vmatprep.subr.bf16.mxu0 %v681_v15  ;;  %2617 = vmatprep.subr.bf16.mxu1 %v681_v15  ;;  %v717_v15 = vunpack.c.l.s8.bf16 %v237_v51  ;;  %v3599_v51 = vrot.slane %v3575_v52, %v3301_v14 }
 0x2e3   :  { %1613 = vmatpush1.bf16.msra.mxu0 %v680_v54  ;;  %2618 = vmatpush1.bf16.msra.mxu1 %v680_v54  ;;  %v1080_v54 = vcombine.high %v3575_v52, %v3575_v52 }
 0x2e4   :  { %1614 = vmatprep.subr.bf16.mxu0 %v683_v16  ;;  %2619 = vmatprep.subr.bf16.mxu1 %v683_v16  ;;  %v2085_v16 = vcombine.high %v3579_v55, %v3579_v55 }
 0x2e6   :  { %v3593_v8 = vrot.slane %v2085_v16, %v3301_v14 }
 0x2e7   :  { %1615 = vmatpush1.bf16.msra.mxu0 %v682_v56  ;;  %2620 = vmatpush1.bf16.msra.mxu1 %v682_v56  ;;  %v2067_v56 = vcombine.high %v3555_v62, %v3555_v62 }
 0x2e8   :  { %1625 = vmatprep.subr.bf16.mxu0 %v685_v57  ;;  %2630 = vmatprep.subr.bf16.mxu1 %v685_v57  ;;  %v716_v57 = vunpack.c.l.s8.bf16 %v236_v53 }
 0x2ea   :  { %1617 = vmatmul.mubr.bf16.vlgmr.msra.gmra.mrb[0].mxu0 %v3551_v61  ;;  %2622 = vmatmul.mubr.bf16.vlgmr.msra.gmra.mrb[0].mxu1 %v3555_v62  ;;  %v718_v61 = vunpack.c.h.s8.bf16 %v236_v53 }
 0x2eb   :  { %1626 = vmatpush1.bf16.msra.mxu0 %v684_v63  ;;  %2631 = vmatpush1.bf16.msra.mxu1 %v684_v63  ;;  %v239_v63 = vld [vmem:[#allocation2 + $0x618] sm:$0xff] }
 0x2ec   :  { %1627 = vmatprep.subr.bf16.mxu0 %v687_v4  ;;  %2632 = vmatprep.subr.bf16.mxu1 %v687_v4  ;;  %v3590_v4 = vrot.slane %v1080_v54, %v3301_v14  ;;  %v721_v62 = vunpack.c.l.s8.bf16 %v239_v63  ;;  %v255_v54 = vld [vmem:[#allocation2 + $0x698] sm:$0xff] }
 0x2ed   :  { %1657 = vmatprep.mubr.bf16.mxu0 %v1064_v9  ;;  %2662 = vmatprep.mubr.bf16.mxu1 %v2069_v6  ;;  %v238_v9 = vld [vmem:[#allocation2 + $0x610] sm:$0xff] }
 0x2ee   :  { %v720_v6 = vunpack.c.l.s8.bf16 %v238_v9  ;;  %v722_v1 = vunpack.c.h.s8.bf16 %v238_v9  ;;  %v1112_v16 = vcombine.high %v3590_v4, %v3590_v4 }
 0x2ef   :  { %1628 = vmatpush1.bf16.msra.mxu0 %v686_v0  ;;  %2633 = vmatpush1.bf16.msra.mxu1 %v686_v0  ;;  %v723_v0 = vunpack.c.h.s8.bf16 %v239_v63  ;;  %v257_v63 = vld [vmem:[#allocation2 + $0x6a8] sm:$0xff] }
 0x2f0   :  { %1629 = vmatprep.subr.bf16.mxu0 %v689_v3  ;;  %2634 = vmatprep.subr.bf16.mxu1 %v689_v3  ;;  %v241_v3 = vld [vmem:[#allocation2 + $0x628] sm:$0xff]  ;;  %v759_v9 = vunpack.c.h.s8.bf16 %v257_v63 }
 0x2f3   :  { %1630 = vmatpush1.bf16.msra.mxu0 %v688_v2  ;;  %2635 = vmatpush1.bf16.msra.mxu1 %v688_v2  ;;  %v725_v2 = vunpack.c.l.s8.bf16 %v241_v3 }
 0x2f4   :  { %1631 = vmatprep.subr.bf16.mxu0 %v691_v7  ;;  %2636 = vmatprep.subr.bf16.mxu1 %v691_v7  ;;  %v240_v7 = vld [vmem:[#allocation2 + $0x620] sm:$0xff] }
 0x2f5   :  { %v724_v10 = vunpack.c.l.s8.bf16 %v240_v7  ;;  %v726_v20 = vunpack.c.h.s8.bf16 %v240_v7 }
 0x2f7   :  { %1632 = vmatpush1.bf16.msra.mxu0 %v690_v11  ;;  %2637 = vmatpush1.bf16.msra.mxu1 %v690_v11  ;;  %v727_v11 = vunpack.c.h.s8.bf16 %v241_v3 }
 0x2f8   :  { %1633 = vmatprep.subr.bf16.mxu0 %v693_v19  ;;  %2638 = vmatprep.subr.bf16.mxu1 %v693_v19  ;;  %v243_v19 = vld [vmem:[#allocation2 + $0x638] sm:$0xff] }
 0x2fb   :  { %1634 = vmatpush1.bf16.msra.mxu0 %v692_v21  ;;  %2639 = vmatpush1.bf16.msra.mxu1 %v692_v21  ;;  %v729_v21 = vunpack.c.l.s8.bf16 %v243_v19 }
 0x2fc   :  { %1635 = vmatprep.subr.bf16.mxu0 %v695_v12  ;;  %2640 = vmatprep.subr.bf16.mxu1 %v695_v12  ;;  %v242_v12 = vld [vmem:[#allocation2 + $0x630] sm:$0xff] }
 0x2fd   :  { %v728_v18 = vunpack.c.l.s8.bf16 %v242_v12  ;;  %v730_v13 = vunpack.c.h.s8.bf16 %v242_v12 }
 0x2ff   :  { %1636 = vmatpush1.bf16.msra.mxu0 %v694_v22  ;;  %2641 = vmatpush1.bf16.msra.mxu1 %v694_v22  ;;  %v731_v22 = vunpack.c.h.s8.bf16 %v243_v19 }
 0x300   :  { %1637 = vmatprep.subr.bf16.mxu0 %v697_v23  ;;  %2642 = vmatprep.subr.bf16.mxu1 %v697_v23  ;;  %v245_v23 = vld [vmem:[#allocation2 + $0x648] sm:$0xff] }
 0x303   :  { %1638 = vmatpush1.bf16.msra.mxu0 %v696_v17  ;;  %2643 = vmatpush1.bf16.msra.mxu1 %v696_v17  ;;  %v733_v17 = vunpack.c.l.s8.bf16 %v245_v23 }
 0x304   :  { %1639 = vmatprep.subr.bf16.mxu0 %v699_v24  ;;  %2644 = vmatprep.subr.bf16.mxu1 %v699_v24  ;;  %v244_v24 = vld [vmem:[#allocation2 + $0x640] sm:$0xff] }
 0x305   :  { %v732_v25 = vunpack.c.l.s8.bf16 %v244_v24  ;;  %v734_v32 = vunpack.c.h.s8.bf16 %v244_v24 }
 0x307   :  { %1640 = vmatpush1.bf16.msra.mxu0 %v698_v26  ;;  %2645 = vmatpush1.bf16.msra.mxu1 %v698_v26  ;;  %v735_v26 = vunpack.c.h.s8.bf16 %v245_v23 }
 0x308   :  { %1641 = vmatprep.subr.bf16.mxu0 %v701_v29  ;;  %2646 = vmatprep.subr.bf16.mxu1 %v701_v29  ;;  %v247_v29 = vld [vmem:[#allocation2 + $0x658] sm:$0xff] }
 0x30b   :  { %1642 = vmatpush1.bf16.msra.mxu0 %v700_v37  ;;  %2647 = vmatpush1.bf16.msra.mxu1 %v700_v37  ;;  %v737_v37 = vunpack.c.l.s8.bf16 %v247_v29 }
 0x30c   :  { %1643 = vmatprep.subr.bf16.mxu0 %v703_v27  ;;  %2648 = vmatprep.subr.bf16.mxu1 %v703_v27  ;;  %v246_v27 = vld [vmem:[#allocation2 + $0x650] sm:$0xff] }
 0x30d   :  { %v736_v28 = vunpack.c.l.s8.bf16 %v246_v27  ;;  %v738_v30 = vunpack.c.h.s8.bf16 %v246_v27 }
 0x30f   :  { %1644 = vmatpush1.bf16.msra.mxu0 %v702_v38  ;;  %2649 = vmatpush1.bf16.msra.mxu1 %v702_v38  ;;  %v739_v38 = vunpack.c.h.s8.bf16 %v247_v29 }
 0x310   :  { %1645 = vmatprep.subr.bf16.mxu0 %v705_v33  ;;  %2650 = vmatprep.subr.bf16.mxu1 %v705_v33  ;;  %v249_v33 = vld [vmem:[#allocation2 + $0x668] sm:$0xff] }
 0x313   :  { %1646 = vmatpush1.bf16.msra.mxu0 %v704_v31  ;;  %2651 = vmatpush1.bf16.msra.mxu1 %v704_v31  ;;  %v741_v31 = vunpack.c.l.s8.bf16 %v249_v33 }
 0x314   :  { %1647 = vmatprep.subr.bf16.mxu0 %v707_v34  ;;  %2652 = vmatprep.subr.bf16.mxu1 %v707_v34  ;;  %v248_v34 = vld [vmem:[#allocation2 + $0x660] sm:$0xff] }
 0x315   :  { %v740_v35 = vunpack.c.l.s8.bf16 %v248_v34  ;;  %v742_v40 = vunpack.c.h.s8.bf16 %v248_v34  ;;  %v2070_v34 = vcombine.high %v3571_v42, %v3571_v42  ;;  %v268_v42 = vld [vmem:[#allocation2 + $0x700] sm:$0xff] }
 0x317   :  { %1648 = vmatpush1.bf16.msra.mxu0 %v706_v36  ;;  %2653 = vmatpush1.bf16.msra.mxu1 %v706_v36  ;;  %v743_v36 = vunpack.c.h.s8.bf16 %v249_v33 }
 0x318   :  { %1649 = vmatprep.subr.bf16.mxu0 %v709_v39  ;;  %2654 = vmatprep.subr.bf16.mxu1 %v709_v39  ;;  %v251_v39 = vld [vmem:[#allocation2 + $0x678] sm:$0xff] }
 0x31b   :  { %1650 = vmatpush1.bf16.msra.mxu0 %v708_v45  ;;  %2655 = vmatpush1.bf16.msra.mxu1 %v708_v45  ;;  %v745_v45 = vunpack.c.l.s8.bf16 %v251_v39 }
 0x31c   :  { %1651 = vmatprep.subr.bf16.mxu0 %v711_v46  ;;  %2656 = vmatprep.subr.bf16.mxu1 %v711_v46  ;;  %v250_v46 = vld [vmem:[#allocation2 + $0x670] sm:$0xff] }
 0x31d   :  { %v744_v47 = vunpack.c.l.s8.bf16 %v250_v46  ;;  %v746_v48 = vunpack.c.h.s8.bf16 %v250_v46 }
 0x31f   :  { %1652 = vmatpush1.bf16.msra.mxu0 %v710_v41  ;;  %2657 = vmatpush1.bf16.msra.mxu1 %v710_v41  ;;  %v747_v41 = vunpack.c.h.s8.bf16 %v251_v39  ;;  %v269_v39 = vld [vmem:[#allocation2 + $0x708] sm:$0xff] }
 0x320   :  { %1653 = vmatprep.subr.bf16.mxu0 %v713_v44  ;;  %2658 = vmatprep.subr.bf16.mxu1 %v713_v44  ;;  %v253_v44 = vld [vmem:[#allocation2 + $0x688] sm:$0xff] }
 0x321   :  { %v751_v53 = vunpack.c.h.s8.bf16 %v253_v44 }
 0x323   :  { %1654 = vmatpush1.bf16.msra.mxu0 %v712_v43  ;;  %2659 = vmatpush1.bf16.msra.mxu1 %v712_v43  ;;  %v749_v43 = vunpack.c.l.s8.bf16 %v253_v44  ;;  %v1110_v44 = vcombine.high %v3599_v51, %v3599_v51 }
 0x324   :  { %1655 = vmatprep.subr.bf16.mxu0 %v715_v50  ;;  %2660 = vmatprep.subr.bf16.mxu1 %v715_v50  ;;  %v252_v50 = vld [vmem:[#allocation2 + $0x680] sm:$0xff] }
 0x325   :  { %v750_v52 = vunpack.c.h.s8.bf16 %v252_v50 }
 0x327   :  { %1656 = vmatpush1.bf16.msra.mxu0 %v714_v58  ;;  %2661 = vmatpush1.bf16.msra.mxu1 %v714_v58  ;;  %v3603_v58 = vrot.slane %v3579_v55, %v3301_v14  ;;  %v753_v55 = vunpack.c.l.s8.bf16 %v255_v54 }
 0x328   :  { %1666 = vmatprep.subr.bf16.mxu0 %v717_v15  ;;  %2671 = vmatprep.subr.bf16.mxu1 %v717_v15  ;;  %v748_v15 = vunpack.c.l.s8.bf16 %v252_v50  ;;  %v783_v50 = vunpack.c.h.s8.bf16 %v269_v39 }
 0x32a   :  { %1658 = vmatmul.mubr.bf16.vlgmr.msra.gmra.mrb[0].mxu0 %v1062_v59  ;;  %2663 = vmatmul.mubr.bf16.vlgmr.msra.gmra.mrb[0].mxu1 %v2067_v56  ;;  %v2117_v59 = vcombine.high %v3593_v8, %v3593_v8  ;;  %v254_v56 = vld [vmem:[#allocation2 + $0x690] sm:$0xff] }
 0x32b   :  { %1667 = vmatpush1.bf16.msra.mxu0 %v716_v57  ;;  %2672 = vmatpush1.bf16.msra.mxu1 %v716_v57  ;;  %v752_v57 = vunpack.c.l.s8.bf16 %v254_v56 }
 0x32c   :  { %1668 = vmatprep.subr.bf16.mxu0 %v719_v60  ;;  %2673 = vmatprep.subr.bf16.mxu1 %v719_v60  ;;  %v755_v60 = vunpack.c.h.s8.bf16 %v255_v54 }
 0x32d   :  { %1698 = vmatprep.mubr.bf16.mxu0 %v3590_v4  ;;  %2703 = vmatprep.mubr.bf16.mxu1 %v3593_v8  ;;  %v754_v4 = vunpack.c.h.s8.bf16 %v254_v56  ;;  %v757_v8 = vunpack.c.l.s8.bf16 %v257_v63 }
 0x32f   :  { %1669 = vmatpush1.bf16.msra.mxu0 %v718_v61  ;;  %2674 = vmatpush1.bf16.msra.mxu1 %v718_v61  ;;  %v256_v61 = vld [vmem:[#allocation2 + $0x6a0] sm:$0xff] }
 0x330   :  { %1670 = vmatprep.subr.bf16.mxu0 %v721_v62  ;;  %2675 = vmatprep.subr.bf16.mxu1 %v721_v62  ;;  %v756_v62 = vunpack.c.l.s8.bf16 %v256_v61 }
 0x333   :  { %1671 = vmatpush1.bf16.msra.mxu0 %v720_v6  ;;  %2676 = vmatpush1.bf16.msra.mxu1 %v720_v6  ;;  %v259_v6 = vld [vmem:[#allocation2 + $0x6b8] sm:$0xff] }
 0x334   :  { %1672 = vmatprep.subr.bf16.mxu0 %v723_v0  ;;  %2677 = vmatprep.subr.bf16.mxu1 %v723_v0  ;;  %v758_v0 = vunpack.c.h.s8.bf16 %v256_v61  ;;  %v761_v3 = vunpack.c.l.s8.bf16 %v259_v6  ;;  %v763_v7 = vunpack.c.h.s8.bf16 %v259_v6 }
 0x337   :  { %1673 = vmatpush1.bf16.msra.mxu0 %v722_v1  ;;  %2678 = vmatpush1.bf16.msra.mxu1 %v722_v1  ;;  %v258_v1 = vld [vmem:[#allocation2 + $0x6b0] sm:$0xff] }
 0x338   :  { %1674 = vmatprep.subr.bf16.mxu0 %v725_v2  ;;  %2679 = vmatprep.subr.bf16.mxu1 %v725_v2  ;;  %v760_v2 = vunpack.c.l.s8.bf16 %v258_v1 }
 0x33b   :  { %1675 = vmatpush1.bf16.msra.mxu0 %v724_v10  ;;  %2680 = vmatpush1.bf16.msra.mxu1 %v724_v10  ;;  %v261_v10 = vld [vmem:[#allocation2 + $0x6c8] sm:$0xff] }
 0x33c   :  { %1676 = vmatprep.subr.bf16.mxu0 %v727_v11  ;;  %2681 = vmatprep.subr.bf16.mxu1 %v727_v11  ;;  %v762_v11 = vunpack.c.h.s8.bf16 %v258_v1  ;;  %v765_v19 = vunpack.c.l.s8.bf16 %v261_v10  ;;  %v767_v12 = vunpack.c.h.s8.bf16 %v261_v10 }
 0x33f   :  { %1677 = vmatpush1.bf16.msra.mxu0 %v726_v20  ;;  %2682 = vmatpush1.bf16.msra.mxu1 %v726_v20  ;;  %v260_v20 = vld [vmem:[#allocation2 + $0x6c0] sm:$0xff] }
 0x340   :  { %1678 = vmatprep.subr.bf16.mxu0 %v729_v21  ;;  %2683 = vmatprep.subr.bf16.mxu1 %v729_v21  ;;  %v764_v21 = vunpack.c.l.s8.bf16 %v260_v20 }
 0x343   :  { %1679 = vmatpush1.bf16.msra.mxu0 %v728_v18  ;;  %2684 = vmatpush1.bf16.msra.mxu1 %v728_v18  ;;  %v263_v18 = vld [vmem:[#allocation2 + $0x6d8] sm:$0xff] }
 0x344   :  { %1680 = vmatprep.subr.bf16.mxu0 %v731_v22  ;;  %2685 = vmatprep.subr.bf16.mxu1 %v731_v22  ;;  %v766_v22 = vunpack.c.h.s8.bf16 %v260_v20  ;;  %v769_v23 = vunpack.c.l.s8.bf16 %v263_v18  ;;  %v771_v24 = vunpack.c.h.s8.bf16 %v263_v18 }
 0x347   :  { %1681 = vmatpush1.bf16.msra.mxu0 %v730_v13  ;;  %2686 = vmatpush1.bf16.msra.mxu1 %v730_v13  ;;  %v262_v13 = vld [vmem:[#allocation2 + $0x6d0] sm:$0xff] }
 0x348   :  { %1682 = vmatprep.subr.bf16.mxu0 %v733_v17  ;;  %2687 = vmatprep.subr.bf16.mxu1 %v733_v17  ;;  %v768_v17 = vunpack.c.l.s8.bf16 %v262_v13 }
 0x34b   :  { %1683 = vmatpush1.bf16.msra.mxu0 %v732_v25  ;;  %2688 = vmatpush1.bf16.msra.mxu1 %v732_v25  ;;  %v265_v25 = vld [vmem:[#allocation2 + $0x6e8] sm:$0xff] }
 0x34c   :  { %1684 = vmatprep.subr.bf16.mxu0 %v735_v26  ;;  %2689 = vmatprep.subr.bf16.mxu1 %v735_v26  ;;  %v770_v26 = vunpack.c.h.s8.bf16 %v262_v13  ;;  %v773_v29 = vunpack.c.l.s8.bf16 %v265_v25  ;;  %v775_v27 = vunpack.c.h.s8.bf16 %v265_v25 }
 0x34f   :  { %1685 = vmatpush1.bf16.msra.mxu0 %v734_v32  ;;  %2690 = vmatpush1.bf16.msra.mxu1 %v734_v32  ;;  %v264_v32 = vld [vmem:[#allocation2 + $0x6e0] sm:$0xff] }
 0x350   :  { %1686 = vmatprep.subr.bf16.mxu0 %v737_v37  ;;  %2691 = vmatprep.subr.bf16.mxu1 %v737_v37  ;;  %v772_v37 = vunpack.c.l.s8.bf16 %v264_v32 }
 0x353   :  { %1687 = vmatpush1.bf16.msra.mxu0 %v736_v28  ;;  %2692 = vmatpush1.bf16.msra.mxu1 %v736_v28  ;;  %v267_v28 = vld [vmem:[#allocation2 + $0x6f8] sm:$0xff] }
 0x354   :  { %1688 = vmatprep.subr.bf16.mxu0 %v739_v38  ;;  %2693 = vmatprep.subr.bf16.mxu1 %v739_v38  ;;  %v774_v38 = vunpack.c.h.s8.bf16 %v264_v32  ;;  %v777_v33 = vunpack.c.l.s8.bf16 %v267_v28 }
 0x357   :  { %1689 = vmatpush1.bf16.msra.mxu0 %v738_v30  ;;  %2694 = vmatpush1.bf16.msra.mxu1 %v738_v30  ;;  %v266_v30 = vld [vmem:[#allocation2 + $0x6f0] sm:$0xff] }
 0x358   :  { %1690 = vmatprep.subr.bf16.mxu0 %v741_v31  ;;  %2695 = vmatprep.subr.bf16.mxu1 %v741_v31  ;;  %v1065_v31 = vcombine.high %v3566_v49, %v3566_v49  ;;  %v778_v46 = vunpack.c.h.s8.bf16 %v266_v30  ;;  %v781_v49 = vunpack.c.l.s8.bf16 %v269_v39 }
 0x35b   :  { %1691 = vmatpush1.bf16.msra.mxu0 %v740_v35  ;;  %2696 = vmatpush1.bf16.msra.mxu1 %v740_v35  ;;  %v776_v35 = vunpack.c.l.s8.bf16 %v266_v30 }
 0x35c   :  { %1692 = vmatprep.subr.bf16.mxu0 %v743_v36  ;;  %2697 = vmatprep.subr.bf16.mxu1 %v743_v36  ;;  %v779_v36 = vunpack.c.h.s8.bf16 %v267_v28 }
 0x35f   :  { %1693 = vmatpush1.bf16.msra.mxu0 %v742_v40  ;;  %2698 = vmatpush1.bf16.msra.mxu1 %v742_v40  ;;  %v3616_v40 = vrot.slane %v1065_v31, %v3301_v14 }
 0x360   :  { %1694 = vmatprep.subr.bf16.mxu0 %v745_v45  ;;  %2699 = vmatprep.subr.bf16.mxu1 %v745_v45  ;;  %v3619_v45 = vrot.slane %v2070_v34, %v3301_v14  ;;  %v284_v34 = vld [vmem:[#allocation2 + $0x780] sm:$0xff] }
 0x361   :  { %v812_v39 = vunpack.c.l.s8.bf16 %v284_v34 }
 0x363   :  { %1695 = vmatpush1.bf16.msra.mxu0 %v744_v47  ;;  %2700 = vmatpush1.bf16.msra.mxu1 %v744_v47  ;;  %v1081_v47 = vcombine.high %v3616_v40, %v3616_v40 }
 0x364   :  { %1696 = vmatprep.subr.bf16.mxu0 %v747_v41  ;;  %2701 = vmatprep.subr.bf16.mxu1 %v747_v41  ;;  %v2086_v41 = vcombine.high %v3619_v45, %v3619_v45 }
 0x366   :  { %v3633_v54 = vrot.slane %v2086_v41, %v3301_v14  ;;  %v286_v41 = vld [vmem:[#allocation2 + $0x790] sm:$0xff] }
 0x367   :  { %1697 = vmatpush1.bf16.msra.mxu0 %v746_v48  ;;  %2702 = vmatpush1.bf16.msra.mxu1 %v746_v48  ;;  %v2115_v48 = vcombine.high %v3603_v58, %v3603_v58 }
 0x368   :  { %1707 = vmatprep.subr.bf16.mxu0 %v749_v43  ;;  %2712 = vmatprep.subr.bf16.mxu1 %v749_v43  ;;  %v780_v43 = vunpack.c.l.s8.bf16 %v268_v42 }
 0x36a   :  { %1699 = vmatmul.mubr.bf16.vlgmr.msra.gmra.mrb[0].mxu0 %v3599_v51  ;;  %2704 = vmatmul.mubr.bf16.vlgmr.msra.gmra.mrb[0].mxu1 %v3603_v58  ;;  %v782_v51 = vunpack.c.h.s8.bf16 %v268_v42 }
 0x36b   :  { %1708 = vmatpush1.bf16.msra.mxu0 %v748_v15  ;;  %2713 = vmatpush1.bf16.msra.mxu1 %v748_v15  ;;  %v271_v15 = vld [vmem:[#allocation2 + $0x718] sm:$0xff] }
 0x36c   :  { %1709 = vmatprep.subr.bf16.mxu0 %v751_v53  ;;  %2714 = vmatprep.subr.bf16.mxu1 %v751_v53  ;;  %v3630_v53 = vrot.slane %v1081_v47, %v3301_v14  ;;  %v785_v58 = vunpack.c.l.s8.bf16 %v271_v15  ;;  %v2118_v47 = vcombine.high %v3633_v54, %v3633_v54 }
 0x36d   :  { %1739 = vmatprep.mubr.bf16.mxu0 %v1112_v16  ;;  %2744 = vmatprep.mubr.bf16.mxu1 %v2117_v59  ;;  %v270_v16 = vld [vmem:[#allocation2 + $0x710] sm:$0xff] }
 0x36e   :  { %v784_v59 = vunpack.c.l.s8.bf16 %v270_v16  ;;  %v786_v56 = vunpack.c.h.s8.bf16 %v270_v16  ;;  %v1113_v42 = vcombine.high %v3630_v53, %v3630_v53 }
 0x36f   :  { %1710 = vmatpush1.bf16.msra.mxu0 %v750_v52  ;;  %2715 = vmatpush1.bf16.msra.mxu1 %v750_v52  ;;  %v787_v52 = vunpack.c.h.s8.bf16 %v271_v15 }
 0x370   :  { %1711 = vmatprep.subr.bf16.mxu0 %v753_v55  ;;  %2716 = vmatprep.subr.bf16.mxu1 %v753_v55  ;;  %v273_v55 = vld [vmem:[#allocation2 + $0x728] sm:$0xff] }
 0x373   :  { %1712 = vmatpush1.bf16.msra.mxu0 %v752_v57  ;;  %2717 = vmatpush1.bf16.msra.mxu1 %v752_v57  ;;  %v789_v57 = vunpack.c.l.s8.bf16 %v273_v55 }
 0x374   :  { %1713 = vmatprep.subr.bf16.mxu0 %v755_v60  ;;  %2718 = vmatprep.subr.bf16.mxu1 %v755_v60  ;;  %v272_v60 = vld [vmem:[#allocation2 + $0x720] sm:$0xff] }
 0x375   :  { %v788_v63 = vunpack.c.l.s8.bf16 %v272_v60  ;;  %v790_v61 = vunpack.c.h.s8.bf16 %v272_v60 }
 0x377   :  { %1714 = vmatpush1.bf16.msra.mxu0 %v754_v4  ;;  %2719 = vmatpush1.bf16.msra.mxu1 %v754_v4  ;;  %v791_v4 = vunpack.c.h.s8.bf16 %v273_v55 }
 0x378   :  { %1715 = vmatprep.subr.bf16.mxu0 %v757_v8  ;;  %2720 = vmatprep.subr.bf16.mxu1 %v757_v8  ;;  %v275_v8 = vld [vmem:[#allocation2 + $0x738] sm:$0xff] }
 0x37b   :  { %1716 = vmatpush1.bf16.msra.mxu0 %v756_v62  ;;  %2721 = vmatpush1.bf16.msra.mxu1 %v756_v62  ;;  %v793_v62 = vunpack.c.l.s8.bf16 %v275_v8 }
 0x37c   :  { %1717 = vmatprep.subr.bf16.mxu0 %v759_v9  ;;  %2722 = vmatprep.subr.bf16.mxu1 %v759_v9  ;;  %v274_v9 = vld [vmem:[#allocation2 + $0x730] sm:$0xff] }
 0x37d   :  { %v792_v6 = vunpack.c.l.s8.bf16 %v274_v9  ;;  %v794_v1 = vunpack.c.h.s8.bf16 %v274_v9 }
 0x37f   :  { %1718 = vmatpush1.bf16.msra.mxu0 %v758_v0  ;;  %2723 = vmatpush1.bf16.msra.mxu1 %v758_v0  ;;  %v795_v0 = vunpack.c.h.s8.bf16 %v275_v8 }
 0x380   :  { %1719 = vmatprep.subr.bf16.mxu0 %v761_v3  ;;  %2724 = vmatprep.subr.bf16.mxu1 %v761_v3  ;;  %v277_v3 = vld [vmem:[#allocation2 + $0x748] sm:$0xff] }
 0x383   :  { %1720 = vmatpush1.bf16.msra.mxu0 %v760_v2  ;;  %2725 = vmatpush1.bf16.msra.mxu1 %v760_v2  ;;  %v797_v2 = vunpack.c.l.s8.bf16 %v277_v3 }
 0x384   :  { %1721 = vmatprep.subr.bf16.mxu0 %v763_v7  ;;  %2726 = vmatprep.subr.bf16.mxu1 %v763_v7  ;;  %v276_v7 = vld [vmem:[#allocation2 + $0x740] sm:$0xff] }
 0x385   :  { %v796_v10 = vunpack.c.l.s8.bf16 %v276_v7  ;;  %v798_v20 = vunpack.c.h.s8.bf16 %v276_v7 }
 0x387   :  { %1722 = vmatpush1.bf16.msra.mxu0 %v762_v11  ;;  %2727 = vmatpush1.bf16.msra.mxu1 %v762_v11  ;;  %v799_v11 = vunpack.c.h.s8.bf16 %v277_v3 }
 0x388   :  { %1723 = vmatprep.subr.bf16.mxu0 %v765_v19  ;;  %2728 = vmatprep.subr.bf16.mxu1 %v765_v19  ;;  %v279_v19 = vld [vmem:[#allocation2 + $0x758] sm:$0xff] }
 0x38b   :  { %1724 = vmatpush1.bf16.msra.mxu0 %v764_v21  ;;  %2729 = vmatpush1.bf16.msra.mxu1 %v764_v21  ;;  %v801_v21 = vunpack.c.l.s8.bf16 %v279_v19 }
 0x38c   :  { %1725 = vmatprep.subr.bf16.mxu0 %v767_v12  ;;  %2730 = vmatprep.subr.bf16.mxu1 %v767_v12  ;;  %v278_v12 = vld [vmem:[#allocation2 + $0x750] sm:$0xff] }
 0x38d   :  { %v800_v18 = vunpack.c.l.s8.bf16 %v278_v12  ;;  %v802_v13 = vunpack.c.h.s8.bf16 %v278_v12 }
 0x38f   :  { %1726 = vmatpush1.bf16.msra.mxu0 %v766_v22  ;;  %2731 = vmatpush1.bf16.msra.mxu1 %v766_v22  ;;  %v803_v22 = vunpack.c.h.s8.bf16 %v279_v19 }
 0x390   :  { %1727 = vmatprep.subr.bf16.mxu0 %v769_v23  ;;  %2732 = vmatprep.subr.bf16.mxu1 %v769_v23  ;;  %v281_v23 = vld [vmem:[#allocation2 + $0x768] sm:$0xff] }
 0x393   :  { %1728 = vmatpush1.bf16.msra.mxu0 %v768_v17  ;;  %2733 = vmatpush1.bf16.msra.mxu1 %v768_v17  ;;  %v805_v17 = vunpack.c.l.s8.bf16 %v281_v23 }
 0x394   :  { %1729 = vmatprep.subr.bf16.mxu0 %v771_v24  ;;  %2734 = vmatprep.subr.bf16.mxu1 %v771_v24  ;;  %v280_v24 = vld [vmem:[#allocation2 + $0x760] sm:$0xff] }
 0x395   :  { %v804_v25 = vunpack.c.l.s8.bf16 %v280_v24  ;;  %v806_v32 = vunpack.c.h.s8.bf16 %v280_v24  ;;  %v3654_v24 = vld.sshfl [vmem:[%s3721_s0 + $0x20] sm:$0x33 pattern:$0x75316420] }
 0x397   :  { %1730 = vmatpush1.bf16.msra.mxu0 %v770_v26  ;;  %2735 = vmatpush1.bf16.msra.mxu1 %v770_v26  ;;  %v807_v26 = vunpack.c.h.s8.bf16 %v281_v23 }
 0x398   :  { %1731 = vmatprep.subr.bf16.mxu0 %v773_v29  ;;  %2736 = vmatprep.subr.bf16.mxu1 %v773_v29  ;;  %v283_v29 = vld [vmem:[#allocation2 + $0x778] sm:$0xff] }
 0x39b   :  { %1732 = vmatpush1.bf16.msra.mxu0 %v772_v37  ;;  %2737 = vmatpush1.bf16.msra.mxu1 %v772_v37  ;;  %v809_v37 = vunpack.c.l.s8.bf16 %v283_v29 }
 0x39c   :  { %1733 = vmatprep.subr.bf16.mxu0 %v775_v27  ;;  %2738 = vmatprep.subr.bf16.mxu1 %v775_v27  ;;  %v282_v27 = vld [vmem:[#allocation2 + $0x770] sm:$0xff] }
 0x39d   :  { %v808_v28 = vunpack.c.l.s8.bf16 %v282_v27  ;;  %v810_v30 = vunpack.c.h.s8.bf16 %v282_v27 }
 0x39f   :  { %1734 = vmatpush1.bf16.msra.mxu0 %v774_v38  ;;  %2739 = vmatpush1.bf16.msra.mxu1 %v774_v38  ;;  %v811_v38 = vunpack.c.h.s8.bf16 %v283_v29 }
 0x3a0   :  { %1735 = vmatprep.subr.bf16.mxu0 %v777_v33  ;;  %2740 = vmatprep.subr.bf16.mxu1 %v777_v33  ;;  %v285_v33 = vld [vmem:[#allocation2 + $0x788] sm:$0xff] }
 0x3a1   :  { %v813_v31 = vunpack.c.l.s8.bf16 %v285_v33 }
 0x3a3   :  { %1736 = vmatpush1.bf16.msra.mxu0 %v776_v35  ;;  %2741 = vmatpush1.bf16.msra.mxu1 %v776_v35  ;;  %v3639_v35 = vrot.slane %v3616_v40, %v3301_v14  ;;  %v814_v40 = vunpack.c.h.s8.bf16 %v284_v34 }
 0x3a4   :  { %1737 = vmatprep.subr.bf16.mxu0 %v779_v36  ;;  %2742 = vmatprep.subr.bf16.mxu1 %v779_v36  ;;  %v3643_v36 = vrot.slane %v3619_v45, %v3301_v14 }
 0x3a7   :  { %1738 = vmatpush1.bf16.msra.mxu0 %v778_v46  ;;  %2743 = vmatpush1.bf16.msra.mxu1 %v778_v46  ;;  %v815_v46 = vunpack.c.h.s8.bf16 %v285_v33 }
 0x3a8   :  { %1748 = vmatprep.subr.bf16.mxu0 %v781_v49  ;;  %2753 = vmatprep.subr.bf16.mxu1 %v781_v49  ;;  %v287_v49 = vld [vmem:[#allocation2 + $0x798] sm:$0xff] }
 0x3a9   :  { %v817_v45 = vunpack.c.l.s8.bf16 %v287_v49 }
 0x3aa   :  { %1740 = vmatmul.mubr.bf16.vlgmr.msra.gmra.mrb[0].mxu0 %v1110_v44  ;;  %2745 = vmatmul.mubr.bf16.vlgmr.msra.gmra.mrb[0].mxu1 %v2115_v48  ;;  %v816_v44 = vunpack.c.l.s8.bf16 %v286_v41  ;;  %v819_v48 = vunpack.c.h.s8.bf16 %v287_v49 }
 0x3ab   :  { %1749 = vmatpush1.bf16.msra.mxu0 %v780_v43  ;;  %2754 = vmatpush1.bf16.msra.mxu1 %v780_v43  ;;  %v289_v43 = vld [vmem:[#allocation2 + $0x7a8] sm:$0xff] }
 0x3ac   :  { %1750 = vmatprep.subr.bf16.mxu0 %v783_v50  ;;  %2755 = vmatprep.subr.bf16.mxu1 %v783_v50  ;;  %v818_v50 = vunpack.c.h.s8.bf16 %v286_v41  ;;  %v821_v15 = vunpack.c.l.s8.bf16 %v289_v43  ;;  %v304_v41 = vld [vmem:[#allocation2 + $0x820] sm:$0xff] }
 0x3ad   :  { %1780 = vmatprep.mubr.bf16.mxu0 %v3630_v53  ;;  %2785 = vmatprep.mubr.bf16.mxu1 %v3633_v54  ;;  %v288_v53 = vld [vmem:[#allocation2 + $0x7a0] sm:$0xff] }
 0x3ae   :  { %v820_v54 = vunpack.c.l.s8.bf16 %v288_v53  ;;  %v822_v16 = vunpack.c.h.s8.bf16 %v288_v53  ;;  %v306_v53 = vld [vmem:[#allocation2 + $0x830] sm:$0xff] }
 0x3af   :  { %1751 = vmatpush1.bf16.msra.mxu0 %v782_v51  ;;  %2756 = vmatpush1.bf16.msra.mxu1 %v782_v51  ;;  %v823_v51 = vunpack.c.h.s8.bf16 %v289_v43  ;;  %v307_v43 = vld [vmem:[#allocation2 + $0x838] sm:$0xff] }
 0x3b0   :  { %1752 = vmatprep.subr.bf16.mxu0 %v785_v58  ;;  %2757 = vmatprep.subr.bf16.mxu1 %v785_v58  ;;  %v291_v58 = vld [vmem:[#allocation2 + $0x7b8] sm:$0xff] }
 0x3b3   :  { %1753 = vmatpush1.bf16.msra.mxu0 %v784_v59  ;;  %2758 = vmatpush1.bf16.msra.mxu1 %v784_v59  ;;  %v825_v59 = vunpack.c.l.s8.bf16 %v291_v58 }
 0x3b4   :  { %1754 = vmatprep.subr.bf16.mxu0 %v787_v52  ;;  %2759 = vmatprep.subr.bf16.mxu1 %v787_v52  ;;  %v290_v52 = vld [vmem:[#allocation2 + $0x7b0] sm:$0xff] }
 0x3b5   :  { %v824_v55 = vunpack.c.l.s8.bf16 %v290_v52  ;;  %v826_v60 = vunpack.c.h.s8.bf16 %v290_v52  ;;  %v308_v52 = vld [vmem:[#allocation2 + $0x840] sm:$0xff] }
 0x3b7   :  { %1755 = vmatpush1.bf16.msra.mxu0 %v786_v56  ;;  %2760 = vmatpush1.bf16.msra.mxu1 %v786_v56  ;;  %v827_v56 = vunpack.c.h.s8.bf16 %v291_v58  ;;  %v309_v58 = vld [vmem:[#allocation2 + $0x848] sm:$0xff] }
 0x3b8   :  { %1756 = vmatprep.subr.bf16.mxu0 %v789_v57  ;;  %2761 = vmatprep.subr.bf16.mxu1 %v789_v57  ;;  %v293_v57 = vld [vmem:[#allocation2 + $0x7c8] sm:$0xff] }
 0x3bb   :  { %1757 = vmatpush1.bf16.msra.mxu0 %v788_v63  ;;  %2762 = vmatpush1.bf16.msra.mxu1 %v788_v63  ;;  %v829_v63 = vunpack.c.l.s8.bf16 %v293_v57 }
 0x3bc   :  { %1758 = vmatprep.subr.bf16.mxu0 %v791_v4  ;;  %2763 = vmatprep.subr.bf16.mxu1 %v791_v4  ;;  %v292_v4 = vld [vmem:[#allocation2 + $0x7c0] sm:$0xff] }
 0x3bd   :  { %v828_v8 = vunpack.c.l.s8.bf16 %v292_v4  ;;  %v830_v9 = vunpack.c.h.s8.bf16 %v292_v4  ;;  %v310_v4 = vld [vmem:[#allocation2 + $0x850] sm:$0xff] }
 0x3bf   :  { %1759 = vmatpush1.bf16.msra.mxu0 %v790_v61  ;;  %2764 = vmatpush1.bf16.msra.mxu1 %v790_v61  ;;  %v831_v61 = vunpack.c.h.s8.bf16 %v293_v57  ;;  %v311_v57 = vld [vmem:[#allocation2 + $0x858] sm:$0xff] }
 0x3c0   :  { %1760 = vmatprep.subr.bf16.mxu0 %v793_v62  ;;  %2765 = vmatprep.subr.bf16.mxu1 %v793_v62  ;;  %v295_v62 = vld [vmem:[#allocation2 + $0x7d8] sm:$0xff] }
 0x3c3   :  { %1761 = vmatpush1.bf16.msra.mxu0 %v792_v6  ;;  %2766 = vmatpush1.bf16.msra.mxu1 %v792_v6  ;;  %v833_v6 = vunpack.c.l.s8.bf16 %v295_v62 }
 0x3c4   :  { %1762 = vmatprep.subr.bf16.mxu0 %v795_v0  ;;  %2767 = vmatprep.subr.bf16.mxu1 %v795_v0  ;;  %v294_v0 = vld [vmem:[#allocation2 + $0x7d0] sm:$0xff] }
 0x3c5   :  { %v832_v3 = vunpack.c.l.s8.bf16 %v294_v0  ;;  %v834_v7 = vunpack.c.h.s8.bf16 %v294_v0  ;;  %v312_v0 = vld [vmem:[#allocation2 + $0x860] sm:$0xff] }
 0x3c7   :  { %1763 = vmatpush1.bf16.msra.mxu0 %v794_v1  ;;  %2768 = vmatpush1.bf16.msra.mxu1 %v794_v1  ;;  %v835_v1 = vunpack.c.h.s8.bf16 %v295_v62  ;;  %v313_v62 = vld [vmem:[#allocation2 + $0x868] sm:$0xff] }
 0x3c8   :  { %1764 = vmatprep.subr.bf16.mxu0 %v797_v2  ;;  %2769 = vmatprep.subr.bf16.mxu1 %v797_v2  ;;  %v297_v2 = vld [vmem:[#allocation2 + $0x7e8] sm:$0xff] }
 0x3cb   :  { %1765 = vmatpush1.bf16.msra.mxu0 %v796_v10  ;;  %2770 = vmatpush1.bf16.msra.mxu1 %v796_v10  ;;  %v837_v10 = vunpack.c.l.s8.bf16 %v297_v2 }
 0x3cc   :  { %1766 = vmatprep.subr.bf16.mxu0 %v799_v11  ;;  %2771 = vmatprep.subr.bf16.mxu1 %v799_v11  ;;  %v296_v11 = vld [vmem:[#allocation2 + $0x7e0] sm:$0xff] }
 0x3cd   :  { %v836_v19 = vunpack.c.l.s8.bf16 %v296_v11  ;;  %v838_v12 = vunpack.c.h.s8.bf16 %v296_v11  ;;  %v314_v11 = vld [vmem:[#allocation2 + $0x870] sm:$0xff] }
 0x3cf   :  { %1767 = vmatpush1.bf16.msra.mxu0 %v798_v20  ;;  %2772 = vmatpush1.bf16.msra.mxu1 %v798_v20  ;;  %v839_v20 = vunpack.c.h.s8.bf16 %v297_v2  ;;  %v315_v2 = vld [vmem:[#allocation2 + $0x878] sm:$0xff] }
 0x3d0   :  { %1768 = vmatprep.subr.bf16.mxu0 %v801_v21  ;;  %2773 = vmatprep.subr.bf16.mxu1 %v801_v21  ;;  %v299_v21 = vld [vmem:[#allocation2 + $0x7f8] sm:$0xff] }
 0x3d3   :  { %1769 = vmatpush1.bf16.msra.mxu0 %v800_v18  ;;  %2774 = vmatpush1.bf16.msra.mxu1 %v800_v18  ;;  %v841_v18 = vunpack.c.l.s8.bf16 %v299_v21 }
 0x3d4   :  { %1770 = vmatprep.subr.bf16.mxu0 %v803_v22  ;;  %2775 = vmatprep.subr.bf16.mxu1 %v803_v22  ;;  %v298_v22 = vld [vmem:[#allocation2 + $0x7f0] sm:$0xff] }
 0x3d5   :  { %v840_v23 = vunpack.c.l.s8.bf16 %v298_v22 }
 0x3d7   :  { %1771 = vmatpush1.bf16.msra.mxu0 %v802_v13  ;;  %2776 = vmatpush1.bf16.msra.mxu1 %v802_v13  ;;  %v843_v13 = vunpack.c.h.s8.bf16 %v299_v21  ;;  %v317_v21 = vld [vmem:[#allocation2 + $0x888] sm:$0xff] }
 0x3d8   :  { %1772 = vmatprep.subr.bf16.mxu0 %v805_v17  ;;  %2777 = vmatprep.subr.bf16.mxu1 %v805_v17  ;;  %v301_v17 = vld [vmem:[#allocation2 + $0x808] sm:$0xff] }
 0x3d9   :  { %v845_v29 = vunpack.c.l.s8.bf16 %v301_v17 }
 0x3db   :  { %1773 = vmatpush1.bf16.msra.mxu0 %v804_v25  ;;  %2778 = vmatpush1.bf16.msra.mxu1 %v804_v25  ;;  %v3659_v25 = vld.sshfl [vmem:[%s3721_s0 + $0x44] sm:$0x33 pattern:$0x75316420] }
 0x3dc   :  { %1774 = vmatprep.subr.bf16.mxu0 %v807_v26  ;;  %2779 = vmatprep.subr.bf16.mxu1 %v807_v26  ;;  %v842_v26 = vunpack.c.h.s8.bf16 %v298_v22  ;;  %v2126_v27 = vcombine.high %v3659_v25, %v3659_v25  ;;  %v316_v22 = vld [vmem:[#allocation2 + $0x880] sm:$0xff] }
 0x3df   :  { %1775 = vmatpush1.bf16.msra.mxu0 %v806_v32  ;;  %2780 = vmatpush1.bf16.msra.mxu1 %v806_v32  ;;  %v300_v32 = vld [vmem:[#allocation2 + $0x800] sm:$0xff] }
 0x3e0   :  { %1776 = vmatprep.subr.bf16.mxu0 %v809_v37  ;;  %2781 = vmatprep.subr.bf16.mxu1 %v809_v37  ;;  %v1121_v37 = vcombine.high %v3654_v24, %v3654_v24  ;;  %v844_v33 = vunpack.c.l.s8.bf16 %v300_v32 }
 0x3e2   :  { %v3670_v34 = vrot.slane %v1121_v37, %v3301_v14 }
 0x3e3   :  { %1777 = vmatpush1.bf16.msra.mxu0 %v808_v28  ;;  %2782 = vmatpush1.bf16.msra.mxu1 %v808_v28  ;;  %v1111_v28 = vcombine.high %v3639_v35, %v3639_v35 }
 0x3e4   :  { %1778 = vmatprep.subr.bf16.mxu0 %v811_v38  ;;  %2783 = vmatprep.subr.bf16.mxu1 %v811_v38  ;;  %v2116_v38 = vcombine.high %v3643_v36, %v3643_v36 }
 0x3e7   :  { %1779 = vmatpush1.bf16.msra.mxu0 %v810_v30  ;;  %2784 = vmatpush1.bf16.msra.mxu1 %v810_v30  ;;  %v847_v30 = vunpack.c.h.s8.bf16 %v301_v17  ;;  %v876_v17 = vunpack.c.l.s8.bf16 %v316_v22 }
 0x3e8   :  { %1789 = vmatprep.subr.bf16.mxu0 %v813_v31  ;;  %2794 = vmatprep.subr.bf16.mxu1 %v813_v31  ;;  %v303_v31 = vld [vmem:[#allocation2 + $0x818] sm:$0xff] }
 0x3ea   :  { %1781 = vmatmul.mubr.bf16.vlgmr.msra.gmra.mrb[0].mxu0 %v3639_v35  ;;  %2786 = vmatmul.mubr.bf16.vlgmr.msra.gmra.mrb[0].mxu1 %v3643_v36  ;;  %v846_v35 = vunpack.c.h.s8.bf16 %v300_v32  ;;  %v849_v36 = vunpack.c.l.s8.bf16 %v303_v31  ;;  %v1137_v32 = vcombine.high %v3670_v34, %v3670_v34 }
 0x3eb   :  { %1790 = vmatpush1.bf16.msra.mxu0 %v812_v39  ;;  %2795 = vmatpush1.bf16.msra.mxu1 %v812_v39  ;;  %v3673_v39 = vrot.slane %v2126_v27, %v3301_v14 }
 0x3ec   :  { %1791 = vmatprep.subr.bf16.mxu0 %v815_v46  ;;  %2796 = vmatprep.subr.bf16.mxu1 %v815_v46  ;;  %v302_v46 = vld [vmem:[#allocation2 + $0x810] sm:$0xff] }
 0x3ed   :  { %1821 = vmatprep.mubr.bf16.mxu0 %v1113_v42  ;;  %2826 = vmatprep.mubr.bf16.mxu1 %v2118_v47  ;;  %v848_v49 = vunpack.c.l.s8.bf16 %v302_v46  ;;  %v851_v42 = vunpack.c.h.s8.bf16 %v303_v31  ;;  %v305_v47 = vld [vmem:[#allocation2 + $0x828] sm:$0xff]  ;;  %v2142_v37 = vcombine.high %v3673_v39, %v3673_v39  ;;  %v320_v31 = vld [vmem:[#allocation2 + $0x8a0] sm:$0xff] }
 0x3ef   :  { %1792 = vmatpush1.bf16.msra.mxu0 %v814_v40  ;;  %2797 = vmatpush1.bf16.msra.mxu1 %v814_v40  ;;  %v850_v40 = vunpack.c.h.s8.bf16 %v302_v46 }
 0x3f0   :  { %1793 = vmatprep.subr.bf16.mxu0 %v817_v45  ;;  %2798 = vmatprep.subr.bf16.mxu1 %v817_v45  ;;  %v853_v45 = vunpack.c.l.s8.bf16 %v305_v47 }
 0x3f3   :  { %1794 = vmatpush1.bf16.msra.mxu0 %v816_v44  ;;  %2799 = vmatpush1.bf16.msra.mxu1 %v816_v44  ;;  %v852_v44 = vunpack.c.l.s8.bf16 %v304_v41 }
 0x3f4   :  { %1795 = vmatprep.subr.bf16.mxu0 %v819_v48  ;;  %2800 = vmatprep.subr.bf16.mxu1 %v819_v48  ;;  %v855_v48 = vunpack.c.h.s8.bf16 %v305_v47 }
 0x3f7   :  { %1796 = vmatpush1.bf16.msra.mxu0 %v818_v50  ;;  %2801 = vmatpush1.bf16.msra.mxu1 %v818_v50  ;;  %v854_v50 = vunpack.c.h.s8.bf16 %v304_v41 }
 0x3f8   :  { %1797 = vmatprep.subr.bf16.mxu0 %v821_v15  ;;  %2802 = vmatprep.subr.bf16.mxu1 %v821_v15  ;;  %v857_v15 = vunpack.c.l.s8.bf16 %v307_v43 }
 0x3fb   :  { %1798 = vmatpush1.bf16.msra.mxu0 %v820_v54  ;;  %2803 = vmatpush1.bf16.msra.mxu1 %v820_v54  ;;  %v856_v54 = vunpack.c.l.s8.bf16 %v306_v53 }
 0x3fc   :  { %1799 = vmatprep.subr.bf16.mxu0 %v823_v51  ;;  %2804 = vmatprep.subr.bf16.mxu1 %v823_v51  ;;  %v859_v51 = vunpack.c.h.s8.bf16 %v307_v43 }
 0x3ff   :  { %1800 = vmatpush1.bf16.msra.mxu0 %v822_v16  ;;  %2805 = vmatpush1.bf16.msra.mxu1 %v822_v16  ;;  %v858_v16 = vunpack.c.h.s8.bf16 %v306_v53 }
 0x400   :  { %1801 = vmatprep.subr.bf16.mxu0 %v825_v59  ;;  %2806 = vmatprep.subr.bf16.mxu1 %v825_v59  ;;  %v861_v59 = vunpack.c.l.s8.bf16 %v309_v58 }
 0x403   :  { %1802 = vmatpush1.bf16.msra.mxu0 %v824_v55  ;;  %2807 = vmatpush1.bf16.msra.mxu1 %v824_v55  ;;  %v860_v55 = vunpack.c.l.s8.bf16 %v308_v52 }
 0x404   :  { %1803 = vmatprep.subr.bf16.mxu0 %v827_v56  ;;  %2808 = vmatprep.subr.bf16.mxu1 %v827_v56  ;;  %v863_v56 = vunpack.c.h.s8.bf16 %v309_v58 }
 0x407   :  { %1804 = vmatpush1.bf16.msra.mxu0 %v826_v60  ;;  %2809 = vmatpush1.bf16.msra.mxu1 %v826_v60  ;;  %v862_v60 = vunpack.c.h.s8.bf16 %v308_v52 }
 0x408   :  { %1805 = vmatprep.subr.bf16.mxu0 %v829_v63  ;;  %2810 = vmatprep.subr.bf16.mxu1 %v829_v63  ;;  %v865_v63 = vunpack.c.l.s8.bf16 %v311_v57 }
 0x40b   :  { %1806 = vmatpush1.bf16.msra.mxu0 %v828_v8  ;;  %2811 = vmatpush1.bf16.msra.mxu1 %v828_v8  ;;  %v864_v8 = vunpack.c.l.s8.bf16 %v310_v4 }
 0x40c   :  { %1807 = vmatprep.subr.bf16.mxu0 %v831_v61  ;;  %2812 = vmatprep.subr.bf16.mxu1 %v831_v61  ;;  %v867_v61 = vunpack.c.h.s8.bf16 %v311_v57 }
 0x40f   :  { %1808 = vmatpush1.bf16.msra.mxu0 %v830_v9  ;;  %2813 = vmatpush1.bf16.msra.mxu1 %v830_v9  ;;  %v866_v9 = vunpack.c.h.s8.bf16 %v310_v4 }
 0x410   :  { %1809 = vmatprep.subr.bf16.mxu0 %v833_v6  ;;  %2814 = vmatprep.subr.bf16.mxu1 %v833_v6  ;;  %v869_v6 = vunpack.c.l.s8.bf16 %v313_v62 }
 0x413   :  { %1810 = vmatpush1.bf16.msra.mxu0 %v832_v3  ;;  %2815 = vmatpush1.bf16.msra.mxu1 %v832_v3  ;;  %v868_v3 = vunpack.c.l.s8.bf16 %v312_v0 }
 0x414   :  { %1811 = vmatprep.subr.bf16.mxu0 %v835_v1  ;;  %2816 = vmatprep.subr.bf16.mxu1 %v835_v1  ;;  %v871_v1 = vunpack.c.h.s8.bf16 %v313_v62 }
 0x417   :  { %1812 = vmatpush1.bf16.msra.mxu0 %v834_v7  ;;  %2817 = vmatpush1.bf16.msra.mxu1 %v834_v7  ;;  %v870_v7 = vunpack.c.h.s8.bf16 %v312_v0 }
 0x418   :  { %1813 = vmatprep.subr.bf16.mxu0 %v837_v10  ;;  %2818 = vmatprep.subr.bf16.mxu1 %v837_v10  ;;  %v873_v10 = vunpack.c.l.s8.bf16 %v315_v2 }
 0x41b   :  { %1814 = vmatpush1.bf16.msra.mxu0 %v836_v19  ;;  %2819 = vmatpush1.bf16.msra.mxu1 %v836_v19  ;;  %v872_v19 = vunpack.c.l.s8.bf16 %v314_v11 }
 0x41c   :  { %1815 = vmatprep.subr.bf16.mxu0 %v839_v20  ;;  %2820 = vmatprep.subr.bf16.mxu1 %v839_v20  ;;  %v875_v20 = vunpack.c.h.s8.bf16 %v315_v2  ;;  %v2925_v2 = vsub.s32 1, %v3298_v5 }
 0x41f   :  { %1816 = vmatpush1.bf16.msra.mxu0 %v838_v12  ;;  %2821 = vmatpush1.bf16.msra.mxu1 %v838_v12  ;;  %v874_v12 = vunpack.c.h.s8.bf16 %v314_v11 }
 0x420   :  { %1817 = vmatprep.subr.bf16.mxu0 %v841_v18  ;;  %2822 = vmatprep.subr.bf16.mxu1 %v841_v18  ;;  %v877_v18 = vunpack.c.l.s8.bf16 %v317_v21 }
 0x423   :  { %1818 = vmatpush1.bf16.msra.mxu0 %v840_v23  ;;  %2823 = vmatpush1.bf16.msra.mxu1 %v840_v23  ;;  %v3679_v23 = vrot.slane %v3654_v24, %v3301_v14 }
 0x424   :  { %1819 = vmatprep.subr.bf16.mxu0 %v843_v13  ;;  %2824 = vmatprep.subr.bf16.mxu1 %v843_v13  ;;  %v3683_v13 = vrot.slane %v3659_v25, %v3301_v14  ;;  %v878_v14 = vunpack.c.h.s8.bf16 %v316_v22  ;;  %v318_v25 = vld [vmem:[#allocation2 + $0x890] sm:$0xff] }
 0x425   :  { %v880_v27 = vunpack.c.l.s8.bf16 %v318_v25 }
 0x426   :  { %v2141_v0 = vcombine.high %v3683_v13, %v3683_v13 }
 0x427   :  { %1820 = vmatpush1.bf16.msra.mxu0 %v842_v26  ;;  %2825 = vmatpush1.bf16.msra.mxu1 %v842_v26  ;;  %v879_v26 = vunpack.c.h.s8.bf16 %v317_v21 }
 0x428   :  { %1830 = vmatprep.subr.bf16.mxu0 %v845_v29  ;;  %2835 = vmatprep.subr.bf16.mxu1 %v845_v29  ;;  %v319_v29 = vld [vmem:[#allocation2 + $0x898] sm:$0xff] }
 0x429   :  { %v881_v24 = vunpack.c.l.s8.bf16 %v319_v29 }
 0x42a   :  { %1822 = vmatmul.mubr.bf16.vlgmr.msra.gmra.mrb[0].mxu0 %v1111_v28  ;;  %2827 = vmatmul.mubr.bf16.vlgmr.msra.gmra.mrb[0].mxu1 %v2116_v38  ;;  %v883_v28 = vunpack.c.h.s8.bf16 %v319_v29  ;;  %v321_v38 = vld [vmem:[#allocation2 + $0x8a8] sm:$0xff] }
 0x42b   :  { %1831 = vmatpush1.bf16.msra.mxu0 %v844_v33  ;;  %2836 = vmatpush1.bf16.msra.mxu1 %v844_v33  ;;  %v882_v33 = vunpack.c.h.s8.bf16 %v318_v25 }
 0x42c   :  { %1832 = vmatprep.subr.bf16.mxu0 %v847_v30  ;;  %2837 = vmatprep.subr.bf16.mxu1 %v847_v30  ;;  %v885_v30 = vunpack.c.l.s8.bf16 %v321_v38 }
 0x42d   :  { %1862 = vmatprep.mubr.bf16.mxu0 %v3670_v34  ;;  %2867 = vmatprep.mubr.bf16.mxu1 %v3673_v39  ;;  %v884_v34 = vunpack.c.l.s8.bf16 %v320_v31  ;;  %v887_v39 = vunpack.c.h.s8.bf16 %v321_v38 }
 0x42f   :  { %1833 = vmatpush1.bf16.msra.mxu0 %v846_v35  ;;  %2838 = vmatpush1.bf16.msra.mxu1 %v846_v35  ;;  %v323_v35 = vld [vmem:[#allocation2 + $0x8b8] sm:$0xff] }
 0x430   :  { %1834 = vmatprep.subr.bf16.mxu0 %v849_v36  ;;  %2839 = vmatprep.subr.bf16.mxu1 %v849_v36  ;;  %v886_v36 = vunpack.c.h.s8.bf16 %v320_v31  ;;  %v889_v46 = vunpack.c.l.s8.bf16 %v323_v35  ;;  %v891_v47 = vunpack.c.h.s8.bf16 %v323_v35 }
 0x433   :  { %1835 = vmatpush1.bf16.msra.mxu0 %v848_v49  ;;  %2840 = vmatpush1.bf16.msra.mxu1 %v848_v49  ;;  %v322_v49 = vld [vmem:[#allocation2 + $0x8b0] sm:$0xff] }
 0x434   :  { %1836 = vmatprep.subr.bf16.mxu0 %v851_v42  ;;  %2841 = vmatprep.subr.bf16.mxu1 %v851_v42  ;;  %v888_v42 = vunpack.c.l.s8.bf16 %v322_v49 }
 0x437   :  { %1837 = vmatpush1.bf16.msra.mxu0 %v850_v40  ;;  %2842 = vmatpush1.bf16.msra.mxu1 %v850_v40  ;;  %v325_v40 = vld [vmem:[#allocation2 + $0x8c8] sm:$0xff] }
 0x438   :  { %1838 = vmatprep.subr.bf16.mxu0 %v853_v45  ;;  %2843 = vmatprep.subr.bf16.mxu1 %v853_v45  ;;  %v890_v45 = vunpack.c.h.s8.bf16 %v322_v49  ;;  %v893_v41 = vunpack.c.l.s8.bf16 %v325_v40  ;;  %v895_v43 = vunpack.c.h.s8.bf16 %v325_v40 }
 0x43b   :  { %1839 = vmatpush1.bf16.msra.mxu0 %v852_v44  ;;  %2844 = vmatpush1.bf16.msra.mxu1 %v852_v44  ;;  %v324_v44 = vld [vmem:[#allocation2 + $0x8c0] sm:$0xff] }
 0x43c   :  { %1840 = vmatprep.subr.bf16.mxu0 %v855_v48  ;;  %2845 = vmatprep.subr.bf16.mxu1 %v855_v48  ;;  %v892_v48 = vunpack.c.l.s8.bf16 %v324_v44 }
 0x43f   :  { %1841 = vmatpush1.bf16.msra.mxu0 %v854_v50  ;;  %2846 = vmatpush1.bf16.msra.mxu1 %v854_v50  ;;  %v327_v50 = vld [vmem:[#allocation2 + $0x8d8] sm:$0xff] }
 0x440   :  { %1842 = vmatprep.subr.bf16.mxu0 %v857_v15  ;;  %2847 = vmatprep.subr.bf16.mxu1 %v857_v15  ;;  %v894_v15 = vunpack.c.h.s8.bf16 %v324_v44  ;;  %v897_v53 = vunpack.c.l.s8.bf16 %v327_v50  ;;  %v899_v58 = vunpack.c.h.s8.bf16 %v327_v50 }
 0x443   :  { %1843 = vmatpush1.bf16.msra.mxu0 %v856_v54  ;;  %2848 = vmatpush1.bf16.msra.mxu1 %v856_v54  ;;  %v326_v54 = vld [vmem:[#allocation2 + $0x8d0] sm:$0xff] }
 0x444   :  { %1844 = vmatprep.subr.bf16.mxu0 %v859_v51  ;;  %2849 = vmatprep.subr.bf16.mxu1 %v859_v51  ;;  %v896_v51 = vunpack.c.l.s8.bf16 %v326_v54 }
 0x447   :  { %1845 = vmatpush1.bf16.msra.mxu0 %v858_v16  ;;  %2850 = vmatpush1.bf16.msra.mxu1 %v858_v16  ;;  %v329_v16 = vld [vmem:[#allocation2 + $0x8e8] sm:$0xff] }
 0x448   :  { %1846 = vmatprep.subr.bf16.mxu0 %v861_v59  ;;  %2851 = vmatprep.subr.bf16.mxu1 %v861_v59  ;;  %v898_v59 = vunpack.c.h.s8.bf16 %v326_v54  ;;  %v901_v52 = vunpack.c.l.s8.bf16 %v329_v16  ;;  %v903_v57 = vunpack.c.h.s8.bf16 %v329_v16 }
 0x44b   :  { %1847 = vmatpush1.bf16.msra.mxu0 %v860_v55  ;;  %2852 = vmatpush1.bf16.msra.mxu1 %v860_v55  ;;  %v328_v55 = vld [vmem:[#allocation2 + $0x8e0] sm:$0xff] }
 0x44c   :  { %1848 = vmatprep.subr.bf16.mxu0 %v863_v56  ;;  %2853 = vmatprep.subr.bf16.mxu1 %v863_v56  ;;  %v900_v56 = vunpack.c.l.s8.bf16 %v328_v55 }
 0x44f   :  { %1849 = vmatpush1.bf16.msra.mxu0 %v862_v60  ;;  %2854 = vmatpush1.bf16.msra.mxu1 %v862_v60  ;;  %v331_v60 = vld [vmem:[#allocation2 + $0x8f8] sm:$0xff] }
 0x450   :  { %1850 = vmatprep.subr.bf16.mxu0 %v865_v63  ;;  %2855 = vmatprep.subr.bf16.mxu1 %v865_v63  ;;  %v902_v63 = vunpack.c.h.s8.bf16 %v328_v55  ;;  %v905_v4 = vunpack.c.l.s8.bf16 %v331_v60  ;;  %v907_v62 = vunpack.c.h.s8.bf16 %v331_v60 }
 0x453   :  { %1851 = vmatpush1.bf16.msra.mxu0 %v864_v8  ;;  %2856 = vmatpush1.bf16.msra.mxu1 %v864_v8  ;;  %v330_v8 = vld [vmem:[#allocation2 + $0x8f0] sm:$0xff] }
 0x454   :  { %1852 = vmatprep.subr.bf16.mxu0 %v867_v61  ;;  %2857 = vmatprep.subr.bf16.mxu1 %v867_v61  ;;  %v904_v61 = vunpack.c.l.s8.bf16 %v330_v8 }
 0x457   :  { %1853 = vmatpush1.bf16.msra.mxu0 %v866_v9  ;;  %2858 = vmatpush1.bf16.msra.mxu1 %v866_v9  ;;  %v906_v9 = vunpack.c.h.s8.bf16 %v330_v8 }
 0x458   :  { %1854 = vmatprep.subr.bf16.mxu0 %v869_v6  ;;  %2859 = vmatprep.subr.bf16.mxu1 %v869_v6  ;;  %v1136_v6 = vcombine.high %v3679_v23, %v3679_v23 }
 0x45b   :  { %1855 = vmatpush1.bf16.msra.mxu0 %v868_v3  ;;  %2860 = vmatpush1.bf16.msra.mxu1 %v868_v3  ;;  %v2921_v3 = vsub.s32 0, %v3298_v5 }
 0x45c   :  { %1856 = vmatprep.subr.bf16.mxu0 %v871_v1  ;;  %2861 = vmatprep.subr.bf16.mxu1 %v871_v1  ;;  %v2917_v1 = vld [vmem:[#allocation5] sm:$0x3] }
 0x45f   :  { %1857 = vmatpush1.bf16.msra.mxu0 %v870_v7  ;;  %2862 = vmatpush1.bf16.msra.mxu1 %v870_v7  ;;  %v2922_v7 = vrot.slane %v2917_v1, %v2921_v3 }
 0x460   :  { %1858 = vmatprep.subr.bf16.mxu0 %v873_v10  ;;  %2863 = vmatprep.subr.bf16.mxu1 %v873_v10  ;;  %v2926_v10 = vrot.slane %v2917_v1, %v2925_v2 }
 0x463   :  { %1859 = vmatpush1.bf16.msra.mxu0 %v872_v19  ;;  %2864 = vmatpush1.bf16.msra.mxu1 %v872_v19 }
 0x464   :  { %1860 = vmatprep.subr.bf16.mxu0 %v875_v20  ;;  %2865 = vmatprep.subr.bf16.mxu1 %v875_v20 }
 0x467   :  { %1861 = vmatpush1.bf16.msra.mxu0 %v874_v12  ;;  %2866 = vmatpush1.bf16.msra.mxu1 %v874_v12 }
 0x468   :  { %1871 = vmatprep.subr.bf16.mxu0 %v877_v18  ;;  %2876 = vmatprep.subr.bf16.mxu1 %v877_v18 }
 0x46a   :  { %1863 = vmatmul.mubr.bf16.vlgmr.msra.gmra.mrb[0].mxu0 %v3679_v23  ;;  %2868 = vmatmul.mubr.bf16.vlgmr.msra.gmra.mrb[0].mxu1 %v3683_v13 }
 0x46b   :  { %1872 = vmatpush1.bf16.msra.mxu0 %v876_v17  ;;  %2877 = vmatpush1.bf16.msra.mxu1 %v876_v17 }
 0x46c   :  { %1873 = vmatprep.subr.bf16.mxu0 %v879_v26  ;;  %2878 = vmatprep.subr.bf16.mxu1 %v879_v26 }
 0x46d   :  { %1903 = vmatprep.mubr.bf16.mxu0 %v1137_v32  ;;  %2908 = vmatprep.mubr.bf16.mxu1 %v2142_v37 }
 0x46f   :  { %1874 = vmatpush1.bf16.msra.mxu0 %v878_v14  ;;  %2879 = vmatpush1.bf16.msra.mxu1 %v878_v14 }
 0x470   :  { %1875 = vmatprep.subr.bf16.mxu0 %v881_v24  ;;  %2880 = vmatprep.subr.bf16.mxu1 %v881_v24 }
 0x473   :  { %1876 = vmatpush1.bf16.msra.mxu0 %v880_v27  ;;  %2881 = vmatpush1.bf16.msra.mxu1 %v880_v27 }
 0x474   :  { %1877 = vmatprep.subr.bf16.mxu0 %v883_v28  ;;  %2882 = vmatprep.subr.bf16.mxu1 %v883_v28 }
 0x477   :  { %1878 = vmatpush1.bf16.msra.mxu0 %v882_v33  ;;  %2883 = vmatpush1.bf16.msra.mxu1 %v882_v33 }
 0x478   :  { %1879 = vmatprep.subr.bf16.mxu0 %v885_v30  ;;  %2884 = vmatprep.subr.bf16.mxu1 %v885_v30 }
 0x47b   :  { %1880 = vmatpush1.bf16.msra.mxu0 %v884_v34  ;;  %2885 = vmatpush1.bf16.msra.mxu1 %v884_v34 }
 0x47c   :  { %1881 = vmatprep.subr.bf16.mxu0 %v887_v39  ;;  %2886 = vmatprep.subr.bf16.mxu1 %v887_v39 }
 0x47f   :  { %1882 = vmatpush1.bf16.msra.mxu0 %v886_v36  ;;  %2887 = vmatpush1.bf16.msra.mxu1 %v886_v36 }
 0x480   :  { %1883 = vmatprep.subr.bf16.mxu0 %v889_v46  ;;  %2888 = vmatprep.subr.bf16.mxu1 %v889_v46 }
 0x483   :  { %1884 = vmatpush1.bf16.msra.mxu0 %v888_v42  ;;  %2889 = vmatpush1.bf16.msra.mxu1 %v888_v42 }
 0x484   :  { %1885 = vmatprep.subr.bf16.mxu0 %v891_v47  ;;  %2890 = vmatprep.subr.bf16.mxu1 %v891_v47 }
 0x487   :  { %1886 = vmatpush1.bf16.msra.mxu0 %v890_v45  ;;  %2891 = vmatpush1.bf16.msra.mxu1 %v890_v45 }
 0x488   :  { %1887 = vmatprep.subr.bf16.mxu0 %v893_v41  ;;  %2892 = vmatprep.subr.bf16.mxu1 %v893_v41 }
 0x48b   :  { %1888 = vmatpush1.bf16.msra.mxu0 %v892_v48  ;;  %2893 = vmatpush1.bf16.msra.mxu1 %v892_v48 }
 0x48c   :  { %1889 = vmatprep.subr.bf16.mxu0 %v895_v43  ;;  %2894 = vmatprep.subr.bf16.mxu1 %v895_v43 }
 0x48f   :  { %1890 = vmatpush1.bf16.msra.mxu0 %v894_v15  ;;  %2895 = vmatpush1.bf16.msra.mxu1 %v894_v15 }
 0x490   :  { %1891 = vmatprep.subr.bf16.mxu0 %v897_v53  ;;  %2896 = vmatprep.subr.bf16.mxu1 %v897_v53 }
 0x493   :  { %1892 = vmatpush1.bf16.msra.mxu0 %v896_v51  ;;  %2897 = vmatpush1.bf16.msra.mxu1 %v896_v51 }
 0x494   :  { %1893 = vmatprep.subr.bf16.mxu0 %v899_v58  ;;  %2898 = vmatprep.subr.bf16.mxu1 %v899_v58 }
 0x497   :  { %1894 = vmatpush1.bf16.msra.mxu0 %v898_v59  ;;  %2899 = vmatpush1.bf16.msra.mxu1 %v898_v59 }
 0x498   :  { %1895 = vmatprep.subr.bf16.mxu0 %v901_v52  ;;  %2900 = vmatprep.subr.bf16.mxu1 %v901_v52 }
 0x49b   :  { %1896 = vmatpush1.bf16.msra.mxu0 %v900_v56  ;;  %2901 = vmatpush1.bf16.msra.mxu1 %v900_v56 }
 0x49c   :  { %1897 = vmatprep.subr.bf16.mxu0 %v903_v57  ;;  %2902 = vmatprep.subr.bf16.mxu1 %v903_v57 }
 0x49f   :  { %1898 = vmatpush1.bf16.msra.mxu0 %v902_v63  ;;  %2903 = vmatpush1.bf16.msra.mxu1 %v902_v63 }
 0x4a0   :  { %1899 = vmatprep.subr.bf16.mxu0 %v905_v4  ;;  %2904 = vmatprep.subr.bf16.mxu1 %v905_v4 }
 0x4a3   :  { %1900 = vmatpush1.bf16.msra.mxu0 %v904_v61  ;;  %2905 = vmatpush1.bf16.msra.mxu1 %v904_v61 }
 0x4a4   :  { %1901 = vmatprep.subr.bf16.mxu0 %v907_v62  ;;  %2906 = vmatprep.subr.bf16.mxu1 %v907_v62 }
 0x4a7   :  { %1902 = vmatpush1.bf16.msra.mxu0 %v906_v9  ;;  %2907 = vmatpush1.bf16.msra.mxu1 %v906_v9 }
 0x4aa   :  { %1904 = vmatmul.mubr.bf16.vlgmr.msra.gmra.mrb[0].mxu0 %v1136_v6  ;;  %2909 = vmatmul.mubr.bf16.vlgmr.msra.gmra.mrb[0].mxu1 %v2141_v0 }
 0x57d   :  { %v1905_v11 = vpop.f32.mrb[0].mxu0  ;;  %v2910_v19 = vpop.f32.mrb[0].mxu1 }
 0x57e   :  { %v2929_v20 = vmul.f32 %v2922_v7, %v1905_v11  ;;  %v2931_v21 = vmul.f32 %v2922_v7, %v2910_v19  ;;  %v1907_v12 = vpop.f32.mrb[1].mxu0  ;;  %v2912_v18 = vpop.f32.mrb[1].mxu1 }
 0x57f   :  { %v2930_v22 = vmul.f32 %v2926_v10, %v1907_v12  ;;  %v2932_v23 = vmul.f32 %v2926_v10, %v2912_v18  ;;  %v1909_v13 = vpop.f32.mrb[2].mxu0  ;;  %v2914_v17 = vpop.f32.mrb[2].mxu1 }
 0x580   :  { %v2941_v26 = vmul.f32 %v2929_v20, %v2929_v20  ;;  %v2933_v29 = vmul.f32 %v2931_v21, %v2929_v20  ;;  %v2948_v32 = vmul.f32 %v2931_v21, %v2931_v21  ;;  %v1910_v37 = vpop.f32.mrb[3].mxu0  ;;  %v2915_v14 = vpop.f32.mrb[3].mxu1 }
 0x581   :  { %v2942_v24 = vmul.f32 %v2930_v22, %v2930_v22  ;;  %v2934_v5 = vmul.f32 %v2932_v23, %v2930_v22  ;;  %v2949_v25 = vmul.f32 %v2932_v23, %v2932_v23 }
 0x582   :  { %v2943_v27 = vsel %vm2935_vm0, %v2941_v26, 0.0  ;;  %v2936_v28 = vsel %vm2935_vm0, %v2933_v29, 0.0  ;;  %v2950_v38 = vsel %vm2935_vm0, %v2948_v32, 0.0 }
 0x583   :  { %v2944_v33 = vsel %vm2935_vm0, %v2942_v24, 0.0  ;;  %v2937_v30 = vsel %vm2935_vm0, %v2934_v5, 0.0  ;;  %v2951_v31 = vsel %vm2935_vm0, %v2949_v25, 0.0 }
 0x584   :  { %v2945_v34 = vadd.f32 %v2944_v33, %v2943_v27  ;;  %v2938_v39 = vadd.f32 %v2937_v30, %v2936_v28  ;;  %v2952_v35 = vadd.f32 %v2951_v31, %v2950_v38 }
 0x586   :  { %2946 = vadd.xlane.f32.xlu0 %v2945_v34  ;;  %2939 = vadd.xlane.f32.xlu1 %v2938_v39 }
 0x58a   :  { %2953 = vadd.xlane.f32.xlu0 %v2952_v35 }
 0x613   :  { %v2947_v36 = vpop.xlane.xlu0 %2946  ;;  %v2940_v40 = vpop.xlane.xlu1 %2939 }
 0x614   :  { %v2955_v46 = vmax.f32 %v2947_v36, 1e-16 }
 0x616   :  { %3166 = vrsqrt.f32 %v2955_v46 }
 0x617   :  { %v2954_v49 = vpop.xlane.xlu0 %2953 }
 0x618   :  { %v2957_v42 = vmax.f32 %v2954_v49, 1e-16 }
 0x61a   :  { %3168 = vrsqrt.f32 %v2957_v42 }
 0x620   :  { %v3167_v47 = vpop.eup %3166 }
 0x621   :  { %v2959_v45 = vmul.f32 %v3167_v47, %v2940_v40 }
 0x624   :  { %v3169_v41 = vpop.eup %3168 }
 0x625   :  { %v2960_v44 = vmul.f32 %v3169_v41, %v2959_v45 }
 0x627   :  { %v2961_v48 = vsub.f32 1.0, %v2960_v44 }
 0x629   :  { %v2963_v43 = vsel %vm2962_vm1, %v2961_v48, 0.0 }
 0x62a   :  { %2964 = vadd.xlane.f32.xlu1 %v2963_v43 }
 0x6b7   :  { %v2965_v50 = vpop.xlane.xlu1 %2964 }
 0x6b8   :  { %v2966_v15 = vrot.slane %v2965_v50, 4 }
 0x6ba   :  { %v2967_v53 = vadd.f32 %v2966_v15, %v2965_v50 }
 0x6bc   :  { %v2968_v54 = vrot.slane %v2967_v53, 2 }
 0x6be   :  { %v2969_v51 = vadd.f32 %v2968_v54, %v2967_v53 }
 0x6c0   :  { %v2970_v58 = vrot.slane %v2969_v51, 1 }
 0x6c2   :  { %v2971_v16 = vadd.f32 %v2970_v58, %v2969_v51 }
 0x6c4   :  { %3149 = vpush %v2971_v16 }
 0x6f5   :  { %s3150_s0 = spop %3149 }
 0x6f6   :  { %s2973_s7 = smul.f32 0.5, %s3150_s0 }
 0x6f8   :  { %s2976_s8 = smul.f32 0.5, %s2973_s7  ;;  %2975 = sst [smem:[#allocation7]] %s2973_s7 }
 0x6f9   :  { %3223 = shalt.err (!%p3220_p4)
}
 0x6fa   :  { %s3247_s14 = smov [#allocation7]   ;;  %2978 = sst [smem:[#allocation8]] %s2976_s8 }
 0x6fb   :  { %2986 = dma.smem_to_hbm %s3247_s14, 16, %s3724_s3, [#allocation4]  }
 0x6fc   :  { %s3224_s19 = scalar_lea.hbm %s3725_s4, 16 }
 0x6fd   :  { %p3225_p5 = scmp.ne.s32.totalorder %s3725_s4, %s3224_s19  ;;  %p3228_p6 = scmp.lt.u32.totalorder %s3224_s19, %s3725_s4 }
 0x6ff   :  { %p3230_p7 = pnand %p3228_p6, %p3225_p5 }
 0x701   :  { %3233 = shalt.err (!%p3230_p7)
}
 0x702   :  { %s3248_s24 = smov [#allocation8]  }
 0x703   :  { %2994 = dma.smem_to_hbm %s3248_s24, 16, %s3725_s4, [#allocation9]  }
 0x704   :  { %3238 = dma.done.wait [#allocation4], 16  }
 0x705   :  { %3239 = vsyncadd [#allocation4], 4294967280 }
 0x706   :  { %3240 = dma.done.wait [#allocation9], 16  }
 0x707   :  { %3241 = vsyncadd [#allocation9], 4294967280 }
 0x708   :  { %3001 = sfence }
 0x709   :  { %3002 = vsyncpa [#allocation3], 1 }
 0x70a   :  { %3003 = vsyncpa [#allocation6], 1 }
 0x70b   :  { %3004 = vsyncpa [#allocation4], 1 }
 0x70c   :  { %3005 = vsyncpa [#allocation9], 1 }

</bundles_post_ra>
